<compile_context>
chip_gen: v5e
topology: v5e:2x2
jax: 0.10.0
libtpu: 0.0.40
codegen_flags: <defaults>
</compile_context>

<pallas_src>
import functools

import jax
import jax.numpy as jnp
from jax.experimental import pallas as pl
from jax.experimental.pallas import tpu as pltpu


def _vmem_capacity_bytes():
    """Physical per-core VMEM, with a conservative fallback (v7x = 64 MiB)."""
    try:
        info = pltpu.get_tpu_info()
        cap = getattr(info, "vmem_capacity_bytes", None)
        if cap:
            return int(cap)
    except Exception:
        pass
    return 64 << 20


# ---------------------------------------------------------------------------
# Shared in-kernel math: channel attention, channel scaling, spatial attention.
# Everything is f32; callers cast once at the final store.
# ---------------------------------------------------------------------------
def _cbam_attention(xf, w1f, w2f, row, col, cw_ref, cb_ref, H, W, K):
    """xf: (C, HW) f32.  Returns (ca (C,1), sa (1,HW), out1 = xf*ca (C,HW))."""
    f32 = jnp.float32
    C, HW = xf.shape
    pad = K // 2

    # ---- channel attention: global max / avg pool + shared SE MLP (MXU) ----
    max_p = jnp.max(xf, axis=1, keepdims=True)                     # (C, 1)
    avg_p = jnp.sum(xf, axis=1, keepdims=True) * (1.0 / HW)        # (C, 1)
    # se(max) + se(avg) == w2 @ (relu(w1 @ max) + relu(w1 @ avg)): 3 matvecs.
    h = (jnp.maximum(jnp.dot(w1f, max_p, preferred_element_type=f32), 0.0)
         + jnp.maximum(jnp.dot(w1f, avg_p, preferred_element_type=f32), 0.0))
    ca = jax.nn.sigmoid(jnp.dot(w2f, h, preferred_element_type=f32))   # (C, 1)

    # ---- channel scaling + channel-wise max / mean pooling ----
    out1 = xf * ca                                                  # (C, HW)
    sp_max = jnp.max(out1, axis=0, keepdims=True)                   # (1, HW)
    # Mean over channels as an MXU ones-matvec (keeps the C-sum off the VALU).
    sp_avg = jnp.dot(jnp.ones((1, C), f32), out1,
                     preferred_element_type=f32) * (1.0 / C)        # (1, HW)

    # ---- K x K (2 -> 1) "same" conv + bias + sigmoid, in flattened lane space
    # Tap (kh, kw) is a lane shift by dh*W + dw (dh = kh - pad, dw = kw - pad);
    # positions whose source pixel (h+dh, w+dw) falls outside the H x W map
    # are masked to zero, which also masks the circular wrap of the roll.
    # TODO(synk): for K >= ~15 (incl. the module default 49) switch to an
    # im2col + MXU matmul instead of unrolled roll-taps.
    acc = jnp.zeros((1, HW), f32)
    for kh in range(K):
        dh = kh - pad
        if dh <= -H or dh >= H:            # tap never hits the map
            continue
        for kw in range(K):
            dw = kw - pad
            if dw <= -W or dw >= W:
                continue
            off = dh * W + dw
            sh = (-off) % HW
            sm = pltpu.roll(sp_max, sh, 1) if sh else sp_max
            sv = pltpu.roll(sp_avg, sh, 1) if sh else sp_avg
            tap = (cw_ref[kh * K + kw] * sm
                   + cw_ref[K * K + kh * K + kw] * sv)
            conds = []
            if dw > 0:
                conds.append(col < W - dw)
            elif dw < 0:
                conds.append(col >= -dw)
            if dh > 0:
                conds.append(row < H - dh)
            elif dh < 0:
                conds.append(row >= -dh)
            if conds:
                tap = jnp.where(functools.reduce(lambda a, b: a & b, conds),
                                tap, 0.0)
            acc = acc + tap
    sa = jax.nn.sigmoid(acc + cb_ref[0])                            # (1, HW)
    return ca, sa, out1


# ---------------------------------------------------------------------------
# Kernels
# ---------------------------------------------------------------------------
def _cbam_fused_kernel(x_ref, w1_ref, w2_ref, rc_ref, cw_ref, cb_ref, o_ref,
                       *, H, W, K):
    f32 = jnp.float32
    xf = x_ref[...].astype(f32)                                     # (C, HW)
    ca, sa, out1 = _cbam_attention(
        xf, w1_ref[...].astype(f32), w2_ref[...].astype(f32),
        rc_ref[0:1, :], rc_ref[1:2, :], cw_ref, cb_ref, H, W, K)
    # out = (x * ca) * sa + x, in f32, single cast at the store.
    o_ref[...] = (xf + out1 * sa).astype(o_ref.dtype)


def _cbam_attn_kernel(x_ref, w1_ref, w2_ref, rc_ref, cw_ref, cb_ref,
                      ca_ref, sa_ref, *, H, W, K):
    f32 = jnp.float32
    xf = x_ref[...].astype(f32)
    ca, sa, _ = _cbam_attention(
        xf, w1_ref[...].astype(f32), w2_ref[...].astype(f32),
        rc_ref[0:1, :], rc_ref[1:2, :], cw_ref, cb_ref, H, W, K)
    ca_ref[...] = ca.astype(ca_ref.dtype)
    sa_ref[...] = sa.astype(sa_ref.dtype)


def _cbam_apply_kernel(x_ref, ca_ref, sa_ref, o_ref):
    f32 = jnp.float32
    xf = x_ref[...].astype(f32)                                     # (C, T)
    o_ref[...] = (xf + (xf * ca_ref[...]) * sa_ref[...]).astype(o_ref.dtype)


# ---------------------------------------------------------------------------
# Wrapper
# ---------------------------------------------------------------------------
@jax.jit
def cbam_forward(x, w1, w2, conv_w, conv_b):
    """CBAMBlock.forward.

    x:      (B, C, H, W)   NCHW feature map
    w1:     (C//r, C)      ChannelAttention.se[0] 1x1 conv weight (no bias)
    w2:     (C, C//r)      ChannelAttention.se[2] 1x1 conv weight (no bias)
    conv_w: (1, 2, K, K)   SpatialAttention.conv weight
    conv_b: (1,)           SpatialAttention.conv bias
    """
    B, C, H, W = x.shape
    HW = H * W
    Cmid = w1.shape[0]
    K = conv_w.shape[-1]
    f32 = jnp.float32
    xb = x.dtype.itemsize

    x3 = x.reshape(B, C, HW)                     # free, lane-dense last dim
    cw = conv_w.reshape(-1).astype(f32)          # (2*K*K,) -> SMEM
    cb = conv_b.reshape(-1).astype(f32)          # (1,)     -> SMEM
    idx = jnp.arange(HW, dtype=jnp.int32)
    rc = jnp.stack([idx // W, idx % W], axis=0)  # (2, HW): row / col per lane

    cap = _vmem_capacity_bytes()
    # Rough per-grid-step VMEM for the fused kernel: double-buffered x block,
    # double-buffered out block, plus f32 temporaries (xf / out1 / product).
    est_fused = C * HW * (4 * xb + 12) + 2 * C * Cmid * 4 + 32 * HW + (1 << 20)
    use_fused = est_fused <= int(0.85 * cap)

    common_in_specs = [
        pl.BlockSpec((None, C, HW), lambda b: (b, 0, 0)),
        pl.BlockSpec((Cmid, C), lambda b: (0, 0)),
        pl.BlockSpec((C, Cmid), lambda b: (0, 0)),
        pl.BlockSpec((2, HW), lambda b: (0, 0)),
        pl.BlockSpec(memory_space=pltpu.MemorySpace.SMEM),
        pl.BlockSpec(memory_space=pltpu.MemorySpace.SMEM),
    ]

    if use_fused:
        # ---- fast path: everything fused, 1 read + 1 write of x ------------
        vmem_limit = int(min(0.92 * cap, max(est_fused + (2 << 20), 32 << 20)))
        out3 = pl.pallas_call(
            functools.partial(_cbam_fused_kernel, H=H, W=W, K=K),
            out_shape=jax.ShapeDtypeStruct((B, C, HW), x.dtype),
            grid_spec=pltpu.PrefetchScalarGridSpec(
                num_scalar_prefetch=0,
                grid=(B,),
                in_specs=common_in_specs,
                out_specs=pl.BlockSpec((None, C, HW), lambda b: (b, 0, 0)),
            ),
            compiler_params=pltpu.CompilerParams(
                dimension_semantics=("parallel",),
                vmem_limit_bytes=vmem_limit),
        )(x3, w1, w2, rc, cw, cb)
        return out3.reshape(B, C, H, W)

    # ---- fallback: attention kernel (per-batch slab) + HW-tiled apply ------
    # TODO(synk): for slabs whose (C, HW) f32 working set itself exceeds VMEM,
    # the attention kernel would additionally need an HW-tiled two-pass
    # channel attention; not needed for typical CBAM feature-map sizes.
    est_attn = C * HW * (2 * xb + 8) + 2 * C * Cmid * 4 + 32 * HW + (1 << 20)
    vmem_attn = int(min(0.92 * cap, max(est_attn + (2 << 20), 32 << 20)))
    ca, sa = pl.pallas_call(
        functools.partial(_cbam_attn_kernel, H=H, W=W, K=K),
        out_shape=(jax.ShapeDtypeStruct((B, C, 1), f32),
                   jax.ShapeDtypeStruct((B, 1, HW), f32)),
        grid_spec=pltpu.PrefetchScalarGridSpec(
            num_scalar_prefetch=0,
            grid=(B,),
            in_specs=common_in_specs,
            out_specs=(pl.BlockSpec((None, C, 1), lambda b: (b, 0, 0)),
                       pl.BlockSpec((None, 1, HW), lambda b: (b, 0, 0))),
        ),
        compiler_params=pltpu.CompilerParams(
            dimension_semantics=("parallel",),
            vmem_limit_bytes=vmem_attn),
    )(x3, w1, w2, rc, cw, cb)

    # HW-tiled elementwise apply: out = (x*ca)*sa + x.  Many pipeline steps,
    # bounded VMEM, lane-dense 128-multiple tiles, both grid axes parallel.
    per_lane = C * (4 * xb + 8) + 16
    t = max(((8 << 20) // per_lane) // 128 * 128, 128)
    hw_tile = HW if t >= HW else t
    n_hw = pl.cdiv(HW, hw_tile)
    vmem_apply = int(min(0.92 * cap, max(2 * per_lane * hw_tile, 32 << 20)))
    out3 = pl.pallas_call(
        _cbam_apply_kernel,
        out_shape=jax.ShapeDtypeStruct((B, C, HW), x.dtype),
        grid_spec=pltpu.PrefetchScalarGridSpec(
            num_scalar_prefetch=0,
            grid=(B, n_hw),
            in_specs=[
                pl.BlockSpec((None, C, hw_tile), lambda b, j: (b, 0, j)),
                pl.BlockSpec((None, C, 1), lambda b, j: (b, 0, 0)),
                pl.BlockSpec((None, 1, hw_tile), lambda b, j: (b, 0, j)),
            ],
            out_specs=pl.BlockSpec((None, C, hw_tile), lambda b, j: (b, 0, j)),
        ),
        compiler_params=pltpu.CompilerParams(
            dimension_semantics=("parallel", "parallel"),
            vmem_limit_bytes=vmem_apply),
    )(x3, ca, sa)
    return out3.reshape(B, C, H, W)


# ---------------------------------------------------------------------------
# Pure-JAX reference (matches the PyTorch CBAMBlock forward)
# ---------------------------------------------------------------------------
def _cbam_ref(x, w1, w2, conv_w, conv_b):
    K = conv_w.shape[-1]
    max_p = jnp.max(x, axis=(2, 3))                       # (B, C)
    avg_p = jnp.mean(x, axis=(2, 3))                      # (B, C)

    def se(v):
        return jnp.maximum(v @ w1.T, 0.0) @ w2.T

    ca = jax.nn.sigmoid(se(max_p) + se(avg_p))            # (B, C)
    out = x * ca[:, :, None, None]
    sp = jnp.concatenate(
        [jnp.max(out, axis=1, keepdims=True),
         jnp.mean(out, axis=1, keepdims=True)], axis=1)   # (B, 2, H, W)
    conv = jax.lax.conv_general_dilated(
        sp, conv_w, window_strides=(1, 1),
        padding=[(K // 2, K // 2), (K // 2, K // 2)],
        dimension_numbers=("NCHW", "OIHW", "NCHW"))
    sa = jax.nn.sigmoid(conv + conv_b.reshape(1, 1, 1, 1))
    return out * sa + x


if __name__ == "__main__":
    # Small shapes consistent with the module (channels divisible by the
    # reduction).  K=7 is the classic CBAM spatial kernel size; the module's
    # default K=49 would unroll 2*49*49 conv taps (see TODO above).
    B, C, H, W = 2, 32, 16, 16
    reduction = 16
    K = 7
    Cmid = C // reduction

    key = jax.random.PRNGKey(0)
    kx, k1, k2, k3, k4 = jax.random.split(key, 5)
    x = jax.random.normal(kx, (B, C, H, W), dtype=jnp.float32)
    w1 = jax.random.normal(k1, (Cmid, C), dtype=jnp.float32) * 0.2
    w2 = jax.random.normal(k2, (C, Cmid), dtype=jnp.float32) * 0.2
    conv_w = jax.random.normal(k3, (1, 2, K, K), dtype=jnp.float32) * 0.1
    conv_b = jax.random.normal(k4, (1,), dtype=jnp.float32) * 0.1

    out = jax.block_until_ready(cbam_forward(x, w1, w2, conv_w, conv_b))
    ref = _cbam_ref(x, w1, w2, conv_w, conv_b)

    assert out.shape == x.shape and out.dtype == x.dtype
    max_err = float(jnp.max(jnp.abs(out - ref)))
    # Tolerance covers the backend's choice of bf16-pass emulation for f32
    # matmuls (the MXU has no native f32 mode) on either the Pallas-kernel or
    # the XLA-reference side; with matching precision the error is ~1e-6.
    assert jnp.allclose(out, ref, atol=1e-2, rtol=1e-2), f"max abs err {max_err}"
    print("KERNEL_OK")
</pallas_src>

<mosaic_0001>
module attributes {stable_mosaic.version = 11 : i64} {
  func.func @_cbam_fused_kernel(%arg0: i32, %arg1: memref<1x32x256xf32, #tpu.memory_space<vmem>>, %arg2: memref<2x32xf32, #tpu.memory_space<vmem>>, %arg3: memref<32x2xf32, #tpu.memory_space<vmem>>, %arg4: memref<2x256xi32, #tpu.memory_space<vmem>>, %arg5: memref<98xf32, #tpu.memory_space<smem>>, %arg6: memref<1xf32, #tpu.memory_space<smem>>, %arg7: memref<1x32x256xf32, #tpu.memory_space<vmem>>) attributes {dimension_semantics = [#tpu.dimension_semantics<parallel>], iteration_bounds = array<i64: 2>, scalar_prefetch = 0 : i64, scratch_operands = 0 : i64, tpu.core_type = #tpu.core_type<tc>, window_params = [{transform_indices = @transform_0, window_bounds = array<i64: 1, 32, 256>}, {pipeline_mode = #tpu.pipeline_mode<synchronous>, transform_indices = @transform_1, window_bounds = array<i64: 2, 32>}, {pipeline_mode = #tpu.pipeline_mode<synchronous>, transform_indices = @transform_2, window_bounds = array<i64: 32, 2>}, {pipeline_mode = #tpu.pipeline_mode<synchronous>, transform_indices = @transform_3, window_bounds = array<i64: 2, 256>}, {transform_indices = @transform_4, window_bounds = array<i64: 98>}, {transform_indices = @transform_5, window_bounds = array<i64: 1>}, {transform_indices = @transform_6, window_bounds = array<i64: 1, 32, 256>}]} {
    %c0 = arith.constant 0 : index
    %c0_0 = arith.constant 0 : index
    %c0_1 = arith.constant 0 : index
    %0 = vector.load %arg1[%c0, %c0_0, %c0_1] : memref<1x32x256xf32, #tpu.memory_space<vmem>>, vector<1x32x256xf32>
    %1 = vector.shape_cast %0 : vector<1x32x256xf32> to vector<32x256xf32>
    %c0_2 = arith.constant 0 : index
    %c0_3 = arith.constant 0 : index
    %2 = vector.load %arg2[%c0_2, %c0_3] : memref<2x32xf32, #tpu.memory_space<vmem>>, vector<2x32xf32>
    %c0_4 = arith.constant 0 : index
    %c0_5 = arith.constant 0 : index
    %3 = vector.load %arg3[%c0_4, %c0_5] : memref<32x2xf32, #tpu.memory_space<vmem>>, vector<32x2xf32>
    %c0_6 = arith.constant 0 : index
    %c0_7 = arith.constant 0 : index
    %4 = vector.load %arg4[%c0_6, %c0_7] : memref<2x256xi32, #tpu.memory_space<vmem>>, vector<1x256xi32>
    %c1 = arith.constant 1 : index
    %c0_8 = arith.constant 0 : index
    %5 = vector.load %arg4[%c1, %c0_8] : memref<2x256xi32, #tpu.memory_space<vmem>>, vector<1x256xi32>
    %cst = arith.constant dense<0xFF800000> : vector<32xf32>
    %6 = vector.multi_reduction <maximumf>, %1, %cst [1] : vector<32x256xf32> to vector<32xf32>
    %7 = vector.shape_cast %6 : vector<32xf32> to vector<32x1xf32>
    %cst_9 = arith.constant dense<0.000000e+00> : vector<32xf32>
    %8 = vector.multi_reduction <add>, %1, %cst_9 [1] : vector<32x256xf32> to vector<32xf32>
    %9 = vector.shape_cast %8 : vector<32xf32> to vector<32x1xf32>
    %cst_10 = arith.constant 3.906250e-03 : f32
    %10 = vector.broadcast %cst_10 : f32 to vector<32x1xf32>
    %11 = arith.mulf %9, %10 : vector<32x1xf32>
    %cst_11 = arith.constant dense<0.000000e+00> : vector<2x1xf32>
    %12 = tpu.matmul %2, %7, %cst_11 {dimension_numbers = #tpu.dot_dimension_numbers<[1], [0], [0], [1], [0, 0, 1, 1], [], []>} : vector<2x32xf32>, vector<32x1xf32>, vector<2x1xf32> -> vector<2x1xf32>
    %cst_12 = arith.constant 0.000000e+00 : f32
    %13 = vector.broadcast %cst_12 : f32 to vector<2x1xf32>
    %14 = arith.maximumf %12, %13 : vector<2x1xf32>
    %cst_13 = arith.constant dense<0.000000e+00> : vector<2x1xf32>
    %15 = tpu.matmul %2, %11, %cst_13 {dimension_numbers = #tpu.dot_dimension_numbers<[1], [0], [0], [1], [0, 0, 1, 1], [], []>} : vector<2x32xf32>, vector<32x1xf32>, vector<2x1xf32> -> vector<2x1xf32>
    %cst_14 = arith.constant 0.000000e+00 : f32
    %16 = vector.broadcast %cst_14 : f32 to vector<2x1xf32>
    %17 = arith.maximumf %15, %16 : vector<2x1xf32>
    %18 = arith.addf %14, %17 : vector<2x1xf32>
    %cst_15 = arith.constant dense<0.000000e+00> : vector<32x1xf32>
    %19 = tpu.matmul %3, %18, %cst_15 {dimension_numbers = #tpu.dot_dimension_numbers<[1], [0], [0], [1], [0, 0, 1, 1], [], []>} : vector<32x2xf32>, vector<2x1xf32>, vector<32x1xf32> -> vector<32x1xf32>
    %20 = arith.negf %19 : vector<32x1xf32>
    %21 = math.exp %20 : vector<32x1xf32>
    %cst_16 = arith.constant 1.000000e+00 : f32
    %22 = vector.broadcast %cst_16 : f32 to vector<32x1xf32>
    %23 = arith.addf %22, %21 : vector<32x1xf32>
    %24 = arith.divf %22, %23 : vector<32x1xf32>
    %25 = vector.broadcast %24 : vector<32x1xf32> to vector<32x256xf32>
    %26 = arith.mulf %1, %25 : vector<32x256xf32>
    %cst_17 = arith.constant dense<0xFF800000> : vector<256xf32>
    %27 = vector.multi_reduction <maximumf>, %26, %cst_17 [0] : vector<32x256xf32> to vector<256xf32>
    %28 = vector.shape_cast %27 : vector<256xf32> to vector<1x256xf32>
    %cst_18 = arith.constant 1.000000e+00 : f32
    %29 = vector.broadcast %cst_18 : f32 to vector<1x32xf32>
    %cst_19 = arith.constant dense<0.000000e+00> : vector<1x256xf32>
    %30 = tpu.matmul %29, %26, %cst_19 {dimension_numbers = #tpu.dot_dimension_numbers<[1], [0], [0], [1], [0, 0, 1, 1], [], []>} : vector<1x32xf32>, vector<32x256xf32>, vector<1x256xf32> -> vector<1x256xf32>
    %cst_20 = arith.constant 3.125000e-02 : f32
    %31 = vector.broadcast %cst_20 : f32 to vector<1x256xf32>
    %32 = arith.mulf %30, %31 : vector<1x256xf32>
    %cst_21 = arith.constant 0.000000e+00 : f32
    %33 = vector.broadcast %cst_21 : f32 to vector<1x256xf32>
    %c51_i32 = arith.constant 51 : i32
    %34 = tpu.dynamic_rotate %28 by %c51_i32 dim 1 : vector<1x256xf32>, i32 -> vector<1x256xf32>
    %c51_i32_22 = arith.constant 51 : i32
    %35 = tpu.dynamic_rotate %32 by %c51_i32_22 dim 1 : vector<1x256xf32>, i32 -> vector<1x256xf32>
    %c0_23 = arith.constant 0 : index
    %36 = memref.load %arg5[%c0_23] : memref<98xf32, #tpu.memory_space<smem>>
    %37 = vector.broadcast %36 : f32 to vector<1x256xf32>
    %38 = arith.mulf %37, %34 : vector<1x256xf32>
    %c49 = arith.constant 49 : index
    %39 = memref.load %arg5[%c49] : memref<98xf32, #tpu.memory_space<smem>>
    %40 = vector.broadcast %39 : f32 to vector<1x256xf32>
    %41 = arith.mulf %40, %35 : vector<1x256xf32>
    %42 = arith.addf %38, %41 : vector<1x256xf32>
    %c3_i32 = arith.constant 3 : i32
    %43 = vector.broadcast %c3_i32 : i32 to vector<1x256xi32>
    %44 = arith.cmpi sge, %5, %43 : vector<1x256xi32>
    %c3_i32_24 = arith.constant 3 : i32
    %45 = vector.broadcast %c3_i32_24 : i32 to vector<1x256xi32>
    %46 = arith.cmpi sge, %4, %45 : vector<1x256xi32>
    %47 = arith.andi %44, %46 : vector<1x256xi1>
    %cst_25 = arith.constant 0.000000e+00 : f32
    %48 = vector.broadcast %cst_25 : f32 to vector<1x256xf32>
    %49 = arith.select %47, %42, %48 : vector<1x256xi1>, vector<1x256xf32>
    %50 = arith.addf %33, %49 : vector<1x256xf32>
    %c50_i32 = arith.constant 50 : i32
    %51 = tpu.dynamic_rotate %28 by %c50_i32 dim 1 : vector<1x256xf32>, i32 -> vector<1x256xf32>
    %c50_i32_26 = arith.constant 50 : i32
    %52 = tpu.dynamic_rotate %32 by %c50_i32_26 dim 1 : vector<1x256xf32>, i32 -> vector<1x256xf32>
    %c1_27 = arith.constant 1 : index
    %53 = memref.load %arg5[%c1_27] : memref<98xf32, #tpu.memory_space<smem>>
    %54 = vector.broadcast %53 : f32 to vector<1x256xf32>
    %55 = arith.mulf %54, %51 : vector<1x256xf32>
    %c50 = arith.constant 50 : index
    %56 = memref.load %arg5[%c50] : memref<98xf32, #tpu.memory_space<smem>>
    %57 = vector.broadcast %56 : f32 to vector<1x256xf32>
    %58 = arith.mulf %57, %52 : vector<1x256xf32>
    %59 = arith.addf %55, %58 : vector<1x256xf32>
    %c2_i32 = arith.constant 2 : i32
    %60 = vector.broadcast %c2_i32 : i32 to vector<1x256xi32>
    %61 = arith.cmpi sge, %5, %60 : vector<1x256xi32>
    %c3_i32_28 = arith.constant 3 : i32
    %62 = vector.broadcast %c3_i32_28 : i32 to vector<1x256xi32>
    %63 = arith.cmpi sge, %4, %62 : vector<1x256xi32>
    %64 = arith.andi %61, %63 : vector<1x256xi1>
    %cst_29 = arith.constant 0.000000e+00 : f32
    %65 = vector.broadcast %cst_29 : f32 to vector<1x256xf32>
    %66 = arith.select %64, %59, %65 : vector<1x256xi1>, vector<1x256xf32>
    %67 = arith.addf %50, %66 : vector<1x256xf32>
    %c49_i32 = arith.constant 49 : i32
    %68 = tpu.dynamic_rotate %28 by %c49_i32 dim 1 : vector<1x256xf32>, i32 -> vector<1x256xf32>
    %c49_i32_30 = arith.constant 49 : i32
    %69 = tpu.dynamic_rotate %32 by %c49_i32_30 dim 1 : vector<1x256xf32>, i32 -> vector<1x256xf32>
    %c2 = arith.constant 2 : index
    %70 = memref.load %arg5[%c2] : memref<98xf32, #tpu.memory_space<smem>>
    %71 = vector.broadcast %70 : f32 to vector<1x256xf32>
    %72 = arith.mulf %71, %68 : vector<1x256xf32>
    %c51 = arith.constant 51 : index
    %73 = memref.load %arg5[%c51] : memref<98xf32, #tpu.memory_space<smem>>
    %74 = vector.broadcast %73 : f32 to vector<1x256xf32>
    %75 = arith.mulf %74, %69 : vector<1x256xf32>
    %76 = arith.addf %72, %75 : vector<1x256xf32>
    %c1_i32 = arith.constant 1 : i32
    %77 = vector.broadcast %c1_i32 : i32 to vector<1x256xi32>
    %78 = arith.cmpi sge, %5, %77 : vector<1x256xi32>
    %c3_i32_31 = arith.constant 3 : i32
    %79 = vector.broadcast %c3_i32_31 : i32 to vector<1x256xi32>
    %80 = arith.cmpi sge, %4, %79 : vector<1x256xi32>
    %81 = arith.andi %78, %80 : vector<1x256xi1>
    %cst_32 = arith.constant 0.000000e+00 : f32
    %82 = vector.broadcast %cst_32 : f32 to vector<1x256xf32>
    %83 = arith.select %81, %76, %82 : vector<1x256xi1>, vector<1x256xf32>
    %84 = arith.addf %67, %83 : vector<1x256xf32>
    %c48_i32 = arith.constant 48 : i32
    %85 = tpu.dynamic_rotate %28 by %c48_i32 dim 1 : vector<1x256xf32>, i32 -> vector<1x256xf32>
    %c48_i32_33 = arith.constant 48 : i32
    %86 = tpu.dynamic_rotate %32 by %c48_i32_33 dim 1 : vector<1x256xf32>, i32 -> vector<1x256xf32>
    %c3 = arith.constant 3 : index
    %87 = memref.load %arg5[%c3] : memref<98xf32, #tpu.memory_space<smem>>
    %88 = vector.broadcast %87 : f32 to vector<1x256xf32>
    %89 = arith.mulf %88, %85 : vector<1x256xf32>
    %c52 = arith.constant 52 : index
    %90 = memref.load %arg5[%c52] : memref<98xf32, #tpu.memory_space<smem>>
    %91 = vector.broadcast %90 : f32 to vector<1x256xf32>
    %92 = arith.mulf %91, %86 : vector<1x256xf32>
    %93 = arith.addf %89, %92 : vector<1x256xf32>
    %c3_i32_34 = arith.constant 3 : i32
    %94 = vector.broadcast %c3_i32_34 : i32 to vector<1x256xi32>
    %95 = arith.cmpi sge, %4, %94 : vector<1x256xi32>
    %cst_35 = arith.constant 0.000000e+00 : f32
    %96 = vector.broadcast %cst_35 : f32 to vector<1x256xf32>
    %97 = arith.select %95, %93, %96 : vector<1x256xi1>, vector<1x256xf32>
    %98 = arith.addf %84, %97 : vector<1x256xf32>
    %c47_i32 = arith.constant 47 : i32
    %99 = tpu.dynamic_rotate %28 by %c47_i32 dim 1 : vector<1x256xf32>, i32 -> vector<1x256xf32>
    %c47_i32_36 = arith.constant 47 : i32
    %100 = tpu.dynamic_rotate %32 by %c47_i32_36 dim 1 : vector<1x256xf32>, i32 -> vector<1x256xf32>
    %c4 = arith.constant 4 : index
    %101 = memref.load %arg5[%c4] : memref<98xf32, #tpu.memory_space<smem>>
    %102 = vector.broadcast %101 : f32 to vector<1x256xf32>
    %103 = arith.mulf %102, %99 : vector<1x256xf32>
    %c53 = arith.constant 53 : index
    %104 = memref.load %arg5[%c53] : memref<98xf32, #tpu.memory_space<smem>>
    %105 = vector.broadcast %104 : f32 to vector<1x256xf32>
    %106 = arith.mulf %105, %100 : vector<1x256xf32>
    %107 = arith.addf %103, %106 : vector<1x256xf32>
    %c15_i32 = arith.constant 15 : i32
    %108 = vector.broadcast %c15_i32 : i32 to vector<1x256xi32>
    %109 = arith.cmpi slt, %5, %108 : vector<1x256xi32>
    %c3_i32_37 = arith.constant 3 : i32
    %110 = vector.broadcast %c3_i32_37 : i32 to vector<1x256xi32>
    %111 = arith.cmpi sge, %4, %110 : vector<1x256xi32>
    %112 = arith.andi %109, %111 : vector<1x256xi1>
    %cst_38 = arith.constant 0.000000e+00 : f32
    %113 = vector.broadcast %cst_38 : f32 to vector<1x256xf32>
    %114 = arith.select %112, %107, %113 : vector<1x256xi1>, vector<1x256xf32>
    %115 = arith.addf %98, %114 : vector<1x256xf32>
    %c46_i32 = arith.constant 46 : i32
    %116 = tpu.dynamic_rotate %28 by %c46_i32 dim 1 : vector<1x256xf32>, i32 -> vector<1x256xf32>
    %c46_i32_39 = arith.constant 46 : i32
    %117 = tpu.dynamic_rotate %32 by %c46_i32_39 dim 1 : vector<1x256xf32>, i32 -> vector<1x256xf32>
    %c5 = arith.constant 5 : index
    %118 = memref.load %arg5[%c5] : memref<98xf32, #tpu.memory_space<smem>>
    %119 = vector.broadcast %118 : f32 to vector<1x256xf32>
    %120 = arith.mulf %119, %116 : vector<1x256xf32>
    %c54 = arith.constant 54 : index
    %121 = memref.load %arg5[%c54] : memref<98xf32, #tpu.memory_space<smem>>
    %122 = vector.broadcast %121 : f32 to vector<1x256xf32>
    %123 = arith.mulf %122, %117 : vector<1x256xf32>
    %124 = arith.addf %120, %123 : vector<1x256xf32>
    %c14_i32 = arith.constant 14 : i32
    %125 = vector.broadcast %c14_i32 : i32 to vector<1x256xi32>
    %126 = arith.cmpi slt, %5, %125 : vector<1x256xi32>
    %c3_i32_40 = arith.constant 3 : i32
    %127 = vector.broadcast %c3_i32_40 : i32 to vector<1x256xi32>
    %128 = arith.cmpi sge, %4, %127 : vector<1x256xi32>
    %129 = arith.andi %126, %128 : vector<1x256xi1>
    %cst_41 = arith.constant 0.000000e+00 : f32
    %130 = vector.broadcast %cst_41 : f32 to vector<1x256xf32>
    %131 = arith.select %129, %124, %130 : vector<1x256xi1>, vector<1x256xf32>
    %132 = arith.addf %115, %131 : vector<1x256xf32>
    %c45_i32 = arith.constant 45 : i32
    %133 = tpu.dynamic_rotate %28 by %c45_i32 dim 1 : vector<1x256xf32>, i32 -> vector<1x256xf32>
    %c45_i32_42 = arith.constant 45 : i32
    %134 = tpu.dynamic_rotate %32 by %c45_i32_42 dim 1 : vector<1x256xf32>, i32 -> vector<1x256xf32>
    %c6 = arith.constant 6 : index
    %135 = memref.load %arg5[%c6] : memref<98xf32, #tpu.memory_space<smem>>
    %136 = vector.broadcast %135 : f32 to vector<1x256xf32>
    %137 = arith.mulf %136, %133 : vector<1x256xf32>
    %c55 = arith.constant 55 : index
    %138 = memref.load %arg5[%c55] : memref<98xf32, #tpu.memory_space<smem>>
    %139 = vector.broadcast %138 : f32 to vector<1x256xf32>
    %140 = arith.mulf %139, %134 : vector<1x256xf32>
    %141 = arith.addf %137, %140 : vector<1x256xf32>
    %c13_i32 = arith.constant 13 : i32
    %142 = vector.broadcast %c13_i32 : i32 to vector<1x256xi32>
    %143 = arith.cmpi slt, %5, %142 : vector<1x256xi32>
    %c3_i32_43 = arith.constant 3 : i32
    %144 = vector.broadcast %c3_i32_43 : i32 to vector<1x256xi32>
    %145 = arith.cmpi sge, %4, %144 : vector<1x256xi32>
    %146 = arith.andi %143, %145 : vector<1x256xi1>
    %cst_44 = arith.constant 0.000000e+00 : f32
    %147 = vector.broadcast %cst_44 : f32 to vector<1x256xf32>
    %148 = arith.select %146, %141, %147 : vector<1x256xi1>, vector<1x256xf32>
    %149 = arith.addf %132, %148 : vector<1x256xf32>
    %c35_i32 = arith.constant 35 : i32
    %150 = tpu.dynamic_rotate %28 by %c35_i32 dim 1 : vector<1x256xf32>, i32 -> vector<1x256xf32>
    %c35_i32_45 = arith.constant 35 : i32
    %151 = tpu.dynamic_rotate %32 by %c35_i32_45 dim 1 : vector<1x256xf32>, i32 -> vector<1x256xf32>
    %c7 = arith.constant 7 : index
    %152 = memref.load %arg5[%c7] : memref<98xf32, #tpu.memory_space<smem>>
    %153 = vector.broadcast %152 : f32 to vector<1x256xf32>
    %154 = arith.mulf %153, %150 : vector<1x256xf32>
    %c56 = arith.constant 56 : index
    %155 = memref.load %arg5[%c56] : memref<98xf32, #tpu.memory_space<smem>>
    %156 = vector.broadcast %155 : f32 to vector<1x256xf32>
    %157 = arith.mulf %156, %151 : vector<1x256xf32>
    %158 = arith.addf %154, %157 : vector<1x256xf32>
    %c3_i32_46 = arith.constant 3 : i32
    %159 = vector.broadcast %c3_i32_46 : i32 to vector<1x256xi32>
    %160 = arith.cmpi sge, %5, %159 : vector<1x256xi32>
    %c2_i32_47 = arith.constant 2 : i32
    %161 = vector.broadcast %c2_i32_47 : i32 to vector<1x256xi32>
    %162 = arith.cmpi sge, %4, %161 : vector<1x256xi32>
    %163 = arith.andi %160, %162 : vector<1x256xi1>
    %cst_48 = arith.constant 0.000000e+00 : f32
    %164 = vector.broadcast %cst_48 : f32 to vector<1x256xf32>
    %165 = arith.select %163, %158, %164 : vector<1x256xi1>, vector<1x256xf32>
    %166 = arith.addf %149, %165 : vector<1x256xf32>
    %c34_i32 = arith.constant 34 : i32
    %167 = tpu.dynamic_rotate %28 by %c34_i32 dim 1 : vector<1x256xf32>, i32 -> vector<1x256xf32>
    %c34_i32_49 = arith.constant 34 : i32
    %168 = tpu.dynamic_rotate %32 by %c34_i32_49 dim 1 : vector<1x256xf32>, i32 -> vector<1x256xf32>
    %c8 = arith.constant 8 : index
    %169 = memref.load %arg5[%c8] : memref<98xf32, #tpu.memory_space<smem>>
    %170 = vector.broadcast %169 : f32 to vector<1x256xf32>
    %171 = arith.mulf %170, %167 : vector<1x256xf32>
    %c57 = arith.constant 57 : index
    %172 = memref.load %arg5[%c57] : memref<98xf32, #tpu.memory_space<smem>>
    %173 = vector.broadcast %172 : f32 to vector<1x256xf32>
    %174 = arith.mulf %173, %168 : vector<1x256xf32>
    %175 = arith.addf %171, %174 : vector<1x256xf32>
    %c2_i32_50 = arith.constant 2 : i32
    %176 = vector.broadcast %c2_i32_50 : i32 to vector<1x256xi32>
    %177 = arith.cmpi sge, %5, %176 : vector<1x256xi32>
    %c2_i32_51 = arith.constant 2 : i32
    %178 = vector.broadcast %c2_i32_51 : i32 to vector<1x256xi32>
    %179 = arith.cmpi sge, %4, %178 : vector<1x256xi32>
    %180 = arith.andi %177, %179 : vector<1x256xi1>
    %cst_52 = arith.constant 0.000000e+00 : f32
    %181 = vector.broadcast %cst_52 : f32 to vector<1x256xf32>
    %182 = arith.select %180, %175, %181 : vector<1x256xi1>, vector<1x256xf32>
    %183 = arith.addf %166, %182 : vector<1x256xf32>
    %c33_i32 = arith.constant 33 : i32
    %184 = tpu.dynamic_rotate %28 by %c33_i32 dim 1 : vector<1x256xf32>, i32 -> vector<1x256xf32>
    %c33_i32_53 = arith.constant 33 : i32
    %185 = tpu.dynamic_rotate %32 by %c33_i32_53 dim 1 : vector<1x256xf32>, i32 -> vector<1x256xf32>
    %c9 = arith.constant 9 : index
    %186 = memref.load %arg5[%c9] : memref<98xf32, #tpu.memory_space<smem>>
    %187 = vector.broadcast %186 : f32 to vector<1x256xf32>
    %188 = arith.mulf %187, %184 : vector<1x256xf32>
    %c58 = arith.constant 58 : index
    %189 = memref.load %arg5[%c58] : memref<98xf32, #tpu.memory_space<smem>>
    %190 = vector.broadcast %189 : f32 to vector<1x256xf32>
    %191 = arith.mulf %190, %185 : vector<1x256xf32>
    %192 = arith.addf %188, %191 : vector<1x256xf32>
    %c1_i32_54 = arith.constant 1 : i32
    %193 = vector.broadcast %c1_i32_54 : i32 to vector<1x256xi32>
    %194 = arith.cmpi sge, %5, %193 : vector<1x256xi32>
    %c2_i32_55 = arith.constant 2 : i32
    %195 = vector.broadcast %c2_i32_55 : i32 to vector<1x256xi32>
    %196 = arith.cmpi sge, %4, %195 : vector<1x256xi32>
    %197 = arith.andi %194, %196 : vector<1x256xi1>
    %cst_56 = arith.constant 0.000000e+00 : f32
    %198 = vector.broadcast %cst_56 : f32 to vector<1x256xf32>
    %199 = arith.select %197, %192, %198 : vector<1x256xi1>, vector<1x256xf32>
    %200 = arith.addf %183, %199 : vector<1x256xf32>
    %c32_i32 = arith.constant 32 : i32
    %201 = tpu.dynamic_rotate %28 by %c32_i32 dim 1 : vector<1x256xf32>, i32 -> vector<1x256xf32>
    %c32_i32_57 = arith.constant 32 : i32
    %202 = tpu.dynamic_rotate %32 by %c32_i32_57 dim 1 : vector<1x256xf32>, i32 -> vector<1x256xf32>
    %c10 = arith.constant 10 : index
    %203 = memref.load %arg5[%c10] : memref<98xf32, #tpu.memory_space<smem>>
    %204 = vector.broadcast %203 : f32 to vector<1x256xf32>
    %205 = arith.mulf %204, %201 : vector<1x256xf32>
    %c59 = arith.constant 59 : index
    %206 = memref.load %arg5[%c59] : memref<98xf32, #tpu.memory_space<smem>>
    %207 = vector.broadcast %206 : f32 to vector<1x256xf32>
    %208 = arith.mulf %207, %202 : vector<1x256xf32>
    %209 = arith.addf %205, %208 : vector<1x256xf32>
    %c2_i32_58 = arith.constant 2 : i32
    %210 = vector.broadcast %c2_i32_58 : i32 to vector<1x256xi32>
    %211 = arith.cmpi sge, %4, %210 : vector<1x256xi32>
    %cst_59 = arith.constant 0.000000e+00 : f32
    %212 = vector.broadcast %cst_59 : f32 to vector<1x256xf32>
    %213 = arith.select %211, %209, %212 : vector<1x256xi1>, vector<1x256xf32>
    %214 = arith.addf %200, %213 : vector<1x256xf32>
    %c31_i32 = arith.constant 31 : i32
    %215 = tpu.dynamic_rotate %28 by %c31_i32 dim 1 : vector<1x256xf32>, i32 -> vector<1x256xf32>
    %c31_i32_60 = arith.constant 31 : i32
    %216 = tpu.dynamic_rotate %32 by %c31_i32_60 dim 1 : vector<1x256xf32>, i32 -> vector<1x256xf32>
    %c11 = arith.constant 11 : index
    %217 = memref.load %arg5[%c11] : memref<98xf32, #tpu.memory_space<smem>>
    %218 = vector.broadcast %217 : f32 to vector<1x256xf32>
    %219 = arith.mulf %218, %215 : vector<1x256xf32>
    %c60 = arith.constant 60 : index
    %220 = memref.load %arg5[%c60] : memref<98xf32, #tpu.memory_space<smem>>
    %221 = vector.broadcast %220 : f32 to vector<1x256xf32>
    %222 = arith.mulf %221, %216 : vector<1x256xf32>
    %223 = arith.addf %219, %222 : vector<1x256xf32>
    %c15_i32_61 = arith.constant 15 : i32
    %224 = vector.broadcast %c15_i32_61 : i32 to vector<1x256xi32>
    %225 = arith.cmpi slt, %5, %224 : vector<1x256xi32>
    %c2_i32_62 = arith.constant 2 : i32
    %226 = vector.broadcast %c2_i32_62 : i32 to vector<1x256xi32>
    %227 = arith.cmpi sge, %4, %226 : vector<1x256xi32>
    %228 = arith.andi %225, %227 : vector<1x256xi1>
    %cst_63 = arith.constant 0.000000e+00 : f32
    %229 = vector.broadcast %cst_63 : f32 to vector<1x256xf32>
    %230 = arith.select %228, %223, %229 : vector<1x256xi1>, vector<1x256xf32>
    %231 = arith.addf %214, %230 : vector<1x256xf32>
    %c30_i32 = arith.constant 30 : i32
    %232 = tpu.dynamic_rotate %28 by %c30_i32 dim 1 : vector<1x256xf32>, i32 -> vector<1x256xf32>
    %c30_i32_64 = arith.constant 30 : i32
    %233 = tpu.dynamic_rotate %32 by %c30_i32_64 dim 1 : vector<1x256xf32>, i32 -> vector<1x256xf32>
    %c12 = arith.constant 12 : index
    %234 = memref.load %arg5[%c12] : memref<98xf32, #tpu.memory_space<smem>>
    %235 = vector.broadcast %234 : f32 to vector<1x256xf32>
    %236 = arith.mulf %235, %232 : vector<1x256xf32>
    %c61 = arith.constant 61 : index
    %237 = memref.load %arg5[%c61] : memref<98xf32, #tpu.memory_space<smem>>
    %238 = vector.broadcast %237 : f32 to vector<1x256xf32>
    %239 = arith.mulf %238, %233 : vector<1x256xf32>
    %240 = arith.addf %236, %239 : vector<1x256xf32>
    %c14_i32_65 = arith.constant 14 : i32
    %241 = vector.broadcast %c14_i32_65 : i32 to vector<1x256xi32>
    %242 = arith.cmpi slt, %5, %241 : vector<1x256xi32>
    %c2_i32_66 = arith.constant 2 : i32
    %243 = vector.broadcast %c2_i32_66 : i32 to vector<1x256xi32>
    %244 = arith.cmpi sge, %4, %243 : vector<1x256xi32>
    %245 = arith.andi %242, %244 : vector<1x256xi1>
    %cst_67 = arith.constant 0.000000e+00 : f32
    %246 = vector.broadcast %cst_67 : f32 to vector<1x256xf32>
    %247 = arith.select %245, %240, %246 : vector<1x256xi1>, vector<1x256xf32>
    %248 = arith.addf %231, %247 : vector<1x256xf32>
    %c29_i32 = arith.constant 29 : i32
    %249 = tpu.dynamic_rotate %28 by %c29_i32 dim 1 : vector<1x256xf32>, i32 -> vector<1x256xf32>
    %c29_i32_68 = arith.constant 29 : i32
    %250 = tpu.dynamic_rotate %32 by %c29_i32_68 dim 1 : vector<1x256xf32>, i32 -> vector<1x256xf32>
    %c13 = arith.constant 13 : index
    %251 = memref.load %arg5[%c13] : memref<98xf32, #tpu.memory_space<smem>>
    %252 = vector.broadcast %251 : f32 to vector<1x256xf32>
    %253 = arith.mulf %252, %249 : vector<1x256xf32>
    %c62 = arith.constant 62 : index
    %254 = memref.load %arg5[%c62] : memref<98xf32, #tpu.memory_space<smem>>
    %255 = vector.broadcast %254 : f32 to vector<1x256xf32>
    %256 = arith.mulf %255, %250 : vector<1x256xf32>
    %257 = arith.addf %253, %256 : vector<1x256xf32>
    %c13_i32_69 = arith.constant 13 : i32
    %258 = vector.broadcast %c13_i32_69 : i32 to vector<1x256xi32>
    %259 = arith.cmpi slt, %5, %258 : vector<1x256xi32>
    %c2_i32_70 = arith.constant 2 : i32
    %260 = vector.broadcast %c2_i32_70 : i32 to vector<1x256xi32>
    %261 = arith.cmpi sge, %4, %260 : vector<1x256xi32>
    %262 = arith.andi %259, %261 : vector<1x256xi1>
    %cst_71 = arith.constant 0.000000e+00 : f32
    %263 = vector.broadcast %cst_71 : f32 to vector<1x256xf32>
    %264 = arith.select %262, %257, %263 : vector<1x256xi1>, vector<1x256xf32>
    %265 = arith.addf %248, %264 : vector<1x256xf32>
    %c19_i32 = arith.constant 19 : i32
    %266 = tpu.dynamic_rotate %28 by %c19_i32 dim 1 : vector<1x256xf32>, i32 -> vector<1x256xf32>
    %c19_i32_72 = arith.constant 19 : i32
    %267 = tpu.dynamic_rotate %32 by %c19_i32_72 dim 1 : vector<1x256xf32>, i32 -> vector<1x256xf32>
    %c14 = arith.constant 14 : index
    %268 = memref.load %arg5[%c14] : memref<98xf32, #tpu.memory_space<smem>>
    %269 = vector.broadcast %268 : f32 to vector<1x256xf32>
    %270 = arith.mulf %269, %266 : vector<1x256xf32>
    %c63 = arith.constant 63 : index
    %271 = memref.load %arg5[%c63] : memref<98xf32, #tpu.memory_space<smem>>
    %272 = vector.broadcast %271 : f32 to vector<1x256xf32>
    %273 = arith.mulf %272, %267 : vector<1x256xf32>
    %274 = arith.addf %270, %273 : vector<1x256xf32>
    %c3_i32_73 = arith.constant 3 : i32
    %275 = vector.broadcast %c3_i32_73 : i32 to vector<1x256xi32>
    %276 = arith.cmpi sge, %5, %275 : vector<1x256xi32>
    %c1_i32_74 = arith.constant 1 : i32
    %277 = vector.broadcast %c1_i32_74 : i32 to vector<1x256xi32>
    %278 = arith.cmpi sge, %4, %277 : vector<1x256xi32>
    %279 = arith.andi %276, %278 : vector<1x256xi1>
    %cst_75 = arith.constant 0.000000e+00 : f32
    %280 = vector.broadcast %cst_75 : f32 to vector<1x256xf32>
    %281 = arith.select %279, %274, %280 : vector<1x256xi1>, vector<1x256xf32>
    %282 = arith.addf %265, %281 : vector<1x256xf32>
    %c18_i32 = arith.constant 18 : i32
    %283 = tpu.dynamic_rotate %28 by %c18_i32 dim 1 : vector<1x256xf32>, i32 -> vector<1x256xf32>
    %c18_i32_76 = arith.constant 18 : i32
    %284 = tpu.dynamic_rotate %32 by %c18_i32_76 dim 1 : vector<1x256xf32>, i32 -> vector<1x256xf32>
    %c15 = arith.constant 15 : index
    %285 = memref.load %arg5[%c15] : memref<98xf32, #tpu.memory_space<smem>>
    %286 = vector.broadcast %285 : f32 to vector<1x256xf32>
    %287 = arith.mulf %286, %283 : vector<1x256xf32>
    %c64 = arith.constant 64 : index
    %288 = memref.load %arg5[%c64] : memref<98xf32, #tpu.memory_space<smem>>
    %289 = vector.broadcast %288 : f32 to vector<1x256xf32>
    %290 = arith.mulf %289, %284 : vector<1x256xf32>
    %291 = arith.addf %287, %290 : vector<1x256xf32>
    %c2_i32_77 = arith.constant 2 : i32
    %292 = vector.broadcast %c2_i32_77 : i32 to vector<1x256xi32>
    %293 = arith.cmpi sge, %5, %292 : vector<1x256xi32>
    %c1_i32_78 = arith.constant 1 : i32
    %294 = vector.broadcast %c1_i32_78 : i32 to vector<1x256xi32>
    %295 = arith.cmpi sge, %4, %294 : vector<1x256xi32>
    %296 = arith.andi %293, %295 : vector<1x256xi1>
    %cst_79 = arith.constant 0.000000e+00 : f32
    %297 = vector.broadcast %cst_79 : f32 to vector<1x256xf32>
    %298 = arith.select %296, %291, %297 : vector<1x256xi1>, vector<1x256xf32>
    %299 = arith.addf %282, %298 : vector<1x256xf32>
    %c17_i32 = arith.constant 17 : i32
    %300 = tpu.dynamic_rotate %28 by %c17_i32 dim 1 : vector<1x256xf32>, i32 -> vector<1x256xf32>
    %c17_i32_80 = arith.constant 17 : i32
    %301 = tpu.dynamic_rotate %32 by %c17_i32_80 dim 1 : vector<1x256xf32>, i32 -> vector<1x256xf32>
    %c16 = arith.constant 16 : index
    %302 = memref.load %arg5[%c16] : memref<98xf32, #tpu.memory_space<smem>>
    %303 = vector.broadcast %302 : f32 to vector<1x256xf32>
    %304 = arith.mulf %303, %300 : vector<1x256xf32>
    %c65 = arith.constant 65 : index
    %305 = memref.load %arg5[%c65] : memref<98xf32, #tpu.memory_space<smem>>
    %306 = vector.broadcast %305 : f32 to vector<1x256xf32>
    %307 = arith.mulf %306, %301 : vector<1x256xf32>
    %308 = arith.addf %304, %307 : vector<1x256xf32>
    %c1_i32_81 = arith.constant 1 : i32
    %309 = vector.broadcast %c1_i32_81 : i32 to vector<1x256xi32>
    %310 = arith.cmpi sge, %5, %309 : vector<1x256xi32>
    %c1_i32_82 = arith.constant 1 : i32
    %311 = vector.broadcast %c1_i32_82 : i32 to vector<1x256xi32>
    %312 = arith.cmpi sge, %4, %311 : vector<1x256xi32>
    %313 = arith.andi %310, %312 : vector<1x256xi1>
    %cst_83 = arith.constant 0.000000e+00 : f32
    %314 = vector.broadcast %cst_83 : f32 to vector<1x256xf32>
    %315 = arith.select %313, %308, %314 : vector<1x256xi1>, vector<1x256xf32>
    %316 = arith.addf %299, %315 : vector<1x256xf32>
    %c16_i32 = arith.constant 16 : i32
    %317 = tpu.dynamic_rotate %28 by %c16_i32 dim 1 : vector<1x256xf32>, i32 -> vector<1x256xf32>
    %c16_i32_84 = arith.constant 16 : i32
    %318 = tpu.dynamic_rotate %32 by %c16_i32_84 dim 1 : vector<1x256xf32>, i32 -> vector<1x256xf32>
    %c17 = arith.constant 17 : index
    %319 = memref.load %arg5[%c17] : memref<98xf32, #tpu.memory_space<smem>>
    %320 = vector.broadcast %319 : f32 to vector<1x256xf32>
    %321 = arith.mulf %320, %317 : vector<1x256xf32>
    %c66 = arith.constant 66 : index
    %322 = memref.load %arg5[%c66] : memref<98xf32, #tpu.memory_space<smem>>
    %323 = vector.broadcast %322 : f32 to vector<1x256xf32>
    %324 = arith.mulf %323, %318 : vector<1x256xf32>
    %325 = arith.addf %321, %324 : vector<1x256xf32>
    %c1_i32_85 = arith.constant 1 : i32
    %326 = vector.broadcast %c1_i32_85 : i32 to vector<1x256xi32>
    %327 = arith.cmpi sge, %4, %326 : vector<1x256xi32>
    %cst_86 = arith.constant 0.000000e+00 : f32
    %328 = vector.broadcast %cst_86 : f32 to vector<1x256xf32>
    %329 = arith.select %327, %325, %328 : vector<1x256xi1>, vector<1x256xf32>
    %330 = arith.addf %316, %329 : vector<1x256xf32>
    %c15_i32_87 = arith.constant 15 : i32
    %331 = tpu.dynamic_rotate %28 by %c15_i32_87 dim 1 : vector<1x256xf32>, i32 -> vector<1x256xf32>
    %c15_i32_88 = arith.constant 15 : i32
    %332 = tpu.dynamic_rotate %32 by %c15_i32_88 dim 1 : vector<1x256xf32>, i32 -> vector<1x256xf32>
    %c18 = arith.constant 18 : index
    %333 = memref.load %arg5[%c18] : memref<98xf32, #tpu.memory_space<smem>>
    %334 = vector.broadcast %333 : f32 to vector<1x256xf32>
    %335 = arith.mulf %334, %331 : vector<1x256xf32>
    %c67 = arith.constant 67 : index
    %336 = memref.load %arg5[%c67] : memref<98xf32, #tpu.memory_space<smem>>
    %337 = vector.broadcast %336 : f32 to vector<1x256xf32>
    %338 = arith.mulf %337, %332 : vector<1x256xf32>
    %339 = arith.addf %335, %338 : vector<1x256xf32>
    %c15_i32_89 = arith.constant 15 : i32
    %340 = vector.broadcast %c15_i32_89 : i32 to vector<1x256xi32>
    %341 = arith.cmpi slt, %5, %340 : vector<1x256xi32>
    %c1_i32_90 = arith.constant 1 : i32
    %342 = vector.broadcast %c1_i32_90 : i32 to vector<1x256xi32>
    %343 = arith.cmpi sge, %4, %342 : vector<1x256xi32>
    %344 = arith.andi %341, %343 : vector<1x256xi1>
    %cst_91 = arith.constant 0.000000e+00 : f32
    %345 = vector.broadcast %cst_91 : f32 to vector<1x256xf32>
    %346 = arith.select %344, %339, %345 : vector<1x256xi1>, vector<1x256xf32>
    %347 = arith.addf %330, %346 : vector<1x256xf32>
    %c14_i32_92 = arith.constant 14 : i32
    %348 = tpu.dynamic_rotate %28 by %c14_i32_92 dim 1 : vector<1x256xf32>, i32 -> vector<1x256xf32>
    %c14_i32_93 = arith.constant 14 : i32
    %349 = tpu.dynamic_rotate %32 by %c14_i32_93 dim 1 : vector<1x256xf32>, i32 -> vector<1x256xf32>
    %c19 = arith.constant 19 : index
    %350 = memref.load %arg5[%c19] : memref<98xf32, #tpu.memory_space<smem>>
    %351 = vector.broadcast %350 : f32 to vector<1x256xf32>
    %352 = arith.mulf %351, %348 : vector<1x256xf32>
    %c68 = arith.constant 68 : index
    %353 = memref.load %arg5[%c68] : memref<98xf32, #tpu.memory_space<smem>>
    %354 = vector.broadcast %353 : f32 to vector<1x256xf32>
    %355 = arith.mulf %354, %349 : vector<1x256xf32>
    %356 = arith.addf %352, %355 : vector<1x256xf32>
    %c14_i32_94 = arith.constant 14 : i32
    %357 = vector.broadcast %c14_i32_94 : i32 to vector<1x256xi32>
    %358 = arith.cmpi slt, %5, %357 : vector<1x256xi32>
    %c1_i32_95 = arith.constant 1 : i32
    %359 = vector.broadcast %c1_i32_95 : i32 to vector<1x256xi32>
    %360 = arith.cmpi sge, %4, %359 : vector<1x256xi32>
    %361 = arith.andi %358, %360 : vector<1x256xi1>
    %cst_96 = arith.constant 0.000000e+00 : f32
    %362 = vector.broadcast %cst_96 : f32 to vector<1x256xf32>
    %363 = arith.select %361, %356, %362 : vector<1x256xi1>, vector<1x256xf32>
    %364 = arith.addf %347, %363 : vector<1x256xf32>
    %c13_i32_97 = arith.constant 13 : i32
    %365 = tpu.dynamic_rotate %28 by %c13_i32_97 dim 1 : vector<1x256xf32>, i32 -> vector<1x256xf32>
    %c13_i32_98 = arith.constant 13 : i32
    %366 = tpu.dynamic_rotate %32 by %c13_i32_98 dim 1 : vector<1x256xf32>, i32 -> vector<1x256xf32>
    %c20 = arith.constant 20 : index
    %367 = memref.load %arg5[%c20] : memref<98xf32, #tpu.memory_space<smem>>
    %368 = vector.broadcast %367 : f32 to vector<1x256xf32>
    %369 = arith.mulf %368, %365 : vector<1x256xf32>
    %c69 = arith.constant 69 : index
    %370 = memref.load %arg5[%c69] : memref<98xf32, #tpu.memory_space<smem>>
    %371 = vector.broadcast %370 : f32 to vector<1x256xf32>
    %372 = arith.mulf %371, %366 : vector<1x256xf32>
    %373 = arith.addf %369, %372 : vector<1x256xf32>
    %c13_i32_99 = arith.constant 13 : i32
    %374 = vector.broadcast %c13_i32_99 : i32 to vector<1x256xi32>
    %375 = arith.cmpi slt, %5, %374 : vector<1x256xi32>
    %c1_i32_100 = arith.constant 1 : i32
    %376 = vector.broadcast %c1_i32_100 : i32 to vector<1x256xi32>
    %377 = arith.cmpi sge, %4, %376 : vector<1x256xi32>
    %378 = arith.andi %375, %377 : vector<1x256xi1>
    %cst_101 = arith.constant 0.000000e+00 : f32
    %379 = vector.broadcast %cst_101 : f32 to vector<1x256xf32>
    %380 = arith.select %378, %373, %379 : vector<1x256xi1>, vector<1x256xf32>
    %381 = arith.addf %364, %380 : vector<1x256xf32>
    %c3_i32_102 = arith.constant 3 : i32
    %382 = tpu.dynamic_rotate %28 by %c3_i32_102 dim 1 : vector<1x256xf32>, i32 -> vector<1x256xf32>
    %c3_i32_103 = arith.constant 3 : i32
    %383 = tpu.dynamic_rotate %32 by %c3_i32_103 dim 1 : vector<1x256xf32>, i32 -> vector<1x256xf32>
    %c21 = arith.constant 21 : index
    %384 = memref.load %arg5[%c21] : memref<98xf32, #tpu.memory_space<smem>>
    %385 = vector.broadcast %384 : f32 to vector<1x256xf32>
    %386 = arith.mulf %385, %382 : vector<1x256xf32>
    %c70 = arith.constant 70 : index
    %387 = memref.load %arg5[%c70] : memref<98xf32, #tpu.memory_space<smem>>
    %388 = vector.broadcast %387 : f32 to vector<1x256xf32>
    %389 = arith.mulf %388, %383 : vector<1x256xf32>
    %390 = arith.addf %386, %389 : vector<1x256xf32>
    %c3_i32_104 = arith.constant 3 : i32
    %391 = vector.broadcast %c3_i32_104 : i32 to vector<1x256xi32>
    %392 = arith.cmpi sge, %5, %391 : vector<1x256xi32>
    %cst_105 = arith.constant 0.000000e+00 : f32
    %393 = vector.broadcast %cst_105 : f32 to vector<1x256xf32>
    %394 = arith.select %392, %390, %393 : vector<1x256xi1>, vector<1x256xf32>
    %395 = arith.addf %381, %394 : vector<1x256xf32>
    %c2_i32_106 = arith.constant 2 : i32
    %396 = tpu.dynamic_rotate %28 by %c2_i32_106 dim 1 : vector<1x256xf32>, i32 -> vector<1x256xf32>
    %c2_i32_107 = arith.constant 2 : i32
    %397 = tpu.dynamic_rotate %32 by %c2_i32_107 dim 1 : vector<1x256xf32>, i32 -> vector<1x256xf32>
    %c22 = arith.constant 22 : index
    %398 = memref.load %arg5[%c22] : memref<98xf32, #tpu.memory_space<smem>>
    %399 = vector.broadcast %398 : f32 to vector<1x256xf32>
    %400 = arith.mulf %399, %396 : vector<1x256xf32>
    %c71 = arith.constant 71 : index
    %401 = memref.load %arg5[%c71] : memref<98xf32, #tpu.memory_space<smem>>
    %402 = vector.broadcast %401 : f32 to vector<1x256xf32>
    %403 = arith.mulf %402, %397 : vector<1x256xf32>
    %404 = arith.addf %400, %403 : vector<1x256xf32>
    %c2_i32_108 = arith.constant 2 : i32
    %405 = vector.broadcast %c2_i32_108 : i32 to vector<1x256xi32>
    %406 = arith.cmpi sge, %5, %405 : vector<1x256xi32>
    %cst_109 = arith.constant 0.000000e+00 : f32
    %407 = vector.broadcast %cst_109 : f32 to vector<1x256xf32>
    %408 = arith.select %406, %404, %407 : vector<1x256xi1>, vector<1x256xf32>
    %409 = arith.addf %395, %408 : vector<1x256xf32>
    %c1_i32_110 = arith.constant 1 : i32
    %410 = tpu.dynamic_rotate %28 by %c1_i32_110 dim 1 : vector<1x256xf32>, i32 -> vector<1x256xf32>
    %c1_i32_111 = arith.constant 1 : i32
    %411 = tpu.dynamic_rotate %32 by %c1_i32_111 dim 1 : vector<1x256xf32>, i32 -> vector<1x256xf32>
    %c23 = arith.constant 23 : index
    %412 = memref.load %arg5[%c23] : memref<98xf32, #tpu.memory_space<smem>>
    %413 = vector.broadcast %412 : f32 to vector<1x256xf32>
    %414 = arith.mulf %413, %410 : vector<1x256xf32>
    %c72 = arith.constant 72 : index
    %415 = memref.load %arg5[%c72] : memref<98xf32, #tpu.memory_space<smem>>
    %416 = vector.broadcast %415 : f32 to vector<1x256xf32>
    %417 = arith.mulf %416, %411 : vector<1x256xf32>
    %418 = arith.addf %414, %417 : vector<1x256xf32>
    %c1_i32_112 = arith.constant 1 : i32
    %419 = vector.broadcast %c1_i32_112 : i32 to vector<1x256xi32>
    %420 = arith.cmpi sge, %5, %419 : vector<1x256xi32>
    %cst_113 = arith.constant 0.000000e+00 : f32
    %421 = vector.broadcast %cst_113 : f32 to vector<1x256xf32>
    %422 = arith.select %420, %418, %421 : vector<1x256xi1>, vector<1x256xf32>
    %423 = arith.addf %409, %422 : vector<1x256xf32>
    %c24 = arith.constant 24 : index
    %424 = memref.load %arg5[%c24] : memref<98xf32, #tpu.memory_space<smem>>
    %425 = vector.broadcast %424 : f32 to vector<1x256xf32>
    %426 = arith.mulf %425, %28 : vector<1x256xf32>
    %c73 = arith.constant 73 : index
    %427 = memref.load %arg5[%c73] : memref<98xf32, #tpu.memory_space<smem>>
    %428 = vector.broadcast %427 : f32 to vector<1x256xf32>
    %429 = arith.mulf %428, %32 : vector<1x256xf32>
    %430 = arith.addf %426, %429 : vector<1x256xf32>
    %431 = arith.addf %423, %430 : vector<1x256xf32>
    %c255_i32 = arith.constant 255 : i32
    %432 = tpu.dynamic_rotate %28 by %c255_i32 dim 1 : vector<1x256xf32>, i32 -> vector<1x256xf32>
    %c255_i32_114 = arith.constant 255 : i32
    %433 = tpu.dynamic_rotate %32 by %c255_i32_114 dim 1 : vector<1x256xf32>, i32 -> vector<1x256xf32>
    %c25 = arith.constant 25 : index
    %434 = memref.load %arg5[%c25] : memref<98xf32, #tpu.memory_space<smem>>
    %435 = vector.broadcast %434 : f32 to vector<1x256xf32>
    %436 = arith.mulf %435, %432 : vector<1x256xf32>
    %c74 = arith.constant 74 : index
    %437 = memref.load %arg5[%c74] : memref<98xf32, #tpu.memory_space<smem>>
    %438 = vector.broadcast %437 : f32 to vector<1x256xf32>
    %439 = arith.mulf %438, %433 : vector<1x256xf32>
    %440 = arith.addf %436, %439 : vector<1x256xf32>
    %c15_i32_115 = arith.constant 15 : i32
    %441 = vector.broadcast %c15_i32_115 : i32 to vector<1x256xi32>
    %442 = arith.cmpi slt, %5, %441 : vector<1x256xi32>
    %cst_116 = arith.constant 0.000000e+00 : f32
    %443 = vector.broadcast %cst_116 : f32 to vector<1x256xf32>
    %444 = arith.select %442, %440, %443 : vector<1x256xi1>, vector<1x256xf32>
    %445 = arith.addf %431, %444 : vector<1x256xf32>
    %c254_i32 = arith.constant 254 : i32
    %446 = tpu.dynamic_rotate %28 by %c254_i32 dim 1 : vector<1x256xf32>, i32 -> vector<1x256xf32>
    %c254_i32_117 = arith.constant 254 : i32
    %447 = tpu.dynamic_rotate %32 by %c254_i32_117 dim 1 : vector<1x256xf32>, i32 -> vector<1x256xf32>
    %c26 = arith.constant 26 : index
    %448 = memref.load %arg5[%c26] : memref<98xf32, #tpu.memory_space<smem>>
    %449 = vector.broadcast %448 : f32 to vector<1x256xf32>
    %450 = arith.mulf %449, %446 : vector<1x256xf32>
    %c75 = arith.constant 75 : index
    %451 = memref.load %arg5[%c75] : memref<98xf32, #tpu.memory_space<smem>>
    %452 = vector.broadcast %451 : f32 to vector<1x256xf32>
    %453 = arith.mulf %452, %447 : vector<1x256xf32>
    %454 = arith.addf %450, %453 : vector<1x256xf32>
    %c14_i32_118 = arith.constant 14 : i32
    %455 = vector.broadcast %c14_i32_118 : i32 to vector<1x256xi32>
    %456 = arith.cmpi slt, %5, %455 : vector<1x256xi32>
    %cst_119 = arith.constant 0.000000e+00 : f32
    %457 = vector.broadcast %cst_119 : f32 to vector<1x256xf32>
    %458 = arith.select %456, %454, %457 : vector<1x256xi1>, vector<1x256xf32>
    %459 = arith.addf %445, %458 : vector<1x256xf32>
    %c253_i32 = arith.constant 253 : i32
    %460 = tpu.dynamic_rotate %28 by %c253_i32 dim 1 : vector<1x256xf32>, i32 -> vector<1x256xf32>
    %c253_i32_120 = arith.constant 253 : i32
    %461 = tpu.dynamic_rotate %32 by %c253_i32_120 dim 1 : vector<1x256xf32>, i32 -> vector<1x256xf32>
    %c27 = arith.constant 27 : index
    %462 = memref.load %arg5[%c27] : memref<98xf32, #tpu.memory_space<smem>>
    %463 = vector.broadcast %462 : f32 to vector<1x256xf32>
    %464 = arith.mulf %463, %460 : vector<1x256xf32>
    %c76 = arith.constant 76 : index
    %465 = memref.load %arg5[%c76] : memref<98xf32, #tpu.memory_space<smem>>
    %466 = vector.broadcast %465 : f32 to vector<1x256xf32>
    %467 = arith.mulf %466, %461 : vector<1x256xf32>
    %468 = arith.addf %464, %467 : vector<1x256xf32>
    %c13_i32_121 = arith.constant 13 : i32
    %469 = vector.broadcast %c13_i32_121 : i32 to vector<1x256xi32>
    %470 = arith.cmpi slt, %5, %469 : vector<1x256xi32>
    %cst_122 = arith.constant 0.000000e+00 : f32
    %471 = vector.broadcast %cst_122 : f32 to vector<1x256xf32>
    %472 = arith.select %470, %468, %471 : vector<1x256xi1>, vector<1x256xf32>
    %473 = arith.addf %459, %472 : vector<1x256xf32>
    %c243_i32 = arith.constant 243 : i32
    %474 = tpu.dynamic_rotate %28 by %c243_i32 dim 1 : vector<1x256xf32>, i32 -> vector<1x256xf32>
    %c243_i32_123 = arith.constant 243 : i32
    %475 = tpu.dynamic_rotate %32 by %c243_i32_123 dim 1 : vector<1x256xf32>, i32 -> vector<1x256xf32>
    %c28 = arith.constant 28 : index
    %476 = memref.load %arg5[%c28] : memref<98xf32, #tpu.memory_space<smem>>
    %477 = vector.broadcast %476 : f32 to vector<1x256xf32>
    %478 = arith.mulf %477, %474 : vector<1x256xf32>
    %c77 = arith.constant 77 : index
    %479 = memref.load %arg5[%c77] : memref<98xf32, #tpu.memory_space<smem>>
    %480 = vector.broadcast %479 : f32 to vector<1x256xf32>
    %481 = arith.mulf %480, %475 : vector<1x256xf32>
    %482 = arith.addf %478, %481 : vector<1x256xf32>
    %c3_i32_124 = arith.constant 3 : i32
    %483 = vector.broadcast %c3_i32_124 : i32 to vector<1x256xi32>
    %484 = arith.cmpi sge, %5, %483 : vector<1x256xi32>
    %c15_i32_125 = arith.constant 15 : i32
    %485 = vector.broadcast %c15_i32_125 : i32 to vector<1x256xi32>
    %486 = arith.cmpi slt, %4, %485 : vector<1x256xi32>
    %487 = arith.andi %484, %486 : vector<1x256xi1>
    %cst_126 = arith.constant 0.000000e+00 : f32
    %488 = vector.broadcast %cst_126 : f32 to vector<1x256xf32>
    %489 = arith.select %487, %482, %488 : vector<1x256xi1>, vector<1x256xf32>
    %490 = arith.addf %473, %489 : vector<1x256xf32>
    %c242_i32 = arith.constant 242 : i32
    %491 = tpu.dynamic_rotate %28 by %c242_i32 dim 1 : vector<1x256xf32>, i32 -> vector<1x256xf32>
    %c242_i32_127 = arith.constant 242 : i32
    %492 = tpu.dynamic_rotate %32 by %c242_i32_127 dim 1 : vector<1x256xf32>, i32 -> vector<1x256xf32>
    %c29 = arith.constant 29 : index
    %493 = memref.load %arg5[%c29] : memref<98xf32, #tpu.memory_space<smem>>
    %494 = vector.broadcast %493 : f32 to vector<1x256xf32>
    %495 = arith.mulf %494, %491 : vector<1x256xf32>
    %c78 = arith.constant 78 : index
    %496 = memref.load %arg5[%c78] : memref<98xf32, #tpu.memory_space<smem>>
    %497 = vector.broadcast %496 : f32 to vector<1x256xf32>
    %498 = arith.mulf %497, %492 : vector<1x256xf32>
    %499 = arith.addf %495, %498 : vector<1x256xf32>
    %c2_i32_128 = arith.constant 2 : i32
    %500 = vector.broadcast %c2_i32_128 : i32 to vector<1x256xi32>
    %501 = arith.cmpi sge, %5, %500 : vector<1x256xi32>
    %c15_i32_129 = arith.constant 15 : i32
    %502 = vector.broadcast %c15_i32_129 : i32 to vector<1x256xi32>
    %503 = arith.cmpi slt, %4, %502 : vector<1x256xi32>
    %504 = arith.andi %501, %503 : vector<1x256xi1>
    %cst_130 = arith.constant 0.000000e+00 : f32
    %505 = vector.broadcast %cst_130 : f32 to vector<1x256xf32>
    %506 = arith.select %504, %499, %505 : vector<1x256xi1>, vector<1x256xf32>
    %507 = arith.addf %490, %506 : vector<1x256xf32>
    %c241_i32 = arith.constant 241 : i32
    %508 = tpu.dynamic_rotate %28 by %c241_i32 dim 1 : vector<1x256xf32>, i32 -> vector<1x256xf32>
    %c241_i32_131 = arith.constant 241 : i32
    %509 = tpu.dynamic_rotate %32 by %c241_i32_131 dim 1 : vector<1x256xf32>, i32 -> vector<1x256xf32>
    %c30 = arith.constant 30 : index
    %510 = memref.load %arg5[%c30] : memref<98xf32, #tpu.memory_space<smem>>
    %511 = vector.broadcast %510 : f32 to vector<1x256xf32>
    %512 = arith.mulf %511, %508 : vector<1x256xf32>
    %c79 = arith.constant 79 : index
    %513 = memref.load %arg5[%c79] : memref<98xf32, #tpu.memory_space<smem>>
    %514 = vector.broadcast %513 : f32 to vector<1x256xf32>
    %515 = arith.mulf %514, %509 : vector<1x256xf32>
    %516 = arith.addf %512, %515 : vector<1x256xf32>
    %c1_i32_132 = arith.constant 1 : i32
    %517 = vector.broadcast %c1_i32_132 : i32 to vector<1x256xi32>
    %518 = arith.cmpi sge, %5, %517 : vector<1x256xi32>
    %c15_i32_133 = arith.constant 15 : i32
    %519 = vector.broadcast %c15_i32_133 : i32 to vector<1x256xi32>
    %520 = arith.cmpi slt, %4, %519 : vector<1x256xi32>
    %521 = arith.andi %518, %520 : vector<1x256xi1>
    %cst_134 = arith.constant 0.000000e+00 : f32
    %522 = vector.broadcast %cst_134 : f32 to vector<1x256xf32>
    %523 = arith.select %521, %516, %522 : vector<1x256xi1>, vector<1x256xf32>
    %524 = arith.addf %507, %523 : vector<1x256xf32>
    %c240_i32 = arith.constant 240 : i32
    %525 = tpu.dynamic_rotate %28 by %c240_i32 dim 1 : vector<1x256xf32>, i32 -> vector<1x256xf32>
    %c240_i32_135 = arith.constant 240 : i32
    %526 = tpu.dynamic_rotate %32 by %c240_i32_135 dim 1 : vector<1x256xf32>, i32 -> vector<1x256xf32>
    %c31 = arith.constant 31 : index
    %527 = memref.load %arg5[%c31] : memref<98xf32, #tpu.memory_space<smem>>
    %528 = vector.broadcast %527 : f32 to vector<1x256xf32>
    %529 = arith.mulf %528, %525 : vector<1x256xf32>
    %c80 = arith.constant 80 : index
    %530 = memref.load %arg5[%c80] : memref<98xf32, #tpu.memory_space<smem>>
    %531 = vector.broadcast %530 : f32 to vector<1x256xf32>
    %532 = arith.mulf %531, %526 : vector<1x256xf32>
    %533 = arith.addf %529, %532 : vector<1x256xf32>
    %c15_i32_136 = arith.constant 15 : i32
    %534 = vector.broadcast %c15_i32_136 : i32 to vector<1x256xi32>
    %535 = arith.cmpi slt, %4, %534 : vector<1x256xi32>
    %cst_137 = arith.constant 0.000000e+00 : f32
    %536 = vector.broadcast %cst_137 : f32 to vector<1x256xf32>
    %537 = arith.select %535, %533, %536 : vector<1x256xi1>, vector<1x256xf32>
    %538 = arith.addf %524, %537 : vector<1x256xf32>
    %c239_i32 = arith.constant 239 : i32
    %539 = tpu.dynamic_rotate %28 by %c239_i32 dim 1 : vector<1x256xf32>, i32 -> vector<1x256xf32>
    %c239_i32_138 = arith.constant 239 : i32
    %540 = tpu.dynamic_rotate %32 by %c239_i32_138 dim 1 : vector<1x256xf32>, i32 -> vector<1x256xf32>
    %c32 = arith.constant 32 : index
    %541 = memref.load %arg5[%c32] : memref<98xf32, #tpu.memory_space<smem>>
    %542 = vector.broadcast %541 : f32 to vector<1x256xf32>
    %543 = arith.mulf %542, %539 : vector<1x256xf32>
    %c81 = arith.constant 81 : index
    %544 = memref.load %arg5[%c81] : memref<98xf32, #tpu.memory_space<smem>>
    %545 = vector.broadcast %544 : f32 to vector<1x256xf32>
    %546 = arith.mulf %545, %540 : vector<1x256xf32>
    %547 = arith.addf %543, %546 : vector<1x256xf32>
    %c15_i32_139 = arith.constant 15 : i32
    %548 = vector.broadcast %c15_i32_139 : i32 to vector<1x256xi32>
    %549 = arith.cmpi slt, %5, %548 : vector<1x256xi32>
    %c15_i32_140 = arith.constant 15 : i32
    %550 = vector.broadcast %c15_i32_140 : i32 to vector<1x256xi32>
    %551 = arith.cmpi slt, %4, %550 : vector<1x256xi32>
    %552 = arith.andi %549, %551 : vector<1x256xi1>
    %cst_141 = arith.constant 0.000000e+00 : f32
    %553 = vector.broadcast %cst_141 : f32 to vector<1x256xf32>
    %554 = arith.select %552, %547, %553 : vector<1x256xi1>, vector<1x256xf32>
    %555 = arith.addf %538, %554 : vector<1x256xf32>
    %c238_i32 = arith.constant 238 : i32
    %556 = tpu.dynamic_rotate %28 by %c238_i32 dim 1 : vector<1x256xf32>, i32 -> vector<1x256xf32>
    %c238_i32_142 = arith.constant 238 : i32
    %557 = tpu.dynamic_rotate %32 by %c238_i32_142 dim 1 : vector<1x256xf32>, i32 -> vector<1x256xf32>
    %c33 = arith.constant 33 : index
    %558 = memref.load %arg5[%c33] : memref<98xf32, #tpu.memory_space<smem>>
    %559 = vector.broadcast %558 : f32 to vector<1x256xf32>
    %560 = arith.mulf %559, %556 : vector<1x256xf32>
    %c82 = arith.constant 82 : index
    %561 = memref.load %arg5[%c82] : memref<98xf32, #tpu.memory_space<smem>>
    %562 = vector.broadcast %561 : f32 to vector<1x256xf32>
    %563 = arith.mulf %562, %557 : vector<1x256xf32>
    %564 = arith.addf %560, %563 : vector<1x256xf32>
    %c14_i32_143 = arith.constant 14 : i32
    %565 = vector.broadcast %c14_i32_143 : i32 to vector<1x256xi32>
    %566 = arith.cmpi slt, %5, %565 : vector<1x256xi32>
    %c15_i32_144 = arith.constant 15 : i32
    %567 = vector.broadcast %c15_i32_144 : i32 to vector<1x256xi32>
    %568 = arith.cmpi slt, %4, %567 : vector<1x256xi32>
    %569 = arith.andi %566, %568 : vector<1x256xi1>
    %cst_145 = arith.constant 0.000000e+00 : f32
    %570 = vector.broadcast %cst_145 : f32 to vector<1x256xf32>
    %571 = arith.select %569, %564, %570 : vector<1x256xi1>, vector<1x256xf32>
    %572 = arith.addf %555, %571 : vector<1x256xf32>
    %c237_i32 = arith.constant 237 : i32
    %573 = tpu.dynamic_rotate %28 by %c237_i32 dim 1 : vector<1x256xf32>, i32 -> vector<1x256xf32>
    %c237_i32_146 = arith.constant 237 : i32
    %574 = tpu.dynamic_rotate %32 by %c237_i32_146 dim 1 : vector<1x256xf32>, i32 -> vector<1x256xf32>
    %c34 = arith.constant 34 : index
    %575 = memref.load %arg5[%c34] : memref<98xf32, #tpu.memory_space<smem>>
    %576 = vector.broadcast %575 : f32 to vector<1x256xf32>
    %577 = arith.mulf %576, %573 : vector<1x256xf32>
    %c83 = arith.constant 83 : index
    %578 = memref.load %arg5[%c83] : memref<98xf32, #tpu.memory_space<smem>>
    %579 = vector.broadcast %578 : f32 to vector<1x256xf32>
    %580 = arith.mulf %579, %574 : vector<1x256xf32>
    %581 = arith.addf %577, %580 : vector<1x256xf32>
    %c13_i32_147 = arith.constant 13 : i32
    %582 = vector.broadcast %c13_i32_147 : i32 to vector<1x256xi32>
    %583 = arith.cmpi slt, %5, %582 : vector<1x256xi32>
    %c15_i32_148 = arith.constant 15 : i32
    %584 = vector.broadcast %c15_i32_148 : i32 to vector<1x256xi32>
    %585 = arith.cmpi slt, %4, %584 : vector<1x256xi32>
    %586 = arith.andi %583, %585 : vector<1x256xi1>
    %cst_149 = arith.constant 0.000000e+00 : f32
    %587 = vector.broadcast %cst_149 : f32 to vector<1x256xf32>
    %588 = arith.select %586, %581, %587 : vector<1x256xi1>, vector<1x256xf32>
    %589 = arith.addf %572, %588 : vector<1x256xf32>
    %c227_i32 = arith.constant 227 : i32
    %590 = tpu.dynamic_rotate %28 by %c227_i32 dim 1 : vector<1x256xf32>, i32 -> vector<1x256xf32>
    %c227_i32_150 = arith.constant 227 : i32
    %591 = tpu.dynamic_rotate %32 by %c227_i32_150 dim 1 : vector<1x256xf32>, i32 -> vector<1x256xf32>
    %c35 = arith.constant 35 : index
    %592 = memref.load %arg5[%c35] : memref<98xf32, #tpu.memory_space<smem>>
    %593 = vector.broadcast %592 : f32 to vector<1x256xf32>
    %594 = arith.mulf %593, %590 : vector<1x256xf32>
    %c84 = arith.constant 84 : index
    %595 = memref.load %arg5[%c84] : memref<98xf32, #tpu.memory_space<smem>>
    %596 = vector.broadcast %595 : f32 to vector<1x256xf32>
    %597 = arith.mulf %596, %591 : vector<1x256xf32>
    %598 = arith.addf %594, %597 : vector<1x256xf32>
    %c3_i32_151 = arith.constant 3 : i32
    %599 = vector.broadcast %c3_i32_151 : i32 to vector<1x256xi32>
    %600 = arith.cmpi sge, %5, %599 : vector<1x256xi32>
    %c14_i32_152 = arith.constant 14 : i32
    %601 = vector.broadcast %c14_i32_152 : i32 to vector<1x256xi32>
    %602 = arith.cmpi slt, %4, %601 : vector<1x256xi32>
    %603 = arith.andi %600, %602 : vector<1x256xi1>
    %cst_153 = arith.constant 0.000000e+00 : f32
    %604 = vector.broadcast %cst_153 : f32 to vector<1x256xf32>
    %605 = arith.select %603, %598, %604 : vector<1x256xi1>, vector<1x256xf32>
    %606 = arith.addf %589, %605 : vector<1x256xf32>
    %c226_i32 = arith.constant 226 : i32
    %607 = tpu.dynamic_rotate %28 by %c226_i32 dim 1 : vector<1x256xf32>, i32 -> vector<1x256xf32>
    %c226_i32_154 = arith.constant 226 : i32
    %608 = tpu.dynamic_rotate %32 by %c226_i32_154 dim 1 : vector<1x256xf32>, i32 -> vector<1x256xf32>
    %c36 = arith.constant 36 : index
    %609 = memref.load %arg5[%c36] : memref<98xf32, #tpu.memory_space<smem>>
    %610 = vector.broadcast %609 : f32 to vector<1x256xf32>
    %611 = arith.mulf %610, %607 : vector<1x256xf32>
    %c85 = arith.constant 85 : index
    %612 = memref.load %arg5[%c85] : memref<98xf32, #tpu.memory_space<smem>>
    %613 = vector.broadcast %612 : f32 to vector<1x256xf32>
    %614 = arith.mulf %613, %608 : vector<1x256xf32>
    %615 = arith.addf %611, %614 : vector<1x256xf32>
    %c2_i32_155 = arith.constant 2 : i32
    %616 = vector.broadcast %c2_i32_155 : i32 to vector<1x256xi32>
    %617 = arith.cmpi sge, %5, %616 : vector<1x256xi32>
    %c14_i32_156 = arith.constant 14 : i32
    %618 = vector.broadcast %c14_i32_156 : i32 to vector<1x256xi32>
    %619 = arith.cmpi slt, %4, %618 : vector<1x256xi32>
    %620 = arith.andi %617, %619 : vector<1x256xi1>
    %cst_157 = arith.constant 0.000000e+00 : f32
    %621 = vector.broadcast %cst_157 : f32 to vector<1x256xf32>
    %622 = arith.select %620, %615, %621 : vector<1x256xi1>, vector<1x256xf32>
    %623 = arith.addf %606, %622 : vector<1x256xf32>
    %c225_i32 = arith.constant 225 : i32
    %624 = tpu.dynamic_rotate %28 by %c225_i32 dim 1 : vector<1x256xf32>, i32 -> vector<1x256xf32>
    %c225_i32_158 = arith.constant 225 : i32
    %625 = tpu.dynamic_rotate %32 by %c225_i32_158 dim 1 : vector<1x256xf32>, i32 -> vector<1x256xf32>
    %c37 = arith.constant 37 : index
    %626 = memref.load %arg5[%c37] : memref<98xf32, #tpu.memory_space<smem>>
    %627 = vector.broadcast %626 : f32 to vector<1x256xf32>
    %628 = arith.mulf %627, %624 : vector<1x256xf32>
    %c86 = arith.constant 86 : index
    %629 = memref.load %arg5[%c86] : memref<98xf32, #tpu.memory_space<smem>>
    %630 = vector.broadcast %629 : f32 to vector<1x256xf32>
    %631 = arith.mulf %630, %625 : vector<1x256xf32>
    %632 = arith.addf %628, %631 : vector<1x256xf32>
    %c1_i32_159 = arith.constant 1 : i32
    %633 = vector.broadcast %c1_i32_159 : i32 to vector<1x256xi32>
    %634 = arith.cmpi sge, %5, %633 : vector<1x256xi32>
    %c14_i32_160 = arith.constant 14 : i32
    %635 = vector.broadcast %c14_i32_160 : i32 to vector<1x256xi32>
    %636 = arith.cmpi slt, %4, %635 : vector<1x256xi32>
    %637 = arith.andi %634, %636 : vector<1x256xi1>
    %cst_161 = arith.constant 0.000000e+00 : f32
    %638 = vector.broadcast %cst_161 : f32 to vector<1x256xf32>
    %639 = arith.select %637, %632, %638 : vector<1x256xi1>, vector<1x256xf32>
    %640 = arith.addf %623, %639 : vector<1x256xf32>
    %c224_i32 = arith.constant 224 : i32
    %641 = tpu.dynamic_rotate %28 by %c224_i32 dim 1 : vector<1x256xf32>, i32 -> vector<1x256xf32>
    %c224_i32_162 = arith.constant 224 : i32
    %642 = tpu.dynamic_rotate %32 by %c224_i32_162 dim 1 : vector<1x256xf32>, i32 -> vector<1x256xf32>
    %c38 = arith.constant 38 : index
    %643 = memref.load %arg5[%c38] : memref<98xf32, #tpu.memory_space<smem>>
    %644 = vector.broadcast %643 : f32 to vector<1x256xf32>
    %645 = arith.mulf %644, %641 : vector<1x256xf32>
    %c87 = arith.constant 87 : index
    %646 = memref.load %arg5[%c87] : memref<98xf32, #tpu.memory_space<smem>>
    %647 = vector.broadcast %646 : f32 to vector<1x256xf32>
    %648 = arith.mulf %647, %642 : vector<1x256xf32>
    %649 = arith.addf %645, %648 : vector<1x256xf32>
    %c14_i32_163 = arith.constant 14 : i32
    %650 = vector.broadcast %c14_i32_163 : i32 to vector<1x256xi32>
    %651 = arith.cmpi slt, %4, %650 : vector<1x256xi32>
    %cst_164 = arith.constant 0.000000e+00 : f32
    %652 = vector.broadcast %cst_164 : f32 to vector<1x256xf32>
    %653 = arith.select %651, %649, %652 : vector<1x256xi1>, vector<1x256xf32>
    %654 = arith.addf %640, %653 : vector<1x256xf32>
    %c223_i32 = arith.constant 223 : i32
    %655 = tpu.dynamic_rotate %28 by %c223_i32 dim 1 : vector<1x256xf32>, i32 -> vector<1x256xf32>
    %c223_i32_165 = arith.constant 223 : i32
    %656 = tpu.dynamic_rotate %32 by %c223_i32_165 dim 1 : vector<1x256xf32>, i32 -> vector<1x256xf32>
    %c39 = arith.constant 39 : index
    %657 = memref.load %arg5[%c39] : memref<98xf32, #tpu.memory_space<smem>>
    %658 = vector.broadcast %657 : f32 to vector<1x256xf32>
    %659 = arith.mulf %658, %655 : vector<1x256xf32>
    %c88 = arith.constant 88 : index
    %660 = memref.load %arg5[%c88] : memref<98xf32, #tpu.memory_space<smem>>
    %661 = vector.broadcast %660 : f32 to vector<1x256xf32>
    %662 = arith.mulf %661, %656 : vector<1x256xf32>
    %663 = arith.addf %659, %662 : vector<1x256xf32>
    %c15_i32_166 = arith.constant 15 : i32
    %664 = vector.broadcast %c15_i32_166 : i32 to vector<1x256xi32>
    %665 = arith.cmpi slt, %5, %664 : vector<1x256xi32>
    %c14_i32_167 = arith.constant 14 : i32
    %666 = vector.broadcast %c14_i32_167 : i32 to vector<1x256xi32>
    %667 = arith.cmpi slt, %4, %666 : vector<1x256xi32>
    %668 = arith.andi %665, %667 : vector<1x256xi1>
    %cst_168 = arith.constant 0.000000e+00 : f32
    %669 = vector.broadcast %cst_168 : f32 to vector<1x256xf32>
    %670 = arith.select %668, %663, %669 : vector<1x256xi1>, vector<1x256xf32>
    %671 = arith.addf %654, %670 : vector<1x256xf32>
    %c222_i32 = arith.constant 222 : i32
    %672 = tpu.dynamic_rotate %28 by %c222_i32 dim 1 : vector<1x256xf32>, i32 -> vector<1x256xf32>
    %c222_i32_169 = arith.constant 222 : i32
    %673 = tpu.dynamic_rotate %32 by %c222_i32_169 dim 1 : vector<1x256xf32>, i32 -> vector<1x256xf32>
    %c40 = arith.constant 40 : index
    %674 = memref.load %arg5[%c40] : memref<98xf32, #tpu.memory_space<smem>>
    %675 = vector.broadcast %674 : f32 to vector<1x256xf32>
    %676 = arith.mulf %675, %672 : vector<1x256xf32>
    %c89 = arith.constant 89 : index
    %677 = memref.load %arg5[%c89] : memref<98xf32, #tpu.memory_space<smem>>
    %678 = vector.broadcast %677 : f32 to vector<1x256xf32>
    %679 = arith.mulf %678, %673 : vector<1x256xf32>
    %680 = arith.addf %676, %679 : vector<1x256xf32>
    %c14_i32_170 = arith.constant 14 : i32
    %681 = vector.broadcast %c14_i32_170 : i32 to vector<1x256xi32>
    %682 = arith.cmpi slt, %5, %681 : vector<1x256xi32>
    %c14_i32_171 = arith.constant 14 : i32
    %683 = vector.broadcast %c14_i32_171 : i32 to vector<1x256xi32>
    %684 = arith.cmpi slt, %4, %683 : vector<1x256xi32>
    %685 = arith.andi %682, %684 : vector<1x256xi1>
    %cst_172 = arith.constant 0.000000e+00 : f32
    %686 = vector.broadcast %cst_172 : f32 to vector<1x256xf32>
    %687 = arith.select %685, %680, %686 : vector<1x256xi1>, vector<1x256xf32>
    %688 = arith.addf %671, %687 : vector<1x256xf32>
    %c221_i32 = arith.constant 221 : i32
    %689 = tpu.dynamic_rotate %28 by %c221_i32 dim 1 : vector<1x256xf32>, i32 -> vector<1x256xf32>
    %c221_i32_173 = arith.constant 221 : i32
    %690 = tpu.dynamic_rotate %32 by %c221_i32_173 dim 1 : vector<1x256xf32>, i32 -> vector<1x256xf32>
    %c41 = arith.constant 41 : index
    %691 = memref.load %arg5[%c41] : memref<98xf32, #tpu.memory_space<smem>>
    %692 = vector.broadcast %691 : f32 to vector<1x256xf32>
    %693 = arith.mulf %692, %689 : vector<1x256xf32>
    %c90 = arith.constant 90 : index
    %694 = memref.load %arg5[%c90] : memref<98xf32, #tpu.memory_space<smem>>
    %695 = vector.broadcast %694 : f32 to vector<1x256xf32>
    %696 = arith.mulf %695, %690 : vector<1x256xf32>
    %697 = arith.addf %693, %696 : vector<1x256xf32>
    %c13_i32_174 = arith.constant 13 : i32
    %698 = vector.broadcast %c13_i32_174 : i32 to vector<1x256xi32>
    %699 = arith.cmpi slt, %5, %698 : vector<1x256xi32>
    %c14_i32_175 = arith.constant 14 : i32
    %700 = vector.broadcast %c14_i32_175 : i32 to vector<1x256xi32>
    %701 = arith.cmpi slt, %4, %700 : vector<1x256xi32>
    %702 = arith.andi %699, %701 : vector<1x256xi1>
    %cst_176 = arith.constant 0.000000e+00 : f32
    %703 = vector.broadcast %cst_176 : f32 to vector<1x256xf32>
    %704 = arith.select %702, %697, %703 : vector<1x256xi1>, vector<1x256xf32>
    %705 = arith.addf %688, %704 : vector<1x256xf32>
    %c211_i32 = arith.constant 211 : i32
    %706 = tpu.dynamic_rotate %28 by %c211_i32 dim 1 : vector<1x256xf32>, i32 -> vector<1x256xf32>
    %c211_i32_177 = arith.constant 211 : i32
    %707 = tpu.dynamic_rotate %32 by %c211_i32_177 dim 1 : vector<1x256xf32>, i32 -> vector<1x256xf32>
    %c42 = arith.constant 42 : index
    %708 = memref.load %arg5[%c42] : memref<98xf32, #tpu.memory_space<smem>>
    %709 = vector.broadcast %708 : f32 to vector<1x256xf32>
    %710 = arith.mulf %709, %706 : vector<1x256xf32>
    %c91 = arith.constant 91 : index
    %711 = memref.load %arg5[%c91] : memref<98xf32, #tpu.memory_space<smem>>
    %712 = vector.broadcast %711 : f32 to vector<1x256xf32>
    %713 = arith.mulf %712, %707 : vector<1x256xf32>
    %714 = arith.addf %710, %713 : vector<1x256xf32>
    %c3_i32_178 = arith.constant 3 : i32
    %715 = vector.broadcast %c3_i32_178 : i32 to vector<1x256xi32>
    %716 = arith.cmpi sge, %5, %715 : vector<1x256xi32>
    %c13_i32_179 = arith.constant 13 : i32
    %717 = vector.broadcast %c13_i32_179 : i32 to vector<1x256xi32>
    %718 = arith.cmpi slt, %4, %717 : vector<1x256xi32>
    %719 = arith.andi %716, %718 : vector<1x256xi1>
    %cst_180 = arith.constant 0.000000e+00 : f32
    %720 = vector.broadcast %cst_180 : f32 to vector<1x256xf32>
    %721 = arith.select %719, %714, %720 : vector<1x256xi1>, vector<1x256xf32>
    %722 = arith.addf %705, %721 : vector<1x256xf32>
    %c210_i32 = arith.constant 210 : i32
    %723 = tpu.dynamic_rotate %28 by %c210_i32 dim 1 : vector<1x256xf32>, i32 -> vector<1x256xf32>
    %c210_i32_181 = arith.constant 210 : i32
    %724 = tpu.dynamic_rotate %32 by %c210_i32_181 dim 1 : vector<1x256xf32>, i32 -> vector<1x256xf32>
    %c43 = arith.constant 43 : index
    %725 = memref.load %arg5[%c43] : memref<98xf32, #tpu.memory_space<smem>>
    %726 = vector.broadcast %725 : f32 to vector<1x256xf32>
    %727 = arith.mulf %726, %723 : vector<1x256xf32>
    %c92 = arith.constant 92 : index
    %728 = memref.load %arg5[%c92] : memref<98xf32, #tpu.memory_space<smem>>
    %729 = vector.broadcast %728 : f32 to vector<1x256xf32>
    %730 = arith.mulf %729, %724 : vector<1x256xf32>
    %731 = arith.addf %727, %730 : vector<1x256xf32>
    %c2_i32_182 = arith.constant 2 : i32
    %732 = vector.broadcast %c2_i32_182 : i32 to vector<1x256xi32>
    %733 = arith.cmpi sge, %5, %732 : vector<1x256xi32>
    %c13_i32_183 = arith.constant 13 : i32
    %734 = vector.broadcast %c13_i32_183 : i32 to vector<1x256xi32>
    %735 = arith.cmpi slt, %4, %734 : vector<1x256xi32>
    %736 = arith.andi %733, %735 : vector<1x256xi1>
    %cst_184 = arith.constant 0.000000e+00 : f32
    %737 = vector.broadcast %cst_184 : f32 to vector<1x256xf32>
    %738 = arith.select %736, %731, %737 : vector<1x256xi1>, vector<1x256xf32>
    %739 = arith.addf %722, %738 : vector<1x256xf32>
    %c209_i32 = arith.constant 209 : i32
    %740 = tpu.dynamic_rotate %28 by %c209_i32 dim 1 : vector<1x256xf32>, i32 -> vector<1x256xf32>
    %c209_i32_185 = arith.constant 209 : i32
    %741 = tpu.dynamic_rotate %32 by %c209_i32_185 dim 1 : vector<1x256xf32>, i32 -> vector<1x256xf32>
    %c44 = arith.constant 44 : index
    %742 = memref.load %arg5[%c44] : memref<98xf32, #tpu.memory_space<smem>>
    %743 = vector.broadcast %742 : f32 to vector<1x256xf32>
    %744 = arith.mulf %743, %740 : vector<1x256xf32>
    %c93 = arith.constant 93 : index
    %745 = memref.load %arg5[%c93] : memref<98xf32, #tpu.memory_space<smem>>
    %746 = vector.broadcast %745 : f32 to vector<1x256xf32>
    %747 = arith.mulf %746, %741 : vector<1x256xf32>
    %748 = arith.addf %744, %747 : vector<1x256xf32>
    %c1_i32_186 = arith.constant 1 : i32
    %749 = vector.broadcast %c1_i32_186 : i32 to vector<1x256xi32>
    %750 = arith.cmpi sge, %5, %749 : vector<1x256xi32>
    %c13_i32_187 = arith.constant 13 : i32
    %751 = vector.broadcast %c13_i32_187 : i32 to vector<1x256xi32>
    %752 = arith.cmpi slt, %4, %751 : vector<1x256xi32>
    %753 = arith.andi %750, %752 : vector<1x256xi1>
    %cst_188 = arith.constant 0.000000e+00 : f32
    %754 = vector.broadcast %cst_188 : f32 to vector<1x256xf32>
    %755 = arith.select %753, %748, %754 : vector<1x256xi1>, vector<1x256xf32>
    %756 = arith.addf %739, %755 : vector<1x256xf32>
    %c208_i32 = arith.constant 208 : i32
    %757 = tpu.dynamic_rotate %28 by %c208_i32 dim 1 : vector<1x256xf32>, i32 -> vector<1x256xf32>
    %c208_i32_189 = arith.constant 208 : i32
    %758 = tpu.dynamic_rotate %32 by %c208_i32_189 dim 1 : vector<1x256xf32>, i32 -> vector<1x256xf32>
    %c45 = arith.constant 45 : index
    %759 = memref.load %arg5[%c45] : memref<98xf32, #tpu.memory_space<smem>>
    %760 = vector.broadcast %759 : f32 to vector<1x256xf32>
    %761 = arith.mulf %760, %757 : vector<1x256xf32>
    %c94 = arith.constant 94 : index
    %762 = memref.load %arg5[%c94] : memref<98xf32, #tpu.memory_space<smem>>
    %763 = vector.broadcast %762 : f32 to vector<1x256xf32>
    %764 = arith.mulf %763, %758 : vector<1x256xf32>
    %765 = arith.addf %761, %764 : vector<1x256xf32>
    %c13_i32_190 = arith.constant 13 : i32
    %766 = vector.broadcast %c13_i32_190 : i32 to vector<1x256xi32>
    %767 = arith.cmpi slt, %4, %766 : vector<1x256xi32>
    %cst_191 = arith.constant 0.000000e+00 : f32
    %768 = vector.broadcast %cst_191 : f32 to vector<1x256xf32>
    %769 = arith.select %767, %765, %768 : vector<1x256xi1>, vector<1x256xf32>
    %770 = arith.addf %756, %769 : vector<1x256xf32>
    %c207_i32 = arith.constant 207 : i32
    %771 = tpu.dynamic_rotate %28 by %c207_i32 dim 1 : vector<1x256xf32>, i32 -> vector<1x256xf32>
    %c207_i32_192 = arith.constant 207 : i32
    %772 = tpu.dynamic_rotate %32 by %c207_i32_192 dim 1 : vector<1x256xf32>, i32 -> vector<1x256xf32>
    %c46 = arith.constant 46 : index
    %773 = memref.load %arg5[%c46] : memref<98xf32, #tpu.memory_space<smem>>
    %774 = vector.broadcast %773 : f32 to vector<1x256xf32>
    %775 = arith.mulf %774, %771 : vector<1x256xf32>
    %c95 = arith.constant 95 : index
    %776 = memref.load %arg5[%c95] : memref<98xf32, #tpu.memory_space<smem>>
    %777 = vector.broadcast %776 : f32 to vector<1x256xf32>
    %778 = arith.mulf %777, %772 : vector<1x256xf32>
    %779 = arith.addf %775, %778 : vector<1x256xf32>
    %c15_i32_193 = arith.constant 15 : i32
    %780 = vector.broadcast %c15_i32_193 : i32 to vector<1x256xi32>
    %781 = arith.cmpi slt, %5, %780 : vector<1x256xi32>
    %c13_i32_194 = arith.constant 13 : i32
    %782 = vector.broadcast %c13_i32_194 : i32 to vector<1x256xi32>
    %783 = arith.cmpi slt, %4, %782 : vector<1x256xi32>
    %784 = arith.andi %781, %783 : vector<1x256xi1>
    %cst_195 = arith.constant 0.000000e+00 : f32
    %785 = vector.broadcast %cst_195 : f32 to vector<1x256xf32>
    %786 = arith.select %784, %779, %785 : vector<1x256xi1>, vector<1x256xf32>
    %787 = arith.addf %770, %786 : vector<1x256xf32>
    %c206_i32 = arith.constant 206 : i32
    %788 = tpu.dynamic_rotate %28 by %c206_i32 dim 1 : vector<1x256xf32>, i32 -> vector<1x256xf32>
    %c206_i32_196 = arith.constant 206 : i32
    %789 = tpu.dynamic_rotate %32 by %c206_i32_196 dim 1 : vector<1x256xf32>, i32 -> vector<1x256xf32>
    %c47 = arith.constant 47 : index
    %790 = memref.load %arg5[%c47] : memref<98xf32, #tpu.memory_space<smem>>
    %791 = vector.broadcast %790 : f32 to vector<1x256xf32>
    %792 = arith.mulf %791, %788 : vector<1x256xf32>
    %c96 = arith.constant 96 : index
    %793 = memref.load %arg5[%c96] : memref<98xf32, #tpu.memory_space<smem>>
    %794 = vector.broadcast %793 : f32 to vector<1x256xf32>
    %795 = arith.mulf %794, %789 : vector<1x256xf32>
    %796 = arith.addf %792, %795 : vector<1x256xf32>
    %c14_i32_197 = arith.constant 14 : i32
    %797 = vector.broadcast %c14_i32_197 : i32 to vector<1x256xi32>
    %798 = arith.cmpi slt, %5, %797 : vector<1x256xi32>
    %c13_i32_198 = arith.constant 13 : i32
    %799 = vector.broadcast %c13_i32_198 : i32 to vector<1x256xi32>
    %800 = arith.cmpi slt, %4, %799 : vector<1x256xi32>
    %801 = arith.andi %798, %800 : vector<1x256xi1>
    %cst_199 = arith.constant 0.000000e+00 : f32
    %802 = vector.broadcast %cst_199 : f32 to vector<1x256xf32>
    %803 = arith.select %801, %796, %802 : vector<1x256xi1>, vector<1x256xf32>
    %804 = arith.addf %787, %803 : vector<1x256xf32>
    %c205_i32 = arith.constant 205 : i32
    %805 = tpu.dynamic_rotate %28 by %c205_i32 dim 1 : vector<1x256xf32>, i32 -> vector<1x256xf32>
    %c205_i32_200 = arith.constant 205 : i32
    %806 = tpu.dynamic_rotate %32 by %c205_i32_200 dim 1 : vector<1x256xf32>, i32 -> vector<1x256xf32>
    %c48 = arith.constant 48 : index
    %807 = memref.load %arg5[%c48] : memref<98xf32, #tpu.memory_space<smem>>
    %808 = vector.broadcast %807 : f32 to vector<1x256xf32>
    %809 = arith.mulf %808, %805 : vector<1x256xf32>
    %c97 = arith.constant 97 : index
    %810 = memref.load %arg5[%c97] : memref<98xf32, #tpu.memory_space<smem>>
    %811 = vector.broadcast %810 : f32 to vector<1x256xf32>
    %812 = arith.mulf %811, %806 : vector<1x256xf32>
    %813 = arith.addf %809, %812 : vector<1x256xf32>
    %c13_i32_201 = arith.constant 13 : i32
    %814 = vector.broadcast %c13_i32_201 : i32 to vector<1x256xi32>
    %815 = arith.cmpi slt, %5, %814 : vector<1x256xi32>
    %c13_i32_202 = arith.constant 13 : i32
    %816 = vector.broadcast %c13_i32_202 : i32 to vector<1x256xi32>
    %817 = arith.cmpi slt, %4, %816 : vector<1x256xi32>
    %818 = arith.andi %815, %817 : vector<1x256xi1>
    %cst_203 = arith.constant 0.000000e+00 : f32
    %819 = vector.broadcast %cst_203 : f32 to vector<1x256xf32>
    %820 = arith.select %818, %813, %819 : vector<1x256xi1>, vector<1x256xf32>
    %821 = arith.addf %804, %820 : vector<1x256xf32>
    %c0_204 = arith.constant 0 : index
    %822 = memref.load %arg6[%c0_204] : memref<1xf32, #tpu.memory_space<smem>>
    %823 = vector.broadcast %822 : f32 to vector<1x256xf32>
    %824 = arith.addf %821, %823 : vector<1x256xf32>
    %825 = arith.negf %824 : vector<1x256xf32>
    %826 = math.exp %825 : vector<1x256xf32>
    %cst_205 = arith.constant 1.000000e+00 : f32
    %827 = vector.broadcast %cst_205 : f32 to vector<1x256xf32>
    %828 = arith.addf %827, %826 : vector<1x256xf32>
    %829 = arith.divf %827, %828 : vector<1x256xf32>
    %830 = vector.broadcast %829 : vector<1x256xf32> to vector<32x256xf32>
    %831 = arith.mulf %26, %830 : vector<32x256xf32>
    %832 = arith.addf %1, %831 : vector<32x256xf32>
    %c0_206 = arith.constant 0 : index
    %c0_207 = arith.constant 0 : index
    %c0_208 = arith.constant 0 : index
    %833 = vector.load %arg7[%c0_206, %c0_207, %c0_208] : memref<1x32x256xf32, #tpu.memory_space<vmem>>, vector<1x32x256xf32>
    %834 = vector.shape_cast %833 : vector<1x32x256xf32> to vector<32x256xf32>
    %835 = vector.shape_cast %832 : vector<32x256xf32> to vector<1x32x256xf32>
    tpu.vector_store %arg7[%c0_206, %c0_207, %c0_208], %835 {strides = array<i32>} : memref<1x32x256xf32, #tpu.memory_space<vmem>>, vector<1x32x256xf32>,
    return
  }
  func.func @transform_0(%arg0: i32) -> (i32, i32, i32) {
    %c0_i32 = arith.constant 0 : i32
    %c0_i32_0 = arith.constant 0 : i32
    %c0_i32_1 = arith.constant 0 : i32
    return %arg0, %c0_i32, %c0_i32_0 : i32, i32, i32
  }
  func.func @transform_1(%arg0: i32) -> (i32, i32) {
    %c0_i32 = arith.constant 0 : i32
    %c0_i32_0 = arith.constant 0 : i32
    %c0_i32_1 = arith.constant 0 : i32
    return %c0_i32, %c0_i32_0 : i32, i32
  }
  func.func @transform_2(%arg0: i32) -> (i32, i32) {
    %c0_i32 = arith.constant 0 : i32
    %c0_i32_0 = arith.constant 0 : i32
    %c0_i32_1 = arith.constant 0 : i32
    return %c0_i32, %c0_i32_0 : i32, i32
  }
  func.func @transform_3(%arg0: i32) -> (i32, i32) {
    %c0_i32 = arith.constant 0 : i32
    %c0_i32_0 = arith.constant 0 : i32
    %c0_i32_1 = arith.constant 0 : i32
    return %c0_i32, %c0_i32_0 : i32, i32
  }
  func.func @transform_4(%arg0: i32) -> i32 {
    %c0_i32 = arith.constant 0 : i32
    %c0_i32_0 = arith.constant 0 : i32
    return %c0_i32 : i32
  }
  func.func @transform_5(%arg0: i32) -> i32 {
    %c0_i32 = arith.constant 0 : i32
    %c0_i32_0 = arith.constant 0 : i32
    return %c0_i32 : i32
  }
  func.func @transform_6(%arg0: i32) -> (i32, i32, i32) {
    %c0_i32 = arith.constant 0 : i32
    %c0_i32_0 = arith.constant 0 : i32
    %c0_i32_1 = arith.constant 0 : i32
    return %arg0, %c0_i32, %c0_i32_0 : i32, i32, i32
  }
}

</mosaic_0001>

<bundles_post_ra>
// kernel: cbam_forward.1
= control target key start
LH: loop header
LB: loop body
LE: loop exit
PB: predicated region body
PF: predicated region fallthrough
CT: control target
= control target key end

     0   :  { %s5150_s0 = inlined_call_operand.vmem [shape: f32[2,32,256], index: 0, kind: input, shape index: {}]   ;;  %s5151_s1 = inlined_call_operand.vmem [shape: f32[2,32], index: 1, kind: input, shape index: {}]   ;;  %s5152_s2 = inlined_call_operand.vmem [shape: f32[32,2], index: 2, kind: input, shape index: {}]   ;;  %s5153_s3 = inlined_call_operand.vmem [shape: s32[2,256], index: 3, kind: input, shape index: {}]   ;;  %s5154_s4 = inlined_call_operand.vmem [shape: f32[98], index: 4, kind: input, shape index: {}]   ;;  %s5155_s5 = inlined_call_operand.<no memory space> [shape: f32[1], index: 5, kind: input, shape index: {}]   ;;  %s5156_s6 = inlined_call_operand.vmem [shape: f32[2,32,256], index: 6, kind: output, shape index: {}]  }
   0x1   :  { %5337 = sst [smem:[#allocation122_spill]] %s5150_s0 }
   0x2   :  { %5338 = sst [smem:[#allocation123_spill]] %s5151_s1 }
   0x3   :  { %5339 = sst [smem:[#allocation124_spill]] %s5152_s2 }
   0x4   :  { %5340 = sst [smem:[#allocation125_spill]] %s5153_s3 }
   0x5   :  { %5341 = sst [smem:[#allocation126_spill]] %s5154_s4 }
   0x6   :  { %5342 = sst [smem:[#allocation127_spill]] %s5156_s6 }
   0x7   :  { %11 = sst [smem:[#allocation2]] %s5155_s5 }
   0x8   :  { %12 = vsyncpa [#allocation4], 0  ;;  %s2541_s23 = smov 0  }
   0x9 LB: > { %5343 = sst [smem:[#allocation6_spill]] %s2450_s23  ;;  %s2196_s24 = sadd.s32 4294967295, %s2450_s23   ;;  %s2450_s23 = sphi %s2541_s23, %s18_s23  }
   0xa   : > { %p2198_p0 = scmp.ge.s32.totalorder %s2450_s23, 1  ;;  %p180_p1 = scmp.lt.s32.totalorder %s2450_s23, 3 }
   0xb   : > { %s5344_s4 = sld [smem:[#allocation126_spill]]  ;;  %p2332_p3 = scmp.eq.s32.totalorder %s2196_s24, 0 }
   0xc   : > { %p181_p2 = pnand %p2198_p0, %p180_p1  ;;  %s2452_s5 = smov [#allocation3]  }
   0xe   : > { %p2328_p4 = pneg %p181_p2  ;;  %225 = sbr.rel (%p181_p2) target bundleno = 1309 (0x51d), region = 44 }
  0x10   : > { %p2329_p5 = pnand %p2332_p3, %p2328_p4 }
  0x11   : > { %s201_s27 = sshll.u32 %s5344_s4, 4  ;;  %s202_s27 = int_to_ptr.vmem [resolvable:$true] %s201_s27 }
  0x12   : > { %2331 = dma.vmem_to_smem (!%p2329_p5), %s202_s27, 16, %s2452_s5, [#allocation4]  }
  0x13   : > { %2445 = dma.done.wait (%p2332_p3), [#allocation4], 16  }
  0x14   : > { %2447 = vsyncadd (%p2332_p3), [#allocation4], 4294967280 }
  0x15   : > { %232 = sfence }
  0x16   : > { %p257_p6 = scmp.lt.s32.totalorder %s2196_s24, 1  ;;  %s5346_s0 = sld [smem:[#allocation122_spill]]  ;;  %vm311_vm0 = vcmask 261120   ;;  %vm371_vm1 = vcmask 1041408   ;;  %vm358_vm2 = vcmask 15360   ;;  %v2453_v40 = vmov 0  }
  0x17   : > { %s5348_s1 = sld [smem:[#allocation123_spill]]  ;;  %2394 = vset.pattern.permute.xlu0 %v2453_v40  ;;  %2395 = vset.pattern.permute.xlu1 %v2453_v40  ;;  %s5215_s18 = smov 51  }
  0x18   : > { %s5878_s24 = smov (!%p257_p6, %s2196_s24), 1  ;;  %s5349_s2 = sld [smem:[#allocation124_spill]]  ;;  %2393 = vset.pattern.permute.xlu2 %v2453_v40 }
  0x19   : > { %5345 = sst [smem:[#allocation7_spill]] %s5878_s24  ;;  %s5157_s28 = sshll.u32 %s5878_s24, 6 }
  0x1a   : > { %s5241_s19 = smov 50   ;;  %s5239_s20 = smov 49  }
  0x1b   : > { %s5229_s21 = smov 48   ;;  %s5235_s22 = smov 47  }
  0x1c   : > { %s2560_s7 = scalar_lea.vmem %s5346_s0, %s5157_s28  ;;  %s5234_s25 = smov 46  }
  0x1d   : > { %5347 = sst [smem:[#allocation8_spill]] %s2560_s7  ;;  %v2563_v0 = vld [vmem:[%s2560_s7 + $0x30] sm:$0xff]  ;;  %v2566_v1 = vld [vmem:[%s2560_s7 + $0x38] sm:$0xff]  ;;  %v2569_v2 = vld [vmem:[%s2560_s7 + $0x20] sm:$0xff]  ;;  %s5225_s26 = smov 45  }
  0x1e   : > { %v304_v3 = vadd.f32 %v2566_v1, %v2563_v0  ;;  %v2574_v4 = vld [vmem:[%s2560_s7 + $0x28] sm:$0xff]  ;;  %v2577_v5 = vld [vmem:[%s2560_s7 + $0x10] sm:$0xff]  ;;  %v2580_v6 = vld [vmem:[%s2560_s7 + $0x18] sm:$0xff]  ;;  %v292_v9 = vmax.f32 %v2563_v0, %v2566_v1  ;;  %s5232_s27 = smov 35   ;;  %s5231_s5 = smov 34  }
  0x1f   : > { %v301_v7 = vadd.f32 %v2574_v4, %v2569_v2  ;;  %v298_v8 = vadd.f32 %v2580_v6, %v2577_v5  ;;  %v289_v10 = vmax.f32 %v2569_v2, %v2574_v4  ;;  %v286_v11 = vmax.f32 %v2577_v5, %v2580_v6  ;;  %v2593_v12 = vld [vmem:[%s2560_s7] sm:$0xff]  ;;  %v2596_v13 = vld [vmem:[%s2560_s7 + $0x8] sm:$0xff]  ;;  %v278_v36 = vld [vmem:[%s5349_s2 + $0x10] sm:$0xff]  ;;  %s5223_s29 = smov 33   ;;  %s5227_s30 = smov 32  }
  0x20   : > { %305 = vadd.xlane.f32.xlu0 %v304_v3  ;;  %v295_v14 = vadd.f32 %v2596_v13, %v2593_v12  ;;  %v283_v15 = vmax.f32 %v2593_v12, %v2596_v13  ;;  %v275_v26 = vld [vmem:[%s5348_s1] sm:$0x3]  ;;  %v277_v34 = vld [vmem:[%s5349_s2 + $0x8] sm:$0xff]  ;;  %v279_v37 = vld [vmem:[%s5349_s2 + $0x18] sm:$0xff]  ;;  %s5226_s8 = smov 31   ;;  %s5221_s9 = smov 30  }
  0x21   : > { %302 = vadd.xlane.f32.xlu1 %v301_v7  ;;  %299 = vadd.xlane.f32.xlu2 %v298_v8  ;;  %v276_v35 = vld [vmem:[%s5349_s2] sm:$0xff]  ;;  %s5224_s10 = smov 29   ;;  %s5158_s11 = smov 19  }
  0x22   : > { %s5219_s12 = smov 18   ;;  %s5222_s13 = smov 17  }
  0x23   : > { %s5160_s14 = smov 16   ;;  %s5220_s15 = smov 15  }
  0x24   : > { %s5162_s16 = smov 14   ;;  %s5164_s17 = smov 13  }
  0x25   : > { %s5168_s28 = smov 3   ;;  %s5428_s0 = smov 98  }
  0x26   : > { %s5435_s1 = smov 81   ;;  %s5436_s2 = smov 95  }
  0x27   : > { %s5440_s4 = smov 79   ;;  %s5441_s23 = smov 78  }
  0x28   : > { %293 = vmax.xlane.f32.xlu0 %v292_v9  ;;  %s5442_s6 = smov 83   ;;  %s5446_s7 = smov 50  }
  0x29   : > { %290 = vmax.xlane.f32.xlu1 %v289_v10  ;;  %287 = vmax.xlane.f32.xlu2 %v286_v11  ;;  %s5447_s24 = smov 49   ;;  %s3369_s3 = sld [smem:[#allocation3 + $0x5]] }
  0x30   : > { %296 = vadd.xlane.f32.xlu0 %v295_v14 }
  0x31   : > { %284 = vmax.xlane.f32.xlu1 %v283_v15 }
  0x93   : > { %v306_v16 = vpop.xlane.xlu0 %305 }
  0x94   : > { %v303_v17 = vpop.xlane.xlu1 %302  ;;  %v310_v18 = vmul.f32 0.00390625, %v306_v16  ;;  %v300_v19 = vpop.xlane.xlu2 %299 }
  0x95   : > { %v309_v20 = vmul.f32 0.00390625, %v303_v17  ;;  %v308_v21 = vmul.f32 0.00390625, %v300_v19 }
  0x96   : > { %348 = vmatpush.msra.mxu1 %v310_v18 }
  0x98   : > { %349 = vmatpush.msra.mxu1 %v309_v20 }
  0x9a   : > { %350 = vmatpush.msra.mxu1 %v308_v21 }
  0x9b   : > { %v294_v22 = vpop.xlane.xlu0 %293 }
  0x9c   : > { %327 = vmatpush.msra.mxu0 %v294_v22  ;;  %v291_v23 = vpop.xlane.xlu1 %290  ;;  %v288_v24 = vpop.xlane.xlu2 %287 }
  0x9e   : > { %328 = vmatpush.msra.mxu0 %v291_v23 }
  0xa0   : > { %329 = vmatpush.msra.mxu0 %v288_v24 }
  0xa3   : > { %v297_v25 = vpop.xlane.xlu0 %296 }
  0xa4   : > { %v285_v27 = vpop.xlane.xlu1 %284  ;;  %v307_v28 = vmul.f32 0.00390625, %v297_v25 }
  0xa5   : > { %330 = vmatpush.msra.mxu0 %v285_v27 }
  0xa6   : > { %351 = vmatpush.msra.mxu1 %v307_v28  ;;  %2208 = vmatmul.msk.f32.vlgmr.msra.gmra.mxu0 %vm311_vm0, %v275_v26 }
  0xa7   : > { %2209 = vmatmul.msk.f32.vlgmr.msra.gmra.mxu1 %vm311_vm0, %v275_v26 }
 0x123   : > { %v332_v29 = vpop.f32.mrf.mxu0 }
 0x124   : > { %v335_v30 = vmax.f32 %v332_v29, 0.0  ;;  %v353_v31 = vpop.f32.mrf.mxu1 }
 0x125   : > { %v356_v32 = vmax.f32 %v353_v31, 0.0 }
 0x127   : > { %v357_v33 = vadd.f32 %v356_v32, %v335_v30 }
 0x129   : > { %2210 = vmatpush.msk.msrb.mxu1 %vm371_vm1, %v357_v33  ;;  %2323 = vmatpush.msk.msra.mxu2 %vm371_vm1, %v357_v33 }
 0x12a   : > { %2212 = vmatmul.msk.f32.vlgmr.msra.gmra.mxu2 %vm358_vm2, %v277_v34  ;;  %2211 = vmatmul.msk.f32.vlgmr.msrb.gmra.mxu1 %vm358_vm2, %v276_v35 }
 0x132   : > { %2213 = vmatmul.msk.f32.gmra.mxu2 %vm358_vm2, %v278_v36 }
 0x13a   : > { %2214 = vmatmul.msk.f32.gmra.mxu2 %vm358_vm2, %v279_v37 }
 0x1a7   : > { %v392_v38 = vpop.f32.mrf.mxu1 }
 0x1a8   : > { %v2215_v39 = vmul.f32 -1.442695, %v392_v38 }
 0x1aa   : > { %2396 = vpow2.f32 %v2215_v39 }
 0x1ad   : > { %v395_v41 = vpop.f32.mrf.mxu2 }
 0x1ae   : > { %v2216_v42 = vmul.f32 -1.442695, %v395_v41 }
 0x1b0   : > { %v2397_v43 = vpop.eup %2396  ;;  %2398 = vpow2.f32 %v2216_v42 }
 0x1b1   : > { %v416_v44 = vadd.f32 1.0, %v2397_v43 }
 0x1b3   : > { %2400 = vrcp.f32 %v416_v44  ;;  %v431_v51 = vand.u32 2147483648, %v416_v44  ;;  %vm425_vm3 = vweird.f32 %v416_v44  ;;  %v429_v53 = vand.u32 2147483647, %v416_v44 }
 0x1b5   : > { %v398_v45 = vpop.f32.mrf.mxu2  ;;  %v432_v60 = vor.u32 1.1754944e-38, %v431_v51  ;;  %vm430_vm6 = vcmp.eq.f32.partialorder %v429_v53, 8.507059e+37  ;;  %v2454_v51 = vmov 1.0  }
 0x1b6   : > { %v2399_v46 = vpop.eup %2398  ;;  %v2217_v47 = vmul.f32 -1.442695, %v398_v45 }
 0x1b7   : > { %v417_v48 = vadd.f32 1.0, %v2399_v46 }
 0x1b8   : > { %2402 = vpow2.f32 %v2217_v47 }
 0x1b9   : > { %v2401_v49 = vpop.eup %2400  ;;  %2404 = vrcp.f32 %v417_v48  ;;  %v446_v7 = vand.u32 2147483648, %v417_v48  ;;  %v444_v10 = vand.u32 2147483647, %v417_v48  ;;  %vm440_vm8 = vweird.f32 %v417_v48 }
 0x1ba   : > { %v421_v50 = vmul.f32 %v2401_v49, %v416_v44  ;;  %vm426_vm4 = vweird.f32 %v2401_v49 }
 0x1bb   : > { %vm427_vm5 = vmor %vm425_vm3, %vm426_vm4  ;;  %v447_v17 = vor.u32 1.1754944e-38, %v446_v7  ;;  %vm445_vm10 = vcmp.eq.f32.partialorder %v444_v10, 8.507059e+37 }
 0x1bc   : > { %v422_v52 = vsub.f32 1.0, %v421_v50 }
 0x1bd   : > { %v401_v54 = vpop.f32.mrf.mxu2 }
 0x1be   : > { %v2403_v55 = vpop.eup %2402  ;;  %v2218_v56 = vmul.f32 -1.442695, %v401_v54  ;;  %v423_v57 = vmul.f32 %v2401_v49, %v422_v52 }
 0x1bf   : > { %v2405_v58 = vpop.eup %2404  ;;  %v418_v59 = vadd.f32 1.0, %v2403_v55 }
 0x1c0   : > { %2406 = vpow2.f32 %v2218_v56  ;;  %v436_v61 = vmul.f32 %v2405_v58, %v417_v48  ;;  %v424_v62 = vadd.f32 %v2401_v49, %v423_v57  ;;  %vm441_vm7 = vweird.f32 %v2405_v58 }
 0x1c1   : > { %2408 = vrcp.f32 %v418_v59  ;;  %vm442_vm9 = vmor %vm440_vm8, %vm441_vm7  ;;  %v461_v22 = vand.u32 2147483648, %v418_v59  ;;  %v459_v24 = vand.u32 2147483647, %v418_v59  ;;  %vm455_vm12 = vweird.f32 %v418_v59 }
 0x1c2   : > { %v437_v63 = vsub.f32 1.0, %v436_v61  ;;  %v428_v3 = vsel %vm427_vm5, %v2401_v49, %v424_v62 }
 0x1c3   : > { %v433_v8 = vsel %vm430_vm6, %v432_v60, %v428_v3  ;;  %v462_v27 = vor.u32 1.1754944e-38, %v461_v22  ;;  %vm460_vm14 = vcmp.eq.f32.partialorder %v459_v24, 8.507059e+37 }
 0x1c4   : > { %v438_v9 = vmul.f32 %v2405_v58, %v437_v63  ;;  %482 = vperm.xlu2 %2393, %v433_v8  }
 0x1c6   : > { %v2407_v11 = vpop.eup %2406  ;;  %v439_v14 = vadd.f32 %v2405_v58, %v438_v9 }
 0x1c7   : > { %v2409_v15 = vpop.eup %2408  ;;  %v419_v16 = vadd.f32 1.0, %v2407_v11 }
 0x1c8   : > { %v443_v18 = vsel %vm442_vm9, %v2405_v58, %v439_v14  ;;  %v451_v19 = vmul.f32 %v2409_v15, %v418_v59  ;;  %vm456_vm11 = vweird.f32 %v2409_v15 }
 0x1c9   : > { %2410 = vrcp.f32 %v419_v16  ;;  %v448_v20 = vsel %vm445_vm10, %v447_v17, %v443_v18  ;;  %vm457_vm13 = vmor %vm455_vm12, %vm456_vm11  ;;  %v476_v31 = vand.u32 2147483648, %v419_v16  ;;  %vm470_vm15 = vweird.f32 %v419_v16 }
 0x1ca   : > { %487 = vperm.xlu0 %2394, %v448_v20   ;;  %v452_v21 = vsub.f32 1.0, %v451_v19  ;;  %v474_v33 = vand.u32 2147483647, %v419_v16 }
 0x1cb   : > { %v477_v35 = vor.u32 1.1754944e-38, %v476_v31 }
 0x1cc   : > { %v453_v23 = vmul.f32 %v2409_v15, %v452_v21  ;;  %vm475_vm3 = vcmp.eq.f32.partialorder %v474_v33, 8.507059e+37 }
 0x1ce   : > { %v454_v25 = vadd.f32 %v2409_v15, %v453_v23 }
 0x1cf   : > { %v2411_v26 = vpop.eup %2410 }
 0x1d0   : > { %v458_v28 = vsel %vm457_vm13, %v2409_v15, %v454_v25  ;;  %v466_v29 = vmul.f32 %v2411_v26, %v419_v16  ;;  %vm471_vm1 = vweird.f32 %v2411_v26 }
 0x1d1   : > { %v463_v30 = vsel %vm460_vm14, %v462_v27, %v458_v28  ;;  %vm472_vm2 = vmor %vm470_vm15, %vm471_vm1 }
 0x1d2   : > { %492 = vperm.xlu1 %2395, %v463_v30   ;;  %v467_v32 = vsub.f32 1.0, %v466_v29 }
 0x1d4   : > { %v468_v34 = vmul.f32 %v2411_v26, %v467_v32 }
 0x1d6   : > { %v469_v36 = vadd.f32 %v2411_v26, %v468_v34 }
 0x1d8   : > { %v473_v37 = vsel %vm472_vm2, %v2411_v26, %v469_v36 }
 0x1d9   : > { %v478_v38 = vsel %vm475_vm3, %v477_v35, %v473_v37 }
 0x1da   : > { %497 = vperm.xlu2 %2393, %v478_v38  }
 0x21e   : > { %v483_v39 = vpop.permute.xlu2 %482 }
 0x21f   : > { %v2634_v47 = vmul.f32 %v483_v39, %v2593_v12 }
 0x221   : > { %5354 = vst [vmem:[#allocation13_spill] sm:$0xff] %v2634_v47 }
 0x234   : > { %v498_v40 = vpop.permute.xlu2 %497 }
 0x235   : > { %v2620_v41 = vmul.f32 %v498_v40, %v2563_v0  ;;  %v2623_v42 = vmul.f32 %v498_v40, %v2566_v1  ;;  %v2637_v0 = vmul.f32 %v483_v39, %v2596_v13 }
 0x237   : > { %5350 = vst [vmem:[#allocation9_spill] sm:$0xff] %v2620_v41  ;;  %541 = vmatpush.msra.mxu3 %v2620_v41  ;;  %561 = vmatpush.msrb.mxu0 %v2623_v42 }
 0x238   : > { %5351 = vst [vmem:[#allocation10_spill] sm:$0xff] %v2623_v42 }
 0x239   : > { %5355 = vst [vmem:[#allocation14_spill] sm:$0xff] %v2637_v0 }
 0x23c   : > { %v488_v43 = vpop.permute.xlu0 %487 }
 0x23d   : > { %v2628_v44 = vmul.f32 %v488_v43, %v2577_v5  ;;  %v2631_v45 = vmul.f32 %v488_v43, %v2580_v6 }
 0x23f   : > { %5352 = vst [vmem:[#allocation11_spill] sm:$0xff] %v2628_v44  ;;  %v509_v5 = vmax.f32 %v2628_v44, %v2620_v41  ;;  %v518_v6 = vmax.f32 %v2631_v45, %v2623_v42 }
 0x240   : > { %5353 = vst [vmem:[#allocation12_spill] sm:$0xff] %v2631_v45 }
 0x244   : > { %v493_v46 = vpop.permute.xlu1 %492 }
 0x245   : > { %v2640_v1 = vmul.f32 %v493_v46, %v2569_v2  ;;  %v2643_v48 = vmul.f32 %v493_v46, %v2574_v4 }
 0x247   : > { %5356 = vst [vmem:[#allocation15_spill] sm:$0xff] %v2640_v1  ;;  %v508_v49 = vmax.f32 %v2634_v47, %v2640_v1  ;;  %v517_v12 = vmax.f32 %v2637_v0, %v2643_v48  ;;  %542 = vmatpush.msra.mxu3 %v2640_v1  ;;  %562 = vmatpush.msrb.mxu0 %v2643_v48 }
 0x248   : > { %5357 = vst [vmem:[#allocation16_spill] sm:$0xff] %v2643_v48 }
 0x249   : > { %v510_v2 = vmax.f32 %v508_v49, %v509_v5  ;;  %v519_v13 = vmax.f32 %v517_v12, %v518_v6  ;;  %543 = vmatpush.msra.mxu3 %v2628_v44  ;;  %563 = vmatpush.msrb.mxu0 %v2631_v45 }
 0x24b   : > { %v511_v4 = vrot.slane %v510_v2, 4  ;;  %v520_v50 = vrot.slane %v519_v13, 4  ;;  %544 = vmatpush.msra.mxu3 %v2634_v47  ;;  %564 = vmatpush.msrb.mxu0 %v2637_v0 }
 0x24c   : > { %2219 = vmatmul.msk.f32.vlgmr.msra.gmra.mxu3 %vm311_vm0, %v2454_v51  ;;  %2220 = vmatmul.msk.f32.vlgmr.msrb.gmra.mxu0 %vm311_vm0, %v2454_v51  ;;  %v575_v51 = vlaneseq }
 0x24d   : > { %v512_v52 = vmax.f32 %v510_v2, %v511_v4  ;;  %v521_v53 = vmax.f32 %v519_v13, %v520_v50 }
 0x24f   : > { %v513_v54 = vrot.slane %v512_v52, 2  ;;  %v522_v55 = vrot.slane %v521_v53, 2 }
 0x251   : > { %v514_v56 = vmax.f32 %v512_v52, %v513_v54  ;;  %v523_v57 = vmax.f32 %v521_v53, %v522_v55  ;;  %v2931_v55 = vand.u32 127, %v575_v51 }
 0x253   : > { %v515_v58 = vrot.slane %v514_v56, 1  ;;  %v524_v59 = vrot.slane %v523_v57, 1  ;;  %vm5305_vm0 = vcmp.lt.s32.totalorder %v2931_v55, 1  ;;  %vm5307_vm4 = vcmp.lt.s32.totalorder %v2931_v55, 127 }
 0x254   : > { %vm5303_vm5 = vcmp.lt.s32.totalorder %v2931_v55, 126  ;;  %vm5302_vm6 = vcmp.lt.s32.totalorder %v2931_v55, 125  ;;  %vm5304_vm7 = vcmp.lt.s32.totalorder %v2931_v55, 115  ;;  %vm5300_vm8 = vcmp.lt.s32.totalorder %v2931_v55, 114 }
 0x255   : > { %v2661_v60 = vmax.f32 %v514_v56, %v515_v58  ;;  %v2663_v61 = vmax.f32 %v523_v57, %v524_v59  ;;  %vm5299_vm9 = vcmp.lt.s32.totalorder %v2931_v55, 113  ;;  %vm5301_vm10 = vcmp.lt.s32.totalorder %v2931_v55, 112 }
 0x256   : > { %vm5294_vm11 = vcmp.lt.s32.totalorder %v2931_v55, 111  ;;  %vm5292_vm12 = vcmp.lt.s32.totalorder %v2931_v55, 110  ;;  %vm5296_vm13 = vcmp.lt.s32.totalorder %v2931_v55, 109  ;;  %vm5288_vm14 = vcmp.lt.s32.totalorder %v2931_v55, 99 }
 0x257   : > { %5358 = vst [vmem:[#allocation17_spill] sm:$0xff] %v2663_v61  ;;  %573 = vrot.lane.b32.xlu1 %v2663_v61, %s5215_s18  ;;  %607 = vrot.lane.b32.xlu0 %v2661_v60, %s5241_s19  ;;  %vm5230_vm15 = vcmp.lt.s32.totalorder %v2931_v55, 98  ;;  %vm5289_vm1 = vcmp.lt.s32.totalorder %v2931_v55, 97  ;;  %vm5228_vm2 = vcmp.lt.s32.totalorder %v2931_v55, 96  ;;  %vm5233_vm3 = vcmp.lt.s32.totalorder %v2931_v55, 95 }
 0x258   : > { %571 = vrot.lane.b32.xlu2 %v2661_v60, %s5215_s18 }
 0x25f   : > { %641 = vrot.lane.b32.xlu1 %v2663_v61, %s5239_s20  ;;  %673 = vrot.lane.b32.xlu0 %v2663_v61, %s5229_s21 }
 0x260   : > { %609 = vrot.lane.b32.xlu2 %v2663_v61, %s5241_s19 }
 0x267   : > { %671 = vrot.lane.b32.xlu1 %v2661_v60, %s5229_s21  ;;  %701 = vrot.lane.b32.xlu0 %v2661_v60, %s5235_s22 }
 0x268   : > { %639 = vrot.lane.b32.xlu2 %v2661_v60, %s5239_s20 }
 0x26f   : > { %735 = vrot.lane.b32.xlu1 %v2663_v61, %s5234_s25  ;;  %767 = vrot.lane.b32.xlu0 %v2663_v61, %s5225_s26 }
 0x270   : > { %703 = vrot.lane.b32.xlu2 %v2663_v61, %s5235_s22 }
 0x277   : > { %765 = vrot.lane.b32.xlu1 %v2661_v60, %s5225_s26  ;;  %797 = vrot.lane.b32.xlu0 %v2661_v60, %s5232_s27 }
 0x278   : > { %733 = vrot.lane.b32.xlu2 %v2661_v60, %s5234_s25 }
 0x27f   : > { %831 = vrot.lane.b32.xlu1 %v2663_v61, %s5231_s5  ;;  %862 = vrot.lane.b32.xlu0 %v2663_v61, %s5223_s29 }
 0x280   : > { %799 = vrot.lane.b32.xlu2 %v2663_v61, %s5232_s27 }
 0x287   : > { %860 = vrot.lane.b32.xlu1 %v2661_v60, %s5223_s29  ;;  %891 = vrot.lane.b32.xlu0 %v2661_v60, %s5227_s30 }
 0x288   : > { %829 = vrot.lane.b32.xlu2 %v2661_v60, %s5231_s5 }
 0x28f   : > { %923 = vrot.lane.b32.xlu1 %v2663_v61, %s5226_s8  ;;  %954 = vrot.lane.b32.xlu0 %v2663_v61, %s5221_s9 }
 0x290   : > { %893 = vrot.lane.b32.xlu2 %v2663_v61, %s5227_s30 }
 0x297   : > { %952 = vrot.lane.b32.xlu1 %v2661_v60, %s5221_s9  ;;  %983 = vrot.lane.b32.xlu0 %v2661_v60, %s5224_s10 }
 0x298   : > { %921 = vrot.lane.b32.xlu2 %v2661_v60, %s5226_s8 }
 0x29f   : > { %1016 = vrot.lane.b32.xlu1 %v2663_v61, %s5158_s11  ;;  %1048 = vrot.lane.b32.xlu0 %v2663_v61, %s5219_s12 }
 0x2a0   : > { %985 = vrot.lane.b32.xlu2 %v2663_v61, %s5224_s10 }
 0x2a7   : > { %1046 = vrot.lane.b32.xlu1 %v2661_v60, %s5219_s12  ;;  %1077 = vrot.lane.b32.xlu0 %v2661_v60, %s5222_s13 }
 0x2a8   : > { %1014 = vrot.lane.b32.xlu2 %v2661_v60, %s5158_s11  ;;  %s5166_s11 = smov 2  }
 0x2af   : > { %1110 = vrot.lane.b32.xlu1 %v2663_v61, %s5160_s14  ;;  %1140 = vrot.lane.b32.xlu0 %v2663_v61, %s5220_s15 }
 0x2b0   : > { %1079 = vrot.lane.b32.xlu2 %v2663_v61, %s5222_s13 }
 0x2b2   : > { %v2737_v62 = vpop.permute.xlu2 %571 }
 0x2b7   : > { %1138 = vrot.lane.b32.xlu1 %v2661_v60, %s5220_s15  ;;  %1169 = vrot.lane.b32.xlu0 %v2661_v60, %s5162_s16 }
 0x2b8   : > { %1108 = vrot.lane.b32.xlu2 %v2661_v60, %s5160_s14  ;;  %s5170_s14 = smov 1  }
 0x2ba   : > { %v2745_v63 = vpop.permute.xlu2 %609 }
 0x2bf   : > { %1202 = vrot.lane.b32.xlu1 %v2663_v61, %s5164_s17  ;;  %1233 = vrot.lane.b32.xlu0 %v2663_v61, %s5168_s28 }
 0x2c0   : > { %1171 = vrot.lane.b32.xlu2 %v2663_v61, %s5162_s16  ;;  %s5174_s16 = smov 127  }
 0x2c2   : > { %v2753_v3 = vpop.permute.xlu2 %639 }
 0x2c7   : > { %1231 = vrot.lane.b32.xlu1 %v2661_v60, %s5168_s28  ;;  %1261 = vrot.lane.b32.xlu0 %v2661_v60, %s5166_s11  ;;  %s5180_s28 = smov 115  }
 0x2c8   : > { %1200 = vrot.lane.b32.xlu2 %v2661_v60, %s5164_s17  ;;  %s5172_s17 = smov 126  }
 0x2c9   : > { %v2761_v7 = vpop.permute.xlu1 %573  ;;  %v2763_v8 = vpop.permute.xlu0 %607 }
 0x2ca   : > { %v2765_v9 = vpop.permute.xlu2 %703  ;;  %v566_v42 = vpop.f32.mrf.mxu0 }
 0x2cb   : > { %v2972_v0 = vmul.f32 0.03125, %v566_v42 }
 0x2cd   : > { %5367 = vst [vmem:[#allocation26_spill] sm:$0xff] %v2972_v0 }
 0x2cf   : > { %1293 = vrot.lane.b32.xlu1 %v2663_v61, %s5170_s14  ;;  %1339 = vrot.lane.b32.xlu0 %v2663_v61, %s5174_s16 }
 0x2d0   : > { %1263 = vrot.lane.b32.xlu2 %v2663_v61, %s5166_s11  ;;  %s5176_s11 = smov 125  }
 0x2d1   : > { %v2773_v10 = vpop.permute.xlu1 %641  ;;  %v2775_v11 = vpop.permute.xlu0 %673 }
 0x2d2   : > { %v2777_v14 = vpop.permute.xlu2 %733 }
 0x2d7   : > { %1337 = vrot.lane.b32.xlu1 %v2661_v60, %s5174_s16  ;;  %1367 = vrot.lane.b32.xlu0 %v2661_v60, %s5172_s17  ;;  %s5186_s16 = smov 112  }
 0x2d8   : > { %1291 = vrot.lane.b32.xlu2 %v2661_v60, %s5170_s14  ;;  %s5178_s14 = smov 114  }
 0x2d9   : > { %v2785_v15 = vpop.permute.xlu1 %671  ;;  %v2787_v16 = vpop.permute.xlu0 %701 }
 0x2da   : > { %v2789_v17 = vpop.permute.xlu2 %799 }
 0x2df   : > { %1399 = vrot.lane.b32.xlu1 %v2663_v61, %s5176_s11  ;;  %1429 = vrot.lane.b32.xlu0 %v2663_v61, %s5180_s28 }
 0x2e0   : > { %1369 = vrot.lane.b32.xlu2 %v2663_v61, %s5172_s17  ;;  %s5182_s17 = smov 113  }
 0x2e1   : > { %v2797_v18 = vpop.permute.xlu1 %735  ;;  %v2799_v19 = vpop.permute.xlu0 %767 }
 0x2e2   : > { %v2801_v20 = vpop.permute.xlu2 %829 }
 0x2e7   : > { %1427 = vrot.lane.b32.xlu1 %v2661_v60, %s5180_s28  ;;  %1459 = vrot.lane.b32.xlu0 %v2661_v60, %s5178_s14  ;;  %s5192_s28 = smov 109  }
 0x2e8   : > { %1397 = vrot.lane.b32.xlu2 %v2661_v60, %s5176_s11  ;;  %s5184_s11 = smov 111  }
 0x2e9   : > { %v2809_v21 = vpop.permute.xlu1 %765  ;;  %v2811_v22 = vpop.permute.xlu0 %797 }
 0x2ea   : > { %v2813_v23 = vpop.permute.xlu2 %893 }
 0x2ef   : > { %1492 = vrot.lane.b32.xlu1 %v2663_v61, %s5182_s17  ;;  %1523 = vrot.lane.b32.xlu0 %v2663_v61, %s5186_s16 }
 0x2f0   : > { %1461 = vrot.lane.b32.xlu2 %v2663_v61, %s5178_s14  ;;  %s5188_s14 = smov 110  }
 0x2f1   : > { %v2821_v24 = vpop.permute.xlu1 %831  ;;  %v2823_v25 = vpop.permute.xlu0 %862 }
 0x2f2   : > { %v2825_v26 = vpop.permute.xlu2 %921 }
 0x2f7   : > { %1521 = vrot.lane.b32.xlu1 %v2661_v60, %s5186_s16  ;;  %1551 = vrot.lane.b32.xlu0 %v2661_v60, %s5184_s11  ;;  %s5198_s16 = smov 97  }
 0x2f8   : > { %1490 = vrot.lane.b32.xlu2 %v2661_v60, %s5182_s17  ;;  %s5190_s17 = smov 99  }
 0x2f9   : > { %v2833_v27 = vpop.permute.xlu1 %860  ;;  %v2835_v28 = vpop.permute.xlu0 %891 }
 0x2fa   : > { %v2837_v29 = vpop.permute.xlu2 %985 }
 0x2ff   : > { %1584 = vrot.lane.b32.xlu1 %v2663_v61, %s5188_s14  ;;  %1615 = vrot.lane.b32.xlu0 %v2663_v61, %s5192_s28 }
 0x300   : > { %1553 = vrot.lane.b32.xlu2 %v2663_v61, %s5184_s11  ;;  %s5194_s11 = smov 98  }
 0x301   : > { %v2845_v30 = vpop.permute.xlu1 %923  ;;  %v2847_v31 = vpop.permute.xlu0 %954 }
 0x302   : > { %v2849_v32 = vpop.permute.xlu2 %1014 }
 0x307   : > { %1613 = vrot.lane.b32.xlu1 %v2661_v60, %s5192_s28  ;;  %1644 = vrot.lane.b32.xlu0 %v2661_v60, %s5190_s17  ;;  %s5252_s28 = smov 94  }
 0x308   : > { %1582 = vrot.lane.b32.xlu2 %v2661_v60, %s5188_s14  ;;  %s5196_s14 = smov 96  }
 0x309   : > { %v2857_v33 = vpop.permute.xlu1 %952  ;;  %v2859_v34 = vpop.permute.xlu0 %983 }
 0x30a   : > { %v2861_v35 = vpop.permute.xlu2 %1079 }
 0x30f   : > { %1678 = vrot.lane.b32.xlu1 %v2663_v61, %s5194_s11  ;;  %1709 = vrot.lane.b32.xlu0 %v2663_v61, %s5198_s16 }
 0x310   : > { %1646 = vrot.lane.b32.xlu2 %v2663_v61, %s5190_s17  ;;  %s5200_s17 = smov 95  }
 0x311   : > { %v2869_v36 = vpop.permute.xlu1 %1016  ;;  %v2871_v37 = vpop.permute.xlu0 %1048 }
 0x312   : > { %v2873_v38 = vpop.permute.xlu2 %1108 }
 0x317   : > { %1707 = vrot.lane.b32.xlu1 %v2661_v60, %s5198_s16  ;;  %1738 = vrot.lane.b32.xlu0 %v2661_v60, %s5196_s14  ;;  %s5204_s16 = smov 82  }
 0x318   : > { %1676 = vrot.lane.b32.xlu2 %v2661_v60, %s5194_s11  ;;  %s5202_s11 = smov 93  }
 0x319   : > { %v2881_v39 = vpop.permute.xlu1 %1046  ;;  %v2883_v40 = vpop.permute.xlu0 %1077 }
 0x31a   : > { %v2885_v43 = vpop.permute.xlu2 %1171 }
 0x31f   : > { %1770 = vrot.lane.b32.xlu1 %v2663_v61, %s5200_s17  ;;  %1801 = vrot.lane.b32.xlu0 %v2663_v61, %s5252_s28 }
 0x320   : > { %1740 = vrot.lane.b32.xlu2 %v2663_v61, %s5196_s14  ;;  %s5206_s14 = smov 83  }
 0x321   : > { %v2893_v46 = vpop.permute.xlu1 %1110  ;;  %v2895_v5 = vpop.permute.xlu0 %1140 }
 0x322   : > { %v2897_v6 = vpop.permute.xlu2 %1200 }
 0x327   : > { %1799 = vrot.lane.b32.xlu1 %v2661_v60, %s5252_s28  ;;  %1830 = vrot.lane.b32.xlu0 %v2661_v60, %s5202_s11 }
 0x328   : > { %1768 = vrot.lane.b32.xlu2 %v2661_v60, %s5200_s17  ;;  %s5247_s17 = smov 81  }
 0x329   : > { %v2905_v49 = vpop.permute.xlu1 %1138  ;;  %v2907_v12 = vpop.permute.xlu0 %1169 }
 0x32a   : > { %v2909_v2 = vpop.permute.xlu2 %1263 }
 0x32b   : > { %5359 = vst [vmem:[#allocation18_spill] sm:$0xff] %v2909_v2 }
 0x32f   : > { %1863 = vrot.lane.b32.xlu1 %v2663_v61, %s5206_s14  ;;  %1895 = vrot.lane.b32.xlu0 %v2663_v61, %s5204_s16 }
 0x330   : > { %1832 = vrot.lane.b32.xlu2 %v2663_v61, %s5202_s11  ;;  %s5236_s11 = smov 80  }
 0x331   : > { %v2917_v13 = vpop.permute.xlu1 %1202  ;;  %v2919_v4 = vpop.permute.xlu0 %1233 }
 0x332   : > { %v1292_v50 = vpop.permute.xlu2 %1291 }
 0x337   : > { %1893 = vrot.lane.b32.xlu1 %v2661_v60, %s5204_s16  ;;  %1924 = vrot.lane.b32.xlu0 %v2661_v60, %s5247_s17  ;;  %s5245_s16 = smov 79  }
 0x338   : > { %1861 = vrot.lane.b32.xlu2 %v2661_v60, %s5206_s14  ;;  %s5242_s14 = smov 78  }
 0x339   : > { %v2927_v52 = vpop.permute.xlu1 %1231  ;;  %v2929_v53 = vpop.permute.xlu0 %1261 }
 0x33a   : > { %5360 = vst [vmem:[#allocation19_spill] sm:$0xff] %v2929_v53  ;;  %v1370_v54 = vpop.permute.xlu2 %1369 }
 0x33f   : > { %1957 = vrot.lane.b32.xlu1 %v2663_v61, %s5236_s11  ;;  %1987 = vrot.lane.b32.xlu0 %v2663_v61, %s5245_s16 }
 0x340   : > { %1926 = vrot.lane.b32.xlu2 %v2663_v61, %s5247_s17  ;;  %s5427_s17 = smov 93  }
 0x341   : > { %v1294_v56 = vpop.permute.xlu1 %1293  ;;  %v1340_v59 = vpop.permute.xlu0 %1339 }
 0x342   : > { %v2942_v57 = vsel %vm5305_vm0, %v1292_v50, %v1294_v56  ;;  %v2946_v58 = vsel %vm5305_vm0, %v1294_v56, %v1292_v50  ;;  %v1398_v51 = vpop.permute.xlu2 %1397  ;;  %vm5315_vm0 = vcmp.lt.s32.totalorder %v2931_v55, 29 }
 0x343   : > { %5361 = vst [vmem:[#allocation20_spill] sm:$0xff] %v2942_v57 }
 0x344   : > { %5362 = vst [vmem:[#allocation21_spill] sm:$0xff] %v2946_v58 }
 0x347   : > { %1985 = vrot.lane.b32.xlu1 %v2661_v60, %s5245_s16  ;;  %2016 = vrot.lane.b32.xlu0 %v2661_v60, %s5242_s14  ;;  %s5423_s16 = smov 110  }
 0x348   : > { %1955 = vrot.lane.b32.xlu2 %v2661_v60, %s5236_s11  ;;  %s5415_s11 = smov 99  }
 0x349   : > { %v1338_v41 = vpop.permute.xlu1 %1337  ;;  %v1368_v48 = vpop.permute.xlu0 %1367 }
 0x34a   : > { %v2958_v50 = vsel %vm5307_vm4, %v1338_v41, %v1340_v59  ;;  %v2962_v56 = vsel %vm5307_vm4, %v1340_v59, %v1338_v41  ;;  %v1462_v1 = vpop.permute.xlu2 %1461  ;;  %v2966_v45 = vsel %vm5303_vm5, %v1368_v48, %v1370_v54  ;;  %v2970_v44 = vsel %vm5303_vm5, %v1370_v54, %v1368_v48 }
 0x34b   : > { %5363 = vst [vmem:[#allocation22_spill] sm:$0xff] %v2958_v50  ;;  %vm5314_vm5 = vcmp.lt.s32.totalorder %v2931_v55, 31  ;;  %vm5319_vm4 = vcmp.lt.s32.totalorder %v2931_v55, 19 }
 0x34c   : > { %5364 = vst [vmem:[#allocation23_spill] sm:$0xff] %v2962_v56 }
 0x34d   : > { %5365 = vst [vmem:[#allocation24_spill] sm:$0xff] %v2966_v45 }
 0x34e   : > { %5366 = vst [vmem:[#allocation25_spill] sm:$0xff] %v2970_v44 }
 0x34f   : > { %582 = vrot.lane.b32.xlu1 %v2972_v0, %s5215_s18  ;;  %616 = vrot.lane.b32.xlu0 %v2972_v0, %s5241_s19  ;;  %s5217_s18 = smov 77   ;;  %s5421_s19 = smov 97  }
 0x350   : > { %2018 = vrot.lane.b32.xlu2 %v2663_v61, %s5242_s14  ;;  %s5422_s14 = smov 96  }
 0x351   : > { %v1400_v41 = vpop.permute.xlu1 %1399  ;;  %v1430_v48 = vpop.permute.xlu0 %1429 }
 0x352   : > { %v2983_v59 = vsel %vm5302_vm6, %v1398_v51, %v1400_v41  ;;  %v2987_v42 = vsel %vm5302_vm6, %v1400_v41, %v1398_v51  ;;  %v1491_v54 = vpop.permute.xlu2 %1490  ;;  %vm5313_vm6 = vcmp.lt.s32.totalorder %v2931_v55, 32 }
 0x353   : > { %5368 = vst [vmem:[#allocation27_spill] sm:$0xff] %v2983_v59 }
 0x354   : > { %5369 = vst [vmem:[#allocation28_spill] sm:$0xff] %v2987_v42 }
 0x357   : > { %680 = vrot.lane.b32.xlu1 %v2972_v0, %s5229_s21  ;;  %710 = vrot.lane.b32.xlu0 %v2972_v0, %s5235_s22  ;;  %s5404_s21 = smov 1   ;;  %s5414_s22 = smov 109  }
 0x358   : > { %2047 = vrot.lane.b32.xlu2 %v2661_v60, %s5217_s18  ;;  %s5386_s18 = smov 14  }
 0x359   : > { %v1428_v47 = vpop.permute.xlu1 %1427  ;;  %v1460_v42 = vpop.permute.xlu0 %1459 }
 0x35a   : > { %v2999_v51 = vsel %vm5304_vm7, %v1428_v47, %v1430_v48  ;;  %v3003_v41 = vsel %vm5304_vm7, %v1430_v48, %v1428_v47  ;;  %v1554_v59 = vpop.permute.xlu2 %1553  ;;  %v3007_v44 = vsel %vm5300_vm8, %v1460_v42, %v1462_v1  ;;  %v3011_v45 = vsel %vm5300_vm8, %v1462_v1, %v1460_v42 }
 0x35b   : > { %5370 = vst [vmem:[#allocation29_spill] sm:$0xff] %v2999_v51  ;;  %vm5308_vm8 = vcmp.lt.s32.totalorder %v2931_v55, 34  ;;  %vm5316_vm7 = vcmp.lt.s32.totalorder %v2931_v55, 30 }
 0x35c   : > { %5371 = vst [vmem:[#allocation30_spill] sm:$0xff] %v3003_v41 }
 0x35d   : > { %5372 = vst [vmem:[#allocation31_spill] sm:$0xff] %v3007_v44 }
 0x35e   : > { %5373 = vst [vmem:[#allocation32_spill] sm:$0xff] %v3011_v45 }
 0x35f   : > { %774 = vrot.lane.b32.xlu1 %v2972_v0, %s5225_s26  ;;  %806 = vrot.lane.b32.xlu0 %v2972_v0, %s5232_s27  ;;  %s5399_s26 = smov 13   ;;  %s5410_s27 = smov 111  }
 0x360   : > { %648 = vrot.lane.b32.xlu2 %v2972_v0, %s5239_s20  ;;  %s5416_s20 = smov 113  }
 0x361   : > { %v1493_v47 = vpop.permute.xlu1 %1492  ;;  %v1524_v42 = vpop.permute.xlu0 %1523 }
 0x362   : > { %v3022_v48 = vsel %vm5299_vm9, %v1491_v54, %v1493_v47  ;;  %v3026_v1 = vsel %vm5299_vm9, %v1493_v47, %v1491_v54  ;;  %v1583_v45 = vpop.permute.xlu2 %1582  ;;  %vm5309_vm9 = vcmp.lt.s32.totalorder %v2931_v55, 35 }
 0x363   : > { %5374 = vst [vmem:[#allocation33_spill] sm:$0xff] %v3022_v48 }
 0x364   : > { %5375 = vst [vmem:[#allocation34_spill] sm:$0xff] %v3026_v1 }
 0x367   : > { %869 = vrot.lane.b32.xlu1 %v2972_v0, %s5223_s29  ;;  %900 = vrot.lane.b32.xlu0 %v2972_v0, %s5227_s30  ;;  %s5397_s29 = smov 127   ;;  %s5403_s30 = smov 114  }
 0x368   : > { %742 = vrot.lane.b32.xlu2 %v2972_v0, %s5234_s25  ;;  %s5411_s25 = smov 125  }
 0x369   : > { %v1522_v48 = vpop.permute.xlu1 %1521  ;;  %v1552_v1 = vpop.permute.xlu0 %1551 }
 0x36a   : > { %v3038_v54 = vsel %vm5301_vm10, %v1522_v48, %v1524_v42  ;;  %v3042_v47 = vsel %vm5301_vm10, %v1524_v42, %v1522_v48  ;;  %v1647_v44 = vpop.permute.xlu2 %1646  ;;  %v3046_v41 = vsel %vm5294_vm11, %v1552_v1, %v1554_v59  ;;  %v3050_v51 = vsel %vm5294_vm11, %v1554_v59, %v1552_v1 }
 0x36b   : > { %5376 = vst [vmem:[#allocation35_spill] sm:$0xff] %v3038_v54  ;;  %vm737_vm11 = vcmp.lt.s32.totalorder %v2931_v55, 46  ;;  %vm864_vm10 = vcmp.lt.s32.totalorder %v2931_v55, 33 }
 0x36c   : > { %5377 = vst [vmem:[#allocation36_spill] sm:$0xff] %v3042_v47 }
 0x36d   : > { %5378 = vst [vmem:[#allocation37_spill] sm:$0xff] %v3046_v41 }
 0x36e   : > { %5379 = vst [vmem:[#allocation38_spill] sm:$0xff] %v3050_v51 }
 0x36f   : > { %961 = vrot.lane.b32.xlu1 %v2972_v0, %s5221_s9  ;;  %992 = vrot.lane.b32.xlu0 %v2972_v0, %s5224_s10  ;;  %s5391_s9 = smov 2   ;;  %s5398_s10 = smov 126  }
 0x370   : > { %838 = vrot.lane.b32.xlu2 %v2972_v0, %s5231_s5  ;;  %s5409_s5 = smov 112  }
 0x371   : > { %v1585_v48 = vpop.permute.xlu1 %1584  ;;  %v1616_v1 = vpop.permute.xlu0 %1615 }
 0x372   : > { %v3061_v42 = vsel %vm5292_vm12, %v1583_v45, %v1585_v48  ;;  %v3065_v59 = vsel %vm5292_vm12, %v1585_v48, %v1583_v45  ;;  %v1677_v51 = vpop.permute.xlu2 %1676  ;;  %vm705_vm12 = vcmp.lt.s32.totalorder %v2931_v55, 47 }
 0x373   : > { %5380 = vst [vmem:[#allocation39_spill] sm:$0xff] %v3061_v42 }
 0x374   : > { %5381 = vst [vmem:[#allocation40_spill] sm:$0xff] %v3065_v59 }
 0x377   : > { %1055 = vrot.lane.b32.xlu1 %v2972_v0, %s5219_s12  ;;  %1086 = vrot.lane.b32.xlu0 %v2972_v0, %s5222_s13  ;;  %s5387_s12 = smov 19   ;;  %s5392_s13 = smov 16  }
 0x378   : > { %930 = vrot.lane.b32.xlu2 %v2972_v0, %s5226_s8  ;;  %s5402_s8 = smov 115  }
 0x379   : > { %v1614_v42 = vpop.permute.xlu1 %1613  ;;  %v1645_v59 = vpop.permute.xlu0 %1644 }
 0x37a   : > { %v3077_v45 = vsel %vm5296_vm13, %v1614_v42, %v1616_v1  ;;  %v3081_v48 = vsel %vm5296_vm13, %v1616_v1, %v1614_v42  ;;  %v1741_v41 = vpop.permute.xlu2 %1740  ;;  %v3085_v47 = vsel %vm5288_vm14, %v1645_v59, %v1647_v44  ;;  %v3089_v54 = vsel %vm5288_vm14, %v1647_v44, %v1645_v59 }
 0x37b   : > { %5382 = vst [vmem:[#allocation41_spill] sm:$0xff] %v3077_v45  ;;  %vm675_vm14 = vcmp.lt.s32.totalorder %v2931_v55, 48  ;;  %vm769_vm13 = vcmp.lt.s32.totalorder %v2931_v55, 45 }
 0x37c   : > { %5383 = vst [vmem:[#allocation42_spill] sm:$0xff] %v3081_v48 }
 0x37d   : > { %5384 = vst [vmem:[#allocation43_spill] sm:$0xff] %v3085_v47 }
 0x37e   : > { %5385 = vst [vmem:[#allocation44_spill] sm:$0xff] %v3089_v54 }
 0x37f   : > { %1147 = vrot.lane.b32.xlu1 %v2972_v0, %s5220_s15  ;;  %1178 = vrot.lane.b32.xlu0 %v2972_v0, %s5386_s18  ;;  %s5390_s15 = smov 3  }
 0x380   : > { %1023 = vrot.lane.b32.xlu2 %v2972_v0, %s5387_s12 }
 0x381   : > { %v1679_v42 = vpop.permute.xlu1 %1678  ;;  %v1710_v59 = vpop.permute.xlu0 %1709 }
 0x382   : > { %v3100_v1 = vsel %vm5230_vm15, %v1677_v51, %v1679_v42  ;;  %v3104_v44 = vsel %vm5230_vm15, %v1679_v42, %v1677_v51  ;;  %v1769_v54 = vpop.permute.xlu2 %1768  ;;  %vm5238_vm15 = vcmp.lt.s32.totalorder %v2931_v55, 93 }
 0x383   : > { %5388 = vst [vmem:[#allocation45_spill] sm:$0xff] %v3100_v1 }
 0x384   : > { %5389 = vst [vmem:[#allocation46_spill] sm:$0xff] %v3104_v44 }
 0x387   : > { %1240 = vrot.lane.b32.xlu1 %v2972_v0, %s5390_s15  ;;  %1270 = vrot.lane.b32.xlu0 %v2972_v0, %s5391_s9 }
 0x388   : > { %1117 = vrot.lane.b32.xlu2 %v2972_v0, %s5392_s13 }
 0x389   : > { %v1708_v1 = vpop.permute.xlu1 %1707  ;;  %v1739_v44 = vpop.permute.xlu0 %1738 }
 0x38a   : > { %v3116_v51 = vsel %vm5289_vm1, %v1708_v1, %v1710_v59  ;;  %v3120_v42 = vsel %vm5289_vm1, %v1710_v59, %v1708_v1  ;;  %v1833_v47 = vpop.permute.xlu2 %1832  ;;  %v3124_v48 = vsel %vm5228_vm2, %v1739_v44, %v1741_v41  ;;  %v3128_v45 = vsel %vm5228_vm2, %v1741_v41, %v1739_v44 }
 0x38b   : > { %5393 = vst [vmem:[#allocation47_spill] sm:$0xff] %v3116_v51  ;;  %vm5240_vm2 = vcmp.lt.s32.totalorder %v2931_v55, 94  ;;  %vm602_vm1 = vcmask 1040384  }
 0x38c   : > { %5394 = vst [vmem:[#allocation48_spill] sm:$0xff] %v3120_v42 }
 0x38d   : > { %5395 = vst [vmem:[#allocation49_spill] sm:$0xff] %v3124_v48 }
 0x38e   : > { %5396 = vst [vmem:[#allocation50_spill] sm:$0xff] %v3128_v45 }
 0x38f   : > { %1346 = vrot.lane.b32.xlu1 %v2972_v0, %s5397_s29  ;;  %1376 = vrot.lane.b32.xlu0 %v2972_v0, %s5398_s10 }
 0x390   : > { %1209 = vrot.lane.b32.xlu2 %v2972_v0, %s5399_s26 }
 0x391   : > { %v1771_v1 = vpop.permute.xlu1 %1770  ;;  %v1802_v44 = vpop.permute.xlu0 %1801 }
 0x392   : > { %v3139_v59 = vsel %vm5233_vm3, %v1769_v54, %v1771_v1  ;;  %v3143_v41 = vsel %vm5233_vm3, %v1771_v1, %v1769_v54  ;;  %v1862_v45 = vpop.permute.xlu2 %1861  ;;  %vm5244_vm3 = vcmp.lt.s32.totalorder %v2931_v55, 83 }
 0x393   : > { %5400 = vst [vmem:[#allocation51_spill] sm:$0xff] %v3139_v59 }
 0x394   : > { %5401 = vst [vmem:[#allocation52_spill] sm:$0xff] %v3143_v41 }
 0x397   : > { %1436 = vrot.lane.b32.xlu1 %v2972_v0, %s5402_s8  ;;  %1468 = vrot.lane.b32.xlu0 %v2972_v0, %s5403_s30 }
 0x398   : > { %1300 = vrot.lane.b32.xlu2 %v2972_v0, %s5404_s21 }
 0x399   : > { %v1800_v59 = vpop.permute.xlu1 %1799  ;;  %v1831_v41 = vpop.permute.xlu0 %1830 }
 0x39a   : > { %v3155_v54 = vsel %vm5240_vm2, %v1800_v59, %v1802_v44  ;;  %v3159_v1 = vsel %vm5240_vm2, %v1802_v44, %v1800_v59  ;;  %v1927_v48 = vpop.permute.xlu2 %1926  ;;  %v3163_v42 = vsel %vm5238_vm15, %v1831_v41, %v1833_v47  ;;  %v3167_v51 = vsel %vm5238_vm15, %v1833_v47, %v1831_v41 }
 0x39b   : > { %5405 = vst [vmem:[#allocation53_spill] sm:$0xff] %v3155_v54  ;;  %vm5250_vm15 = vcmp.lt.s32.totalorder %v2931_v55, 82  ;;  %vm5249_vm2 = vcmp.lt.s32.totalorder %v2931_v55, 81 }
 0x39c   : > { %5406 = vst [vmem:[#allocation54_spill] sm:$0xff] %v3159_v1 }
 0x39d   : > { %5407 = vst [vmem:[#allocation55_spill] sm:$0xff] %v3163_v42 }
 0x39e   : > { %5408 = vst [vmem:[#allocation56_spill] sm:$0xff] %v3167_v51 }
 0x39f   : > { %1530 = vrot.lane.b32.xlu1 %v2972_v0, %s5409_s5  ;;  %1560 = vrot.lane.b32.xlu0 %v2972_v0, %s5410_s27 }
 0x3a0   : > { %1406 = vrot.lane.b32.xlu2 %v2972_v0, %s5411_s25 }
 0x3a1   : > { %v1864_v59 = vpop.permute.xlu1 %1863  ;;  %v1896_v41 = vpop.permute.xlu0 %1895 }
 0x3a2   : > { %v3178_v44 = vsel %vm5244_vm3, %v1862_v45, %v1864_v59  ;;  %v3182_v47 = vsel %vm5244_vm3, %v1864_v59, %v1862_v45  ;;  %v1956_v51 = vpop.permute.xlu2 %1955  ;;  %vm5284_vm3 = vcmp.lt.s32.totalorder %v2931_v55, 80 }
 0x3a3   : > { %5412 = vst [vmem:[#allocation57_spill] sm:$0xff] %v3178_v44 }
 0x3a4   : > { %5413 = vst [vmem:[#allocation58_spill] sm:$0xff] %v3182_v47 }
 0x3a7   : > { %1622 = vrot.lane.b32.xlu1 %v2972_v0, %s5414_s22  ;;  %1653 = vrot.lane.b32.xlu0 %v2972_v0, %s5415_s11 }
 0x3a8   : > { %1499 = vrot.lane.b32.xlu2 %v2972_v0, %s5416_s20 }
 0x3a9   : > { %v1894_v44 = vpop.permute.xlu1 %1893  ;;  %v1925_v47 = vpop.permute.xlu0 %1924 }
 0x3aa   : > { %v3194_v45 = vsel %vm5250_vm15, %v1894_v44, %v1896_v41  ;;  %v3198_v59 = vsel %vm5250_vm15, %v1896_v41, %v1894_v44  ;;  %v2019_v42 = vpop.permute.xlu2 %2018  ;;  %v3202_v1 = vsel %vm5249_vm2, %v1925_v47, %v1927_v48  ;;  %v3206_v54 = vsel %vm5249_vm2, %v1927_v48, %v1925_v47 }
 0x3ab   : > { %5417 = vst [vmem:[#allocation59_spill] sm:$0xff] %v3194_v45  ;;  %vm5286_vm2 = vcmp.lt.s32.totalorder %v2931_v55, 79  ;;  %vm5280_vm15 = vcmp.lt.s32.totalorder %v2931_v55, 78 }
 0x3ac   : > { %5418 = vst [vmem:[#allocation60_spill] sm:$0xff] %v3198_v59 }
 0x3ad   : > { %5419 = vst [vmem:[#allocation61_spill] sm:$0xff] %v3202_v1 }
 0x3ae   : > { %5420 = vst [vmem:[#allocation62_spill] sm:$0xff] %v3206_v54 }
 0x3af   : > { %1716 = vrot.lane.b32.xlu1 %v2972_v0, %s5421_s19  ;;  %1747 = vrot.lane.b32.xlu0 %v2972_v0, %s5422_s14 }
 0x3b0   : > { %1591 = vrot.lane.b32.xlu2 %v2972_v0, %s5423_s16 }
 0x3b1   : > { %v1958_v44 = vpop.permute.xlu1 %1957  ;;  %v1988_v47 = vpop.permute.xlu0 %1987 }
 0x3b2   : > { %v3217_v41 = vsel %vm5284_vm3, %v1956_v51, %v1958_v44  ;;  %v3221_v48 = vsel %vm5284_vm3, %v1958_v44, %v1956_v51  ;;  %v3223_v54 = vpop.permute.xlu2 %2047  ;;  %vm611_vm3 = vcmp.lt.s32.totalorder %v2931_v55, 50 }
 0x3b3   : > { %5424 = vst [vmem:[#allocation63_spill] sm:$0xff] %v3217_v41  ;;  %v613_v56 = vsel %vm611_vm3, %v2745_v63, %v2763_v8 }
 0x3b4   : > { %5425 = vst [vmem:[#allocation64_spill] sm:$0xff] %v3221_v48 }
 0x3b5   : > { %5426 = vst [vmem:[#allocation65_spill] sm:$0xff] %v3223_v54 }
 0x3b7   : > { %1808 = vrot.lane.b32.xlu1 %v2972_v0, %s5252_s28  ;;  %1839 = vrot.lane.b32.xlu0 %v2972_v0, %s5427_s17  ;;  %s5434_s28 = smov 82  }
 0x3b8   : > { %1685 = vrot.lane.b32.xlu2 %v2972_v0, %s5428_s0 }
 0x3b9   : > { %v1986_v41 = vpop.permute.xlu1 %1985  ;;  %v2017_v54 = vpop.permute.xlu0 %2016 }
 0x3ba   : > { %v3235_v51 = vsel %vm5286_vm2, %v1986_v41, %v1988_v47  ;;  %v3239_v44 = vsel %vm5286_vm2, %v1988_v47, %v1986_v41  ;;  %v3241_v48 = vpop.permute.xlu2 %648  ;;  %v3245_v1 = vsel %vm5280_vm15, %v2017_v54, %v2019_v42  ;;  %v3249_v59 = vsel %vm5280_vm15, %v2019_v42, %v2017_v54  ;;  %v546_v42 = vpop.f32.mrf.mxu3 }
 0x3bb   : > { %5429 = vst [vmem:[#allocation66_spill] sm:$0xff] %v3235_v51  ;;  %vm577_vm15 = vcmp.lt.s32.totalorder %v2931_v55, 51  ;;  %vm643_vm2 = vcmp.lt.s32.totalorder %v2931_v55, 49 }
 0x3bc   : > { %5430 = vst [vmem:[#allocation67_spill] sm:$0xff] %v3239_v44  ;;  %v3275_v44 = vmul.f32 0.03125, %v546_v42 }
 0x3bd   : > { %5431 = vst [vmem:[#allocation68_spill] sm:$0xff] %v3241_v48 }
 0x3be   : > { %5432 = vst [vmem:[#allocation69_spill] sm:$0xff] %v3245_v1 }
 0x3bf   : > { %5433 = vst [vmem:[#allocation70_spill] sm:$0xff] %v3249_v59  ;;  %1902 = vrot.lane.b32.xlu1 %v2972_v0, %s5434_s28  ;;  %1933 = vrot.lane.b32.xlu0 %v2972_v0, %s5435_s1  ;;  %s5452_s28 = smov 47   ;;  %s5454_s1 = smov 51  }
 0x3c0   : > { %1777 = vrot.lane.b32.xlu2 %v2972_v0, %s5436_s2 }
 0x3c1   : > { %v3257_v41 = vpop.permute.xlu1 %582  ;;  %v3259_v47 = vpop.permute.xlu0 %616 }
 0x3c2   : > { %5437 = vst [vmem:[#allocation71_spill] sm:$0xff] %v3257_v41  ;;  %v3261_v48 = vpop.permute.xlu2 %742 }
 0x3c3   : > { %5438 = vst [vmem:[#allocation72_spill] sm:$0xff] %v3259_v47 }
 0x3c4   : > { %5439 = vst [vmem:[#allocation73_spill] sm:$0xff] %v3261_v48 }
 0x3c7   : > { %1994 = vrot.lane.b32.xlu1 %v2972_v0, %s5440_s4  ;;  %2025 = vrot.lane.b32.xlu0 %v2972_v0, %s5441_s23  ;;  %s5448_s4 = smov 80   ;;  %s5453_s23 = smov 46  }
 0x3c8   : > { %1870 = vrot.lane.b32.xlu2 %v2972_v0, %s5442_s6 }
 0x3c9   : > { %v3269_v54 = vpop.permute.xlu1 %680  ;;  %v3271_v1 = vpop.permute.xlu0 %710 }
 0x3ca   : > { %5443 = vst [vmem:[#allocation74_spill] sm:$0xff] %v3269_v54  ;;  %v3273_v59 = vpop.permute.xlu2 %838 }
 0x3cb   : > { %5444 = vst [vmem:[#allocation75_spill] sm:$0xff] %v3271_v1 }
 0x3cc   : > { %5445 = vst [vmem:[#allocation76_spill] sm:$0xff] %v3273_v59 }
 0x3cf   : > { %614 = vrot.lane.b32.xlu1 %v3275_v44, %s5446_s7  ;;  %646 = vrot.lane.b32.xlu0 %v3275_v44, %s5447_s24  ;;  %s5458_s24 = smov 35   ;;  %s5459_s7 = smov 34  }
 0x3d0   : > { %1964 = vrot.lane.b32.xlu2 %v2972_v0, %s5448_s4  ;;  %s5460_s4 = smov 48  }
 0x3d1   : > { %v3283_v48 = vpop.permute.xlu1 %774  ;;  %v3285_v47 = vpop.permute.xlu0 %806 }
 0x3d2   : > { %5449 = vst [vmem:[#allocation77_spill] sm:$0xff] %v3283_v48  ;;  %v3287_v51 = vpop.permute.xlu2 %930 }
 0x3d3   : > { %5450 = vst [vmem:[#allocation78_spill] sm:$0xff] %v3285_v47 }
 0x3d4   : > { %5451 = vst [vmem:[#allocation79_spill] sm:$0xff] %v3287_v51 }
 0x3d7   : > { %708 = vrot.lane.b32.xlu1 %v3275_v44, %s5452_s28  ;;  %740 = vrot.lane.b32.xlu0 %v3275_v44, %s5453_s23  ;;  %s5465_s23 = smov 31   ;;  %s5466_s28 = smov 45  }
 0x3d8   : > { %580 = vrot.lane.b32.xlu2 %v3275_v44, %s5454_s1  ;;  %s5464_s1 = smov 32  }
 0x3d9   : > { %v3295_v42 = vpop.permute.xlu1 %869  ;;  %v3297_v59 = vpop.permute.xlu0 %900 }
 0x3da   : > { %5455 = vst [vmem:[#allocation80_spill] sm:$0xff] %v3295_v42  ;;  %v3299_v1 = vpop.permute.xlu2 %1023 }
 0x3db   : > { %5456 = vst [vmem:[#allocation81_spill] sm:$0xff] %v3297_v59 }
 0x3dc   : > { %5457 = vst [vmem:[#allocation82_spill] sm:$0xff] %v3299_v1 }
 0x3df   : > { %804 = vrot.lane.b32.xlu1 %v3275_v44, %s5458_s24  ;;  %836 = vrot.lane.b32.xlu0 %v3275_v44, %s5459_s7  ;;  %s5471_s24 = smov 33   ;;  %s5475_s7 = smov 17  }
 0x3e0   : > { %678 = vrot.lane.b32.xlu2 %v3275_v44, %s5460_s4  ;;  %s5470_s4 = smov 29  }
 0x3e1   : > { %v3307_v51 = vpop.permute.xlu1 %961  ;;  %v3309_v47 = vpop.permute.xlu0 %992 }
 0x3e2   : > { %5461 = vst [vmem:[#allocation83_spill] sm:$0xff] %v3307_v51  ;;  %v3311_v48 = vpop.permute.xlu2 %1117 }
 0x3e3   : > { %5462 = vst [vmem:[#allocation84_spill] sm:$0xff] %v3309_v47 }
 0x3e4   : > { %5463 = vst [vmem:[#allocation85_spill] sm:$0xff] %v3311_v48 }
 0x3e7   : > { %898 = vrot.lane.b32.xlu1 %v3275_v44, %s5464_s1  ;;  %928 = vrot.lane.b32.xlu0 %v3275_v44, %s5465_s23  ;;  %s5476_s1 = smov 30   ;;  %s3349_s23 = sld [smem:[#allocation3 + $0x49]] }
 0x3e8   : > { %772 = vrot.lane.b32.xlu2 %v3275_v44, %s5466_s28  ;;  %s3351_s28 = sld [smem:[#allocation3]] }
 0x3e9   : > { %v3319_v1 = vpop.permute.xlu1 %1055  ;;  %v3321_v59 = vpop.permute.xlu0 %1086 }
 0x3ea   : > { %5467 = vst [vmem:[#allocation86_spill] sm:$0xff] %v3319_v1  ;;  %v3323_v42 = vpop.permute.xlu2 %1209 }
 0x3eb   : > { %5468 = vst [vmem:[#allocation87_spill] sm:$0xff] %v3321_v59 }
 0x3ec   : > { %5469 = vst [vmem:[#allocation88_spill] sm:$0xff] %v3323_v42 }
 0x3ee   : > { %v587_v54 = vstv %s3351_s28  ;;  %s3472_s28 = sld [smem:[#allocation3 + $0xd]] }
 0x3ef   : > { %990 = vrot.lane.b32.xlu1 %v3275_v44, %s5470_s4  ;;  %1021 = vrot.lane.b32.xlu0 %v3275_v44, %s5387_s12  ;;  %s2268_s12 = sld [smem:[#allocation3 + $0x18]] }
 0x3f0   : > { %867 = vrot.lane.b32.xlu2 %v3275_v44, %s5471_s24  ;;  %s3353_s4 = sld [smem:[#allocation3 + $0x1]] }
 0x3f1   : > { %v3331_v48 = vpop.permute.xlu1 %1147  ;;  %v3333_v47 = vpop.permute.xlu0 %1178  ;;  %s3355_s24 = sld [smem:[#allocation3 + $0x2]] }
 0x3f2   : > { %5472 = vst [vmem:[#allocation89_spill] sm:$0xff] %v3331_v48  ;;  %v3335_v51 = vpop.permute.xlu2 %1300 }
 0x3f3   : > { %5473 = vst [vmem:[#allocation90_spill] sm:$0xff] %v3333_v47 }
 0x3f4   : > { %5474 = vst [vmem:[#allocation91_spill] sm:$0xff] %v3335_v51 }
 0x3f5   : > { %v1322_v47 = vstv %s2268_s12  ;;  %s5484_s12 = smov 15  }
 0x3f6   : > { %v1324_v48 = vmul.f32 %v1322_v47, %v2663_v61 }
 0x3f7   : > { %1084 = vrot.lane.b32.xlu1 %v3275_v44, %s5475_s7  ;;  %1115 = vrot.lane.b32.xlu0 %v3275_v44, %s5392_s13  ;;  %s3361_s13 = sld [smem:[#allocation3 + $0x3]]  ;;  %s5480_s7 = smov 18  }
 0x3f8   : > { %959 = vrot.lane.b32.xlu2 %v3275_v44, %s5476_s1  ;;  %s3365_s1 = sld [smem:[#allocation3 + $0x4]] }
 0x3f9   : > { %v3343_v42 = vpop.permute.xlu1 %1240  ;;  %v3345_v59 = vpop.permute.xlu0 %1270 }
 0x3fa   : > { %5477 = vst [vmem:[#allocation92_spill] sm:$0xff] %v3343_v42  ;;  %v3347_v1 = vpop.permute.xlu2 %1406  ;;  %v1326_v42 = vstv %s3349_s23  ;;  %s3437_s23 = sld [smem:[#allocation3 + $0xb]] }
 0x3fb   : > { %5478 = vst [vmem:[#allocation93_spill] sm:$0xff] %v3345_v59  ;;  %v1328_v45 = vmul.f32 %v1326_v42, %v2972_v0  ;;  %v579_v0 = vsel %vm577_vm15, %v2761_v7, %v2737_v62 }
 0x3fc   : > { %5479 = vst [vmem:[#allocation94_spill] sm:$0xff] %v3347_v1  ;;  %v3432_v53 = vmul.f32 %v587_v54, %v579_v0  ;;  %v645_v0 = vsel %vm643_vm2, %v2773_v10, %v2753_v3 }
 0x3fd   : > { %v685_v61 = vstv %s3361_s13  ;;  %s3548_s13 = sld [smem:[#allocation3 + $0x13]] }
 0x3fe   : > { %v715_v50 = vstv %s3365_s1  ;;  %s3562_s1 = sld [smem:[#allocation3 + $0x14]] }
 0x3ff   : > { %1176 = vrot.lane.b32.xlu1 %v3275_v44, %s5386_s18  ;;  %1207 = vrot.lane.b32.xlu0 %v3275_v44, %s5399_s26  ;;  %s3375_s18 = sld [smem:[#allocation3 + $0x6]] }
 0x400   : > { %1053 = vrot.lane.b32.xlu2 %v3275_v44, %s5480_s7  ;;  %s3379_s26 = sld [smem:[#allocation3 + $0x7]] }
 0x401   : > { %v3367_v1 = vpop.permute.xlu1 %1346  ;;  %v3371_v51 = vpop.permute.xlu0 %1376  ;;  %s3388_s7 = sld [smem:[#allocation3 + $0x8]] }
 0x402   : > { %5481 = vst [vmem:[#allocation95_spill] sm:$0xff] %v3367_v1  ;;  %v3373_v59 = vpop.permute.xlu2 %1499  ;;  %v1323_v1 = vmul.f32 %v1322_v47, %v2661_v60  ;;  %v1327_v60 = vmul.f32 %v1326_v42, %v3275_v44  ;;  %v578_v47 = vsel %vm577_vm15, %v2737_v62, %v2761_v7  ;;  %v612_v42 = vsel %vm611_vm3, %v2763_v8, %v2745_v63 }
 0x403   : > { %5482 = vst [vmem:[#allocation96_spill] sm:$0xff] %v3371_v51  ;;  %v653_v51 = vstv %s3355_s24  ;;  %v1330_v7 = vadd.f32 %v1328_v45, %v1324_v48  ;;  %v3434_v2 = vmul.f32 %v587_v54, %v578_v47  ;;  %v644_v48 = vsel %vm643_vm2, %v2753_v3, %v2773_v10  ;;  %s3541_s24 = sld [smem:[#allocation3 + $0x12]] }
 0x404   : > { %5483 = vst [vmem:[#allocation97_spill] sm:$0xff] %v3373_v59  ;;  %v621_v59 = vstv %s3353_s4  ;;  %v1329_v63 = vadd.f32 %v1327_v60, %v1323_v1  ;;  %v676_v54 = vsel %vm675_vm14, %v2785_v15, %v2775_v11  ;;  %v706_v3 = vsel %vm705_vm12, %v2787_v16, %v2765_v9  ;;  %s3483_s4 = sld [smem:[#allocation3 + $0xe]] }
 0x405   : > { %v779_v58 = vstv %s3375_s18  ;;  %v3439_v8 = vmul.f32 %v621_v59, %v613_v56  ;;  %v3441_v45 = vmul.f32 %v621_v59, %v612_v42  ;;  %v677_v56 = vsel %vm675_vm14, %v2775_v11, %v2785_v15  ;;  %s3573_s18 = sld [smem:[#allocation3 + $0x15]] }
 0x406   : > { %v811_v1 = vstv %s3379_s26  ;;  %v1333_v59 = vrot.slane %v1330_v7, 7  ;;  %v707_v10 = vsel %vm705_vm12, %v2765_v9, %v2787_v16  ;;  %v3478_v11 = vmul.f32 %v653_v51, %v645_v0  ;;  %s3589_s26 = sld [smem:[#allocation3 + $0x16]] }
 0x407   : > { %1268 = vrot.lane.b32.xlu1 %v3275_v44, %s5391_s9  ;;  %1298 = vrot.lane.b32.xlu0 %v3275_v44, %s5404_s21  ;;  %s3409_s21 = sld [smem:[#allocation3 + $0x9]]  ;;  %v843_v60 = vstv %s3388_s7  ;;  %v3480_v15 = vmul.f32 %v653_v51, %v644_v48  ;;  %v3490_v16 = vmul.f32 %v685_v61, %v677_v56  ;;  %v739_v47 = vsel %vm737_vm11, %v2797_v18, %v2777_v14 }
 0x408   : > { %1145 = vrot.lane.b32.xlu2 %v3275_v44, %s5484_s12  ;;  %s3430_s9 = sld [smem:[#allocation3 + $0xa]]  ;;  %v3488_v9 = vsel %vm602_vm1, %v1329_v63, %v1333_v59  ;;  %v3502_v7 = vmul.f32 %v685_v61, %v676_v54  ;;  %v3504_v63 = vmul.f32 %v715_v50, %v707_v10  ;;  %v3506_v48 = vmul.f32 %v715_v50, %v706_v3 }
 0x409   : > { %v3411_v41 = vpop.permute.xlu1 %1436  ;;  %v3422_v57 = vpop.permute.xlu0 %1468  ;;  %5488 = vst [vmem:[#allocation101_spill] sm:$0xff] %v3488_v9  ;;  %v738_v0 = vsel %vm737_vm11, %v2777_v14, %v2797_v18  ;;  %v770_v61 = vsel %vm769_vm13, %v2809_v21, %v2799_v19  ;;  %v771_v50 = vsel %vm769_vm13, %v2799_v19, %v2809_v21  ;;  %v802_v18 = vsel %vm5309_vm9, %v2811_v22, %v2789_v17  ;;  %s3642_s7 = sld [smem:[#allocation3 + $0x1b]] }
 0x40a   : > { %5485 = vst [vmem:[#allocation98_spill] sm:$0xff] %v3411_v41  ;;  %v3424_v62 = vpop.permute.xlu2 %1591  ;;  %v747_v41 = vstv %s3369_s3  ;;  %s3451_s3 = sld [smem:[#allocation3 + $0xc]]  ;;  %v803_v3 = vsel %vm5309_vm9, %v2789_v17, %v2811_v22  ;;  %v935_v10 = vstv %s3437_s23  ;;  %v834_v17 = vsel %vm5308_vm8, %v2801_v20, %v2821_v24 }
 0x40b   : > { %5486 = vst [vmem:[#allocation99_spill] sm:$0xff] %v3422_v57  ;;  %v3530_v14 = vmul.f32 %v747_v41, %v739_v47  ;;  %v3543_v19 = vmul.f32 %v747_v41, %v738_v0  ;;  %v3550_v47 = vmul.f32 %v779_v58, %v771_v50  ;;  %v835_v22 = vsel %vm5308_vm8, %v2821_v24, %v2801_v20  ;;  %s3655_s12 = sld [smem:[#allocation3 + $0x1c]] }
 0x40c   : > { %5487 = vst [vmem:[#allocation100_spill] sm:$0xff] %v3424_v62  ;;  %v3564_v41 = vmul.f32 %v811_v1, %v803_v3  ;;  %v3566_v0 = vmul.f32 %v811_v1, %v802_v18  ;;  %v865_v20 = vsel %vm864_vm10, %v2833_v27, %v2823_v25  ;;  %v897_v24 = vsel %vm5313_vm6, %v2813_v23, %v2835_v28  ;;  %s3688_s23 = sld [smem:[#allocation3 + $0x1f]] }
 0x40d   : > { %v874_v51 = vstv %s3409_s21  ;;  %v1028_v1 = vstv %s3483_s4  ;;  %v3593_v50 = vmul.f32 %v843_v60, %v835_v22  ;;  %v3595_v18 = vmul.f32 %v843_v60, %v834_v17  ;;  %s3663_s21 = sld [smem:[#allocation3 + $0x1d]] }
 0x40e   : > { %v905_v54 = vstv %s3430_s9  ;;  %vm1050_vm8 = vcmp.lt.s32.totalorder %v2931_v55, 18  ;;  %v927_v60 = vsel %vm5314_vm5, %v2845_v30, %v2825_v26  ;;  %vm5318_vm9 = vcmp.lt.s32.totalorder %v2931_v55, 17  ;;  %s3676_s9 = sld [smem:[#allocation3 + $0x1e]] }
 0x40f   : > { %1374 = vrot.lane.b32.xlu1 %v3275_v44, %s5398_s10  ;;  %1404 = vrot.lane.b32.xlu0 %v3275_v44, %s5411_s25  ;;  %s3498_s25 = sld [smem:[#allocation3 + $0xf]]  ;;  %v3620_v22 = vmul.f32 %v874_v51, %v865_v20  ;;  %v3622_v62 = vmul.f32 %v905_v54, %v897_v24 }
 0x410   : > { %1238 = vrot.lane.b32.xlu2 %v3275_v44, %s5390_s15  ;;  %s3512_s10 = sld [smem:[#allocation3 + $0x10]]  ;;  %v966_v21 = vstv %s3451_s3 }
 0x411   : > { %v3500_v42 = vpop.permute.xlu1 %1530  ;;  %v3514_v56 = vpop.permute.xlu0 %1560  ;;  %s3528_s15 = sld [smem:[#allocation3 + $0x11]] }
 0x412   : > { %5489 = vst [vmem:[#allocation102_spill] sm:$0xff] %v3500_v42  ;;  %v3516_v59 = vpop.permute.xlu2 %1685  ;;  %s3746_s3 = sld [smem:[#allocation3 + $0x23]]  ;;  %v1441_v42 = vstv %s3655_s12 }
 0x413   : > { %5490 = vst [vmem:[#allocation103_spill] sm:$0xff] %v3514_v56  ;;  %v958_v56 = vsel %vm5316_vm7, %v2847_v31, %v2857_v33  ;;  %s3770_s4 = sld [smem:[#allocation3 + $0x25]] }
 0x414   : > { %5491 = vst [vmem:[#allocation104_spill] sm:$0xff] %v3516_v59  ;;  %v3552_v59 = vmul.f32 %v779_v58, %v770_v61  ;;  %v866_v58 = vsel %vm864_vm10, %v2823_v25, %v2833_v27  ;;  %v997_v61 = vstv %s3472_s28  ;;  %v896_v25 = vsel %vm5313_vm6, %v2835_v28, %v2813_v23  ;;  %s3754_s28 = sld [smem:[#allocation3 + $0x24]] }
 0x415   : > { %v3606_v3 = vmul.f32 %v874_v51, %v866_v58  ;;  %v1060_v17 = vstv %s3498_s25  ;;  %v926_v58 = vsel %vm5314_vm5, %v2825_v26, %v2845_v30  ;;  %v957_v51 = vsel %vm5316_vm7, %v2857_v33, %v2847_v31  ;;  %s3783_s25 = sld [smem:[#allocation3 + $0x26]] }
 0x416   : > { %v1091_v20 = vstv %s3512_s10  ;;  %vm1112_vm6 = vcmp.lt.s32.totalorder %v2931_v55, 16  ;;  %v3644_v26 = vmul.f32 %v935_v10, %v927_v60  ;;  %v988_v30 = vsel %vm5315_vm0, %v2859_v34, %v2837_v29  ;;  %s3840_s10 = sld [smem:[#allocation3 + $0x31]] }
 0x417   : > { %1466 = vrot.lane.b32.xlu1 %v3275_v44, %s5403_s30  ;;  %1497 = vrot.lane.b32.xlu0 %v3275_v44, %s5416_s20  ;;  %s3602_s20 = sld [smem:[#allocation3 + $0x17]]  ;;  %v1122_v24 = vstv %s3528_s15  ;;  %v3657_v31 = vmul.f32 %v935_v10, %v926_v58  ;;  %v3659_v33 = vmul.f32 %v966_v21, %v958_v56  ;;  %vm1142_vm5 = vcmp.lt.s32.totalorder %v2931_v55, 15 }
 0x418   : > { %1344 = vrot.lane.b32.xlu2 %v3275_v44, %s5397_s29  ;;  %s3614_s29 = sld [smem:[#allocation3 + $0x19]]  ;;  %v3665_v60 = vmul.f32 %v966_v21, %v957_v51  ;;  %v3684_v10 = vmul.f32 %v997_v61, %v988_v30  ;;  %v1183_v21 = vstv %s3548_s13  ;;  %vm5334_vm7 = vcmp.lt.s32.totalorder %v2931_v55, 13 }
 0x419   : > { %v3604_v27 = vpop.permute.xlu1 %1622  ;;  %v3616_v23 = vpop.permute.xlu0 %1653  ;;  %s3632_s30 = sld [smem:[#allocation3 + $0x1a]]  ;;  %v1214_v58 = vstv %s3562_s1 }
 0x41a   : > { %5492 = vst [vmem:[#allocation105_spill] sm:$0xff] %v3604_v27  ;;  %v3618_v28 = vpop.permute.xlu2 %1777  ;;  %s3850_s15 = sld [smem:[#allocation3 + $0x2a]] }
 0x41b   : > { %5493 = vst [vmem:[#allocation106_spill] sm:$0xff] %v3616_v23  ;;  %v3634_v23 = vmul.f32 %v905_v54, %v896_v25  ;;  %v989_v54 = vsel %vm5315_vm0, %v2837_v29, %v2859_v34  ;;  %v1152_v25 = vstv %s3541_s24  ;;  %v1019_v29 = vsel %vm5319_vm4, %v2849_v32, %v2869_v36  ;;  %s3862_s24 = sld [smem:[#allocation3 + $0x2b]] }
 0x41c   : > { %5494 = vst [vmem:[#allocation107_spill] sm:$0xff] %v3618_v28  ;;  %v1020_v34 = vsel %vm5319_vm4, %v2869_v36, %v2849_v32  ;;  %vm5335_vm0 = vcmp.lt.s32.totalorder %v2931_v55, 14  ;;  %v3682_v56 = vmul.f32 %v997_v61, %v989_v54  ;;  %v1051_v32 = vsel %vm1050_vm8, %v2881_v39, %v2871_v37  ;;  %s3872_s13 = sld [smem:[#allocation3 + $0x2c]] }
 0x41d   : > { %v1052_v36 = vsel %vm1050_vm8, %v2871_v37, %v2881_v39  ;;  %v1083_v61 = vsel %vm5318_vm9, %v2861_v35, %v2883_v40  ;;  %v3709_v30 = vmul.f32 %v1028_v1, %v1020_v34  ;;  %v3711_v54 = vmul.f32 %v1028_v1, %v1019_v29  ;;  %s3884_s1 = sld [smem:[#allocation3 + $0x2d]] }
 0x41e   : > { %v1082_v28 = vsel %vm5318_vm9, %v2883_v40, %v2861_v35  ;;  %v1114_v37 = vsel %vm1112_vm6, %v2893_v46, %v2873_v38  ;;  %v1113_v1 = vsel %vm1112_vm6, %v2873_v38, %v2893_v46  ;;  %vm5336_vm9 = vcmp.lt.s32.totalorder %v2931_v55, 3  ;;  %s5594_s12 = sld [smem:[#allocation125_spill]] }
 0x41f   : > { %1558 = vrot.lane.b32.xlu1 %v3275_v44, %s5410_s27  ;;  %1589 = vrot.lane.b32.xlu0 %v3275_v44, %s5423_s16  ;;  %s3705_s27 = sld [smem:[#allocation3 + $0x20]]  ;;  %v1245_v35 = vstv %s3573_s18  ;;  %vm5333_vm4 = vcmp.lt.s32.totalorder %v2931_v55, 2  ;;  %v3736_v40 = vmul.f32 %v1060_v17, %v1052_v36  ;;  %v3738_v29 = vmul.f32 %v1060_v17, %v1051_v32 }
 0x420   : > { %1434 = vrot.lane.b32.xlu2 %v3275_v44, %s5402_s8  ;;  %s3721_s8 = sld [smem:[#allocation3 + $0x21]]  ;;  %v3748_v38 = vmul.f32 %v1091_v20, %v1082_v28  ;;  %v3750_v46 = vmul.f32 %v1122_v24, %v1114_v37  ;;  %v1305_v27 = vstv %s3602_s20  ;;  %v3756_v17 = vmul.f32 %v1122_v24, %v1113_v1 }
 0x421   : > { %v3707_v51 = vpop.permute.xlu1 %1716  ;;  %v3723_v39 = vpop.permute.xlu0 %1747  ;;  %s3734_s16 = sld [smem:[#allocation3 + $0x22]]  ;;  %v1143_v32 = vsel %vm1142_vm5, %v2905_v49, %v2895_v5  ;;  %v1174_v36 = vsel %vm5335_vm0, %v2907_v12, %v2885_v43  ;;  %v1175_v28 = vsel %vm5335_vm0, %v2885_v43, %v2907_v12  ;;  %v1351_v24 = vstv %s3614_s29  ;;  %v5498_v12 = vld [vmem:[#allocation18_spill] sm:$0xff] }
 0x422   : > { %5495 = vst [vmem:[#allocation108_spill] sm:$0xff] %v3707_v51  ;;  %v3725_v34 = vpop.permute.xlu2 %1870  ;;  %v3740_v51 = vmul.f32 %v1091_v20, %v1083_v61  ;;  %v1236_v43 = vsel %vm5336_vm9, %v2927_v52, %v2919_v4  ;;  %v3811_v1 = vmul.f32 %v1183_v21, %v1175_v28  ;;  %s3898_s18 = sld [smem:[#allocation3 + $0x2e]] }
 0x423   : > { %5496 = vst [vmem:[#allocation109_spill] sm:$0xff] %v3723_v39  ;;  %v1275_v39 = vstv %s3589_s26  ;;  %s3958_s26 = sld [smem:[#allocation3 + $0x33]] }
 0x424   : > { %5497 = vst [vmem:[#allocation110_spill] sm:$0xff] %v3725_v34  ;;  %v1144_v34 = vsel %vm1142_vm5, %v2895_v5, %v2905_v49  ;;  %v1205_v5 = vsel %vm5334_vm7, %v2897_v6, %v2917_v13  ;;  %v1206_v49 = vsel %vm5334_vm7, %v2917_v13, %v2897_v6  ;;  %v1237_v6 = vsel %vm5336_vm9, %v2919_v4, %v2927_v52  ;;  %v5499_v13 = vld [vmem:[#allocation19_spill] sm:$0xff]  ;;  %s3969_s20 = sld [smem:[#allocation3 + $0x37]] }
 0x425   : > { %v3772_v20 = vmul.f32 %v1152_v25, %v1144_v34  ;;  %v1266_v61 = vsel %vm5333_vm4, %v5499_v13, %v5498_v12  ;;  %v1267_v37 = vsel %vm5333_vm4, %v5498_v12, %v5499_v13  ;;  %v3809_v34 = vmul.f32 %v1152_v25, %v1143_v32  ;;  %5500 = vst [vmem:[#allocation18_spill] sm:$0xff] %v3811_v1  ;;  %v5559_v1 = vld [vmem:[#allocation44_spill] sm:$0xff]  ;;  %s3985_s29 = sld [smem:[#allocation3 + $0x35]] }
 0x426   : > { %v3813_v4 = vmul.f32 %v1183_v21, %v1174_v36  ;;  %v1381_v52 = vstv %s3632_s30  ;;  %v3820_v9 = vmul.f32 %v1214_v58, %v1206_v49  ;;  %v3822_v12 = vmul.f32 %v1214_v58, %v1205_v5  ;;  %v5511_v58 = vld [vmem:[#allocation21_spill] sm:$0xff]  ;;  %s3997_s30 = sld [smem:[#allocation3 + $0x36]] }
 0x427   : > { %1651 = vrot.lane.b32.xlu1 %v3275_v44, %s5415_s11  ;;  %1683 = vrot.lane.b32.xlu0 %v3275_v44, %s5428_s0  ;;  %s3805_s0 = sld [smem:[#allocation3 + $0x27]]  ;;  %v1411_v13 = vstv %s3642_s7  ;;  %v3832_v32 = vmul.f32 %v1245_v35, %v1237_v6  ;;  %v3834_v36 = vmul.f32 %v1245_v35, %v1236_v43  ;;  %v3836_v28 = vmul.f32 %v1275_v39, %v1267_v37  ;;  %v5515_v35 = vld [vmem:[#allocation22_spill] sm:$0xff]  ;;  %v5517_v37 = vld [vmem:[#allocation23_spill] sm:$0xff] }
 0x428   : > { %1528 = vrot.lane.b32.xlu2 %v3275_v44, %s5409_s5  ;;  %5501 = vst [vmem:[#allocation19_spill] sm:$0xff] %v3813_v4  ;;  %s3816_s11 = sld [smem:[#allocation3 + $0x28]]  ;;  %v3838_v49 = vmul.f32 %v1275_v39, %v1266_v61  ;;  %v3843_v5 = vmul.f32 %v1305_v27, %v5511_v58  ;;  %v1504_v6 = vstv %s3676_s9  ;;  %v3853_v43 = vmul.f32 %v1351_v24, %v5515_v35  ;;  %v5519_v39 = vld [vmem:[#allocation24_spill] sm:$0xff]  ;;  %v5523_v58 = vld [vmem:[#allocation27_spill] sm:$0xff] }
 0x429   : > { %v3818_v57 = vpop.permute.xlu1 %1808  ;;  %5503 = vst [vmem:[#allocation112_spill] sm:$0xff] %v3820_v9  ;;  %s3826_s5 = sld [smem:[#allocation3 + $0x29]]  ;;  %v3828_v25 = vpop.permute.xlu0 %1839  ;;  %v3859_v61 = vmul.f32 %v1381_v52, %v5519_v39  ;;  %v1596_v35 = vstv %s3721_s8  ;;  %v5527_v39 = vld [vmem:[#allocation29_spill] sm:$0xff]  ;;  %s5605_s8 = smov 81  }
 0x42a   : > { %5502 = vst [vmem:[#allocation111_spill] sm:$0xff] %v3818_v57  ;;  %v3830_v21 = vpop.permute.xlu2 %1964  ;;  %v5513_v57 = vld [vmem:[#allocation20_spill] sm:$0xff]  ;;  %s4539_s7 = sld [smem:[#allocation3 + $0x4c]] }
 0x42b   : > { %5504 = vst [vmem:[#allocation113_spill] sm:$0xff] %v3822_v12  ;;  %v3846_v9 = vmul.f32 %v1305_v27, %v5513_v57  ;;  %v5521_v57 = vld [vmem:[#allocation25_spill] sm:$0xff]  ;;  %s4608_s9 = sld [smem:[#allocation3 + $0x4e]] }
 0x42c   : > { %5505 = vst [vmem:[#allocation114_spill] sm:$0xff] %v3828_v25  ;;  %v1473_v25 = vstv %s3663_s21  ;;  %v3865_v27 = vmul.f32 %v1381_v52, %v5521_v57  ;;  %v5531_v52 = vld [vmem:[#allocation31_spill] sm:$0xff]  ;;  %v5533_v57 = vld [vmem:[#allocation32_spill] sm:$0xff]  ;;  %s4588_s21 = sld [smem:[#allocation3 + $0x50]] }
 0x42d   : > { %5506 = vst [vmem:[#allocation115_spill] sm:$0xff] %v3830_v21  ;;  %v3856_v21 = vmul.f32 %v1351_v24, %v5517_v37  ;;  %v5525_v24 = vld [vmem:[#allocation28_spill] sm:$0xff] }
 0x42e   : > { %5507 = vst [vmem:[#allocation116_spill] sm:$0xff] %v3832_v32  ;;  %v3875_v37 = vmul.f32 %v1411_v13, %v5525_v24  ;;  %v1658_v24 = vstv %s3746_s3  ;;  %s4083_s3 = sld [smem:[#allocation3 + $0x3b]] }
 0x42f   : > { %5508 = vst [vmem:[#allocation117_spill] sm:$0xff] %v3834_v36  ;;  %1745 = vrot.lane.b32.xlu1 %v3275_v44, %s5422_s14  ;;  %1775 = vrot.lane.b32.xlu0 %v3275_v44, %s5436_s2  ;;  %s3914_s2 = sld [smem:[#allocation3 + $0x34]]  ;;  %v3954_v4 = vmul.f32 %v1658_v24, %v5559_v1  ;;  %v1844_v32 = vstv %s3826_s5  ;;  %v1875_v36 = vstv %s3850_s15  ;;  %v5567_v1 = vld [vmem:[#allocation48_spill] sm:$0xff]  ;;  %s5615_s5 = smov 78  }
 0x430   : > { %5509 = vst [vmem:[#allocation118_spill] sm:$0xff] %v3836_v28  ;;  %v1535_v28 = vstv %s3688_s23  ;;  %1620 = vrot.lane.b32.xlu2 %v3275_v44, %s5414_s22  ;;  %s3932_s22 = sld [smem:[#allocation3 + $0x2f]] }
 0x431   : > { %5510 = vst [vmem:[#allocation119_spill] sm:$0xff] %v3838_v49  ;;  %v5529_v49 = vld [vmem:[#allocation30_spill] sm:$0xff]  ;;  %s3948_s14 = sld [smem:[#allocation3 + $0x32]] }
 0x432   : > { %5512 = vst [vmem:[#allocation21_spill] sm:$0xff] %v3843_v5  ;;  %v3868_v5 = vmul.f32 %v1411_v13, %v5523_v58  ;;  %v3891_v13 = vmul.f32 %v1473_v25, %v5531_v52  ;;  %v3894_v58 = vmul.f32 %v1473_v25, %v5533_v57  ;;  %v5539_v52 = vld [vmem:[#allocation35_spill] sm:$0xff]  ;;  %v1721_v25 = vstv %s3770_s4  ;;  %v3912_v57 = vpop.permute.xlu1 %1902  ;;  %s4065_s23 = sld [smem:[#allocation3 + $0x39]] }
 0x433   : > { %5514 = vst [vmem:[#allocation20_spill] sm:$0xff] %v3846_v9  ;;  %v1565_v9 = vstv %s3705_s27  ;;  %s4074_s27 = sld [smem:[#allocation3 + $0x3d]] }
 0x434   : > { %5516 = vst [vmem:[#allocation22_spill] sm:$0xff] %v3853_v43  ;;  %v3881_v43 = vmul.f32 %v1441_v42, %v5529_v49  ;;  %s4091_s4 = sld [smem:[#allocation3 + $0x3c]] }
 0x435   : > { %5518 = vst [vmem:[#allocation23_spill] sm:$0xff] %v3856_v21  ;;  %v1627_v21 = vstv %s3734_s16  ;;  %s5606_s16 = smov 80   ;;  %s4155_s15 = sld [smem:[#allocation3 + $0x43]] }
 0x436   : > { %5520 = vst [vmem:[#allocation24_spill] sm:$0xff] %v3859_v61  ;;  %v3878_v61 = vmul.f32 %v1441_v42, %v5527_v39  ;;  %v1690_v39 = vstv %s3754_s28  ;;  %v5535_v42 = vld [vmem:[#allocation33_spill] sm:$0xff]  ;;  %s5607_s28 = smov 94  }
 0x437   : > { %5522 = vst [vmem:[#allocation25_spill] sm:$0xff] %v3865_v27  ;;  %v3903_v49 = vmul.f32 %v1504_v6, %v5535_v42  ;;  %v5546_v42 = vld [vmem:[#allocation38_spill] sm:$0xff]  ;;  %1837 = vrot.lane.b32.xlu1 %v3275_v44, %s5427_s17  ;;  %1868 = vrot.lane.b32.xlu0 %v3275_v44, %s5442_s6  ;;  %s4009_s6 = sld [smem:[#allocation3 + $0x3a]] }
 0x438   : > { %5524 = vst [vmem:[#allocation27_spill] sm:$0xff] %v3868_v5  ;;  %v5537_v5 = vld [vmem:[#allocation34_spill] sm:$0xff]  ;;  %1714 = vrot.lane.b32.xlu2 %v3275_v44, %s5421_s19  ;;  %s4033_s19 = sld [smem:[#allocation3 + $0x38]] }
 0x439   : > { %5526 = vst [vmem:[#allocation28_spill] sm:$0xff] %v3875_v37  ;;  %v3906_v37 = vmul.f32 %v1504_v6, %v5537_v5  ;;  %v1752_v5 = vstv %s3783_s25  ;;  %v3926_v6 = vpop.permute.xlu0 %1933  ;;  %s4097_s25 = sld [smem:[#allocation3 + $0x40]] }
 0x43a   : > { %5528 = vst [vmem:[#allocation29_spill] sm:$0xff] %v3878_v61  ;;  %s4519_s17 = sld [smem:[#allocation3 + $0x4b]] }
 0x43b   : > { %5530 = vst [vmem:[#allocation30_spill] sm:$0xff] %v3881_v43  ;;  %v5544_v43 = vld [vmem:[#allocation37_spill] sm:$0xff] }
 0x43c   : > { %5532 = vst [vmem:[#allocation31_spill] sm:$0xff] %v3891_v13  ;;  %v3909_v13 = vmul.f32 %v1535_v28, %v5539_v52  ;;  %v3920_v61 = vmul.f32 %v1565_v9, %v5544_v43  ;;  %v581_v52 = vpop.permute.xlu2 %580 }
 0x43d   : > { %5534 = vst [vmem:[#allocation32_spill] sm:$0xff] %v3894_v58  ;;  %v5542_v58 = vld [vmem:[#allocation36_spill] sm:$0xff] }
 0x43e   : > { %5536 = vst [vmem:[#allocation33_spill] sm:$0xff] %v3903_v49  ;;  %v3917_v27 = vmul.f32 %v1535_v28, %v5542_v58  ;;  %v3923_v49 = vmul.f32 %v1565_v9, %v5546_v42  ;;  %v591_v28 = vstv %s3840_s10  ;;  %v5551_v58 = vld [vmem:[#allocation71_spill] sm:$0xff]  ;;  %v5554_v42 = vld [vmem:[#allocation41_spill] sm:$0xff]  ;;  %s5616_s10 = smov 77  }
 0x43f   : > { %5538 = vst [vmem:[#allocation34_spill] sm:$0xff] %v3906_v37  ;;  %v5549_v37 = vld [vmem:[#allocation39_spill] sm:$0xff]  ;;  %v584_v43 = vsel %vm577_vm15, %v581_v52, %v5551_v58  ;;  %1931 = vrot.lane.b32.xlu1 %v3275_v44, %s5605_s8  ;;  %1962 = vrot.lane.b32.xlu0 %v3275_v44, %s5606_s16  ;;  %s4664_s8 = sld [smem:[#allocation3 + $0x51]] }
 0x440   : > { %5540 = vst [vmem:[#allocation35_spill] sm:$0xff] %v3909_v13  ;;  %v1782_v13 = vstv %s3805_s0  ;;  %1806 = vrot.lane.b32.xlu2 %v3275_v44, %s5607_s28  ;;  %s4132_s0 = sld [smem:[#allocation3 + $0x3e]] }
 0x441   : > { %5541 = vst [vmem:[#allocation120_spill] sm:$0xff] %v3912_v57  ;;  %v3929_v57 = vmul.f32 %v1596_v35, %v5549_v37  ;;  %v1813_v37 = vstv %s3816_s11  ;;  %s4137_s11 = sld [smem:[#allocation3 + $0x3f]] }
 0x442   : > { %5543 = vst [vmem:[#allocation36_spill] sm:$0xff] %v3917_v27  ;;  %v5555_v27 = vld [vmem:[#allocation42_spill] sm:$0xff]  ;;  %s4704_s16 = sld [smem:[#allocation3 + $0x52]] }
 0x443   : > { %5545 = vst [vmem:[#allocation37_spill] sm:$0xff] %v3920_v61  ;;  %v5552_v61 = vld [vmem:[#allocation40_spill] sm:$0xff]  ;;  %s4744_s28 = sld [smem:[#allocation3 + $0x54]] }
 0x444   : > { %5547 = vst [vmem:[#allocation38_spill] sm:$0xff] %v3923_v49  ;;  %v3939_v9 = vmul.f32 %v1596_v35, %v5552_v61  ;;  %v3942_v49 = vmul.f32 %v1627_v21, %v5554_v42  ;;  %v5561_v61 = vld [vmem:[#allocation45_spill] sm:$0xff]  ;;  %v5565_v42 = vld [vmem:[#allocation47_spill] sm:$0xff] }
 0x445   : > { %5548 = vst [vmem:[#allocation121_spill] sm:$0xff] %v3926_v6  ;;  %v3945_v6 = vmul.f32 %v1627_v21, %v5555_v27  ;;  %v3961_v35 = vmul.f32 %v1690_v39, %v5561_v61  ;;  %v5563_v21 = vld [vmem:[#allocation46_spill] sm:$0xff] }
 0x446   : > { %5550 = vst [vmem:[#allocation39_spill] sm:$0xff] %v3929_v57  ;;  %v5557_v57 = vld [vmem:[#allocation43_spill] sm:$0xff]  ;;  %v3964_v27 = vmul.f32 %v1690_v39, %v5563_v21 }
 0x447   : > { %5553 = vst [vmem:[#allocation71_spill] sm:$0xff] %v3939_v9  ;;  %v3951_v12 = vmul.f32 %v1658_v24, %v5557_v57  ;;  %v3967_v9 = vmul.f32 %v1721_v25, %v5565_v42  ;;  %v593_v57 = vmul.f32 %v591_v28, %v584_v43  ;;  %v3972_v24 = vmul.f32 %v1721_v25, %v5567_v1  ;;  %v5573_v39 = vld [vmem:[#allocation51_spill] sm:$0xff]  ;;  %v5575_v25 = vld [vmem:[#allocation52_spill] sm:$0xff] }
 0x448   : > { %5556 = vst [vmem:[#allocation40_spill] sm:$0xff] %v3945_v6  ;;  %v5571_v6 = vld [vmem:[#allocation50_spill] sm:$0xff]  ;;  %v3988_v43 = vmul.f32 %v1782_v13, %v5573_v39  ;;  %v3991_v21 = vmul.f32 %v1782_v13, %v5575_v25  ;;  %v1999_v1 = vstv %s3898_s18  ;;  %v585_v39 = vsel %vm577_vm15, %v5551_v58, %v581_v52  ;;  %v679_v52 = vpop.permute.xlu2 %678  ;;  %v5587_v58 = vld [vmem:[#allocation57_spill] sm:$0xff]  ;;  %2023 = vrot.lane.b32.xlu1 %v3275_v44, %s5615_s5  ;;  %s4221_s18 = sld [smem:[#allocation3 + $0x42]] }
 0x449   : > { %5558 = vst [vmem:[#allocation41_spill] sm:$0xff] %v3951_v12  ;;  %v5569_v12 = vld [vmem:[#allocation49_spill] sm:$0xff]  ;;  %v3978_v61 = vmul.f32 %v1752_v5, %v5571_v6  ;;  %v689_v13 = vstv %s3914_s2  ;;  %v5580_v25 = vld [vmem:[#allocation54_spill] sm:$0xff]  ;;  %2054 = vrot.lane.b32.xlu0 %v3275_v44, %s5616_s10  ;;  %s4236_s2 = sld [smem:[#allocation3 + $0x46]] }
 0x44a   : > { %5560 = vst [vmem:[#allocation42_spill] sm:$0xff] %v3954_v4  ;;  %v3975_v4 = vmul.f32 %v1752_v5, %v5569_v12  ;;  %v1938_v12 = vstv %s3872_s13  ;;  %v5577_v5 = vld [vmem:[#allocation53_spill] sm:$0xff]  ;;  %v4012_v42 = vmul.f32 %v1813_v37, %v5580_v25  ;;  %v5591_v25 = vld [vmem:[#allocation74_spill] sm:$0xff]  ;;  %s4175_s13 = sld [smem:[#allocation3 + $0x41]] }
 0x44b   : > { %5562 = vst [vmem:[#allocation43_spill] sm:$0xff] %v3961_v35  ;;  %v1907_v35 = vstv %s3862_s24  ;;  %v4000_v6 = vmul.f32 %v1813_v37, %v5577_v5  ;;  %v595_v5 = vadd.f32 %v593_v57, %v3434_v2  ;;  %v4041_v2 = vld [vmem:[%s5594_s12] ss:$2 sm:$0x3]  ;;  %v683_v57 = vsel %vm675_vm14, %v5591_v25, %v679_v52  ;;  %v5595_v37 = vld [vmem:[#allocation60_spill] sm:$0xff]  ;;  %s5617_s24 = smov 82  }
 0x44c   : > { %5564 = vst [vmem:[#allocation44_spill] sm:$0xff] %v3964_v27  ;;  %vm597_vm15 = vcmp.ge.s32.totalorder %v4041_v2, 3  ;;  %1900 = vrot.lane.b32.xlu2 %v3275_v44, %s5617_s24  ;;  %s4882_s5 = sld [smem:[#allocation3 + $0x5c]] }
 0x44d   : > { %5566 = vst [vmem:[#allocation45_spill] sm:$0xff] %v3967_v9  ;;  %v5589_v9 = vld [vmem:[#allocation58_spill] sm:$0xff]  ;;  %s4933_s24 = sld [smem:[#allocation3 + $0x5f]] }
 0x44e   : > { %5568 = vst [vmem:[#allocation46_spill] sm:$0xff] %v3972_v24  ;;  %v4027_v24 = vmul.f32 %v1875_v36, %v5589_v9  ;;  %v592_v9 = vmul.f32 %v591_v28, %v585_v39  ;;  %v5603_v28 = vld [vmem:[#allocation66_spill] sm:$0xff] }
 0x44f   : > { %5570 = vst [vmem:[#allocation47_spill] sm:$0xff] %v3975_v4  ;;  %v4068_v39 = vmul.f32 %v1999_v1, %v5603_v28 }
 0x450   : > { %5572 = vst [vmem:[#allocation48_spill] sm:$0xff] %v3978_v61  ;;  %v5584_v61 = vld [vmem:[#allocation56_spill] sm:$0xff] }
 0x451   : > { %5574 = vst [vmem:[#allocation49_spill] sm:$0xff] %v3988_v43  ;;  %v4006_v43 = vpop.permute.xlu1 %1994  ;;  %v4018_v27 = vmul.f32 %v1844_v32, %v5584_v61 }
 0x452   : > { %5576 = vst [vmem:[#allocation50_spill] sm:$0xff] %v3991_v21  ;;  %v5582_v21 = vld [vmem:[#allocation55_spill] sm:$0xff] }
 0x453   : > { %5578 = vst [vmem:[#allocation51_spill] sm:$0xff] %v4000_v6  ;;  %v4015_v4 = vmul.f32 %v1844_v32, %v5582_v21  ;;  %v4021_v6 = vpop.permute.xlu0 %2025  ;;  %v682_v21 = vsel %vm675_vm14, %v679_v52, %v5591_v25  ;;  %v5592_v32 = vld [vmem:[#allocation59_spill] sm:$0xff] }
 0x454   : > { %5579 = vst [vmem:[#allocation52_spill] sm:$0xff] %v4006_v43  ;;  %v4024_v43 = vmul.f32 %v1875_v36, %v5587_v58  ;;  %v4036_v61 = vmul.f32 %v1907_v35, %v5592_v32  ;;  %v4046_v36 = vld [vmem:[%s5594_s12 + $0x1] ss:$2 sm:$0x3]  ;;  %v691_v58 = vmul.f32 %v689_v13, %v682_v21  ;;  %v4052_v32 = vmul.f32 %v1907_v35, %v5595_v37  ;;  %v5604_v52 = vld [vmem:[#allocation67_spill] sm:$0xff] }
 0x455   : > { %5581 = vst [vmem:[#allocation53_spill] sm:$0xff] %v4012_v42  ;;  %v4071_v35 = vmul.f32 %v1999_v1, %v5604_v52  ;;  %v601_v37 = vrot.slane %v595_v5, 7  ;;  %vm596_vm14 = vcmp.ge.s32.totalorder %v4046_v36, 3  ;;  %vm630_vm4 = vcmp.ge.s32.totalorder %v4046_v36, 2  ;;  %v773_v52 = vpop.permute.xlu2 %772 }
 0x456   : > { %5583 = vst [vmem:[#allocation54_spill] sm:$0xff] %v4015_v4  ;;  %v783_v1 = vstv %s3969_s20  ;;  %vm662_vm7 = vcmp.ge.s32.totalorder %v4046_v36, 1  ;;  %vm788_vm0 = vcmp.lt.s32.totalorder %v4046_v36, 13  ;;  %vm724_vm9 = vcmp.lt.s32.totalorder %v4046_v36, 15  ;;  %s4303_s20 = sld [smem:[#allocation3 + $0x45]] }
 0x457   : > { %5585 = vst [vmem:[#allocation55_spill] sm:$0xff] %v4018_v27  ;;  %v5600_v27 = vld [vmem:[#allocation64_spill] sm:$0xff] }
 0x458   : > { %5586 = vst [vmem:[#allocation56_spill] sm:$0xff] %v4021_v6  ;;  %v5596_v6 = vld [vmem:[#allocation61_spill] sm:$0xff] }
 0x459   : > { %5588 = vst [vmem:[#allocation57_spill] sm:$0xff] %v4024_v43  ;;  %v5598_v43 = vld [vmem:[#allocation62_spill] sm:$0xff] }
 0x45a   : > { %5590 = vst [vmem:[#allocation58_spill] sm:$0xff] %v4027_v24  ;;  %v4055_v24 = vmul.f32 %v1938_v12, %v5596_v6  ;;  %v4058_v4 = vmul.f32 %v1938_v12, %v5598_v43  ;;  %v693_v6 = vadd.f32 %v691_v58, %v3502_v7  ;;  %v625_v43 = vstv %s3948_s14  ;;  %s5633_s14 = smov 79  }
 0x45b   : > { %5593 = vst [vmem:[#allocation74_spill] sm:$0xff] %v4036_v61  ;;  %v5601_v61 = vstv %s3884_s1  ;;  %v594_v7 = vadd.f32 %v592_v9, %v3432_v53  ;;  %v657_v12 = vstv %s3958_s26  ;;  %v5608_v9 = vld [vmem:[#allocation72_spill] sm:$0xff]  ;;  %v647_v28 = vpop.permute.xlu0 %646  ;;  %1992 = vrot.lane.b32.xlu2 %v3275_v44, %s5633_s14  ;;  %s4290_s26 = sld [smem:[#allocation3 + $0x44]] }
 0x45c   : > { %5597 = vst [vmem:[#allocation59_spill] sm:$0xff] %v4055_v24  ;;  %v4063_v42 = vmul.f32 %v5601_v61, %v5600_v27  ;;  %v690_v27 = vmul.f32 %v689_v13, %v683_v57  ;;  %v615_v13 = vpop.permute.xlu1 %614  ;;  %v696_v53 = vrot.slane %v693_v6, 7  ;;  %v847_v24 = vstv %s4065_s23  ;;  %s4638_s23 = sld [smem:[#allocation3 + $0x4f]] }
 0x45d   : > { %5599 = vst [vmem:[#allocation60_spill] sm:$0xff] %v4058_v4  ;;  %v603_v61 = vsel %vm602_vm1, %v594_v7, %v601_v37  ;;  %v618_v57 = vsel %vm611_vm3, %v615_v13, %v5608_v9  ;;  %v619_v58 = vsel %vm611_vm3, %v5608_v9, %v615_v13  ;;  %v5609_v37 = vld [vmem:[#allocation68_spill] sm:$0xff]  ;;  %vm4115_vm3 = vmand %vm596_vm14, %vm597_vm15  ;;  %v970_v4 = vstv %s4074_s27  ;;  %s4654_s27 = sld [smem:[#allocation3 + $0x53]] }
 0x45e   : > { %5602 = vst [vmem:[#allocation61_spill] sm:$0xff] %v4063_v42  ;;  %v692_v21 = vadd.f32 %v690_v27, %v3490_v16  ;;  %v626_v25 = vmul.f32 %v625_v43, %v619_v58  ;;  %v627_v5 = vmul.f32 %v625_v43, %v618_v57  ;;  %v650_v6 = vsel %vm643_vm2, %v647_v28, %v5609_v37  ;;  %v5612_v27 = vld [vmem:[#allocation77_spill] sm:$0xff]  ;;  %s4986_s14 = sld [smem:[#allocation3 + $0x5e]] }
 0x45f   : > { %v651_v13 = vsel %vm643_vm2, %v5609_v37, %v647_v28  ;;  %v659_v16 = vmul.f32 %v657_v12, %v650_v6  ;;  %v776_v43 = vsel %vm769_vm13, %v773_v52, %v5612_v27  ;;  %v777_v9 = vsel %vm769_vm13, %v5612_v27, %v773_v52  ;;  %vm4145_vm13 = vmand %vm630_vm4, %vm597_vm15 }
 0x460   : > { %v629_v57 = vadd.f32 %v627_v5, %v3441_v45  ;;  %v658_v58 = vmul.f32 %v657_v12, %v651_v13  ;;  %v815_v42 = vstv %s4033_s19  ;;  %v697_v28 = vsel %vm602_vm1, %v692_v21, %v696_v53  ;;  %s4450_s19 = sld [smem:[#allocation3 + $0x4d]] }
 0x461   : > { %v661_v37 = vadd.f32 %v659_v16, %v3480_v15  ;;  %v785_v6 = vmul.f32 %v783_v1, %v776_v43  ;;  %v605_v52 = vsel %vm4115_vm3, %v603_v61, 0.0  ;;  %v628_v12 = vadd.f32 %v626_v25, %v3439_v8  ;;  %vm4169_vm3 = vmand %vm662_vm7, %vm597_vm15 }
 0x462   : > { %v634_v15 = vrot.slane %v629_v57, 7  ;;  %v784_v5 = vmul.f32 %v783_v1, %v777_v9  ;;  %vm756_vm2 = vcmp.lt.s32.totalorder %v4046_v36, 14  ;;  %v660_v21 = vadd.f32 %v658_v58, %v3478_v11  ;;  %v5620_v9 = vld [vmem:[#allocation75_spill] sm:$0xff] }
 0x463   : > { %v666_v61 = vrot.slane %v661_v37, 7  ;;  %v787_v53 = vadd.f32 %v785_v6, %v3552_v59  ;;  %v909_v8 = vstv %s4083_s3  ;;  %v699_v1 = vsel %vm597_vm15, %v697_v28, 0.0  ;;  %v741_v58 = vpop.permute.xlu0 %740  ;;  %v868_v28 = vpop.permute.xlu2 %867  ;;  %s4722_s3 = sld [smem:[#allocation3 + $0x56]] }
 0x464   : > { %v635_v25 = vsel %vm602_vm1, %v628_v12, %v634_v15  ;;  %v709_v11 = vpop.permute.xlu1 %708  ;;  %v939_v59 = vstv %s4091_s4  ;;  %v786_v6 = vadd.f32 %v784_v5, %v3550_v47  ;;  %v5621_v12 = vstv %s3985_s29  ;;  %s4342_s29 = sld [smem:[#allocation3 + $0x4a]] }
 0x465   : > { %v637_v16 = vsel %vm4145_vm13, %v635_v25, 0.0  ;;  %v667_v27 = vsel %vm602_vm1, %v660_v21, %v666_v61  ;;  %v792_v43 = vrot.slane %v787_v53, 7  ;;  %v712_v57 = vsel %vm705_vm12, %v709_v11, %v5620_v9  ;;  %v5623_v25 = vld [vmem:[#allocation73_spill] sm:$0xff]  ;;  %vm4227_vm13 = vmand %vm724_vm9, %vm597_vm15  ;;  %s4786_s4 = sld [smem:[#allocation3 + $0x55]] }
 0x466   : > { %v638_v37 = vadd.f32 %v637_v16, %v605_v52  ;;  %v713_v45 = vsel %vm705_vm12, %v5620_v9, %v709_v11  ;;  %v721_v15 = vmul.f32 %v5621_v12, %v712_v57  ;;  %v669_v21 = vsel %vm4169_vm3, %v667_v27, 0.0  ;;  %vm4203_vm12 = vmand %vm788_vm0, %vm597_vm15 }
 0x467   : > { %v5622_v61 = vmov %v5621_v12  ;;  %v744_v13 = vsel %vm737_vm11, %v741_v58, %v5623_v25  ;;  %v745_v47 = vsel %vm737_vm11, %v5623_v25, %v741_v58  ;;  %v793_v7 = vsel %vm602_vm1, %v786_v6, %v792_v43  ;;  %v5628_v58 = vld [vmem:[#allocation80_spill] sm:$0xff]  ;;  %v5631_v6 = vld [vmem:[#allocation17_spill] sm:$0xff] }
 0x468   : > { %v720_v53 = vmul.f32 %v5622_v61, %v713_v45  ;;  %v670_v52 = vadd.f32 %v669_v21, %v638_v37  ;;  %v723_v11 = vadd.f32 %v721_v15, %v3506_v48  ;;  %v5626_v16 = vstv %s3997_s30  ;;  %2049 = vrot.lane.b32.xlu1 %v5631_v6, %s5616_s10  ;;  %v5640_v48 = vld [vmem:[#allocation76_spill] sm:$0xff]  ;;  %s4377_s30 = sld [smem:[#allocation3 + $0x47]] }
 0x469   : > { %v752_v27 = vmul.f32 %v5626_v16, %v745_v47  ;;  %v5627_v9 = vmov %v5626_v16  ;;  %vm820_vm11 = vcmp.ge.s32.totalorder %v4041_v2, 2  ;;  %v871_v37 = vsel %vm864_vm10, %v868_v28, %v5628_v58 }
 0x46a   : > { %v753_v57 = vmul.f32 %v5627_v9, %v744_v13  ;;  %v872_v45 = vsel %vm864_vm10, %v5628_v58, %v868_v28  ;;  %v1001_v12 = vstv %s4132_s0  ;;  %v722_v13 = vadd.f32 %v720_v53, %v3504_v63  ;;  %vm4256_vm10 = vmand %vm756_vm2, %vm597_vm15  ;;  %s4830_s0 = sld [smem:[#allocation3 + $0x57]] }
 0x46b   : > { %v728_v43 = vrot.slane %v723_v11, 7  ;;  %v1032_v28 = vstv %s4137_s11  ;;  %v1156_v15 = vstv %s4155_s15  ;;  %v795_v21 = vsel %vm4203_vm12, %v793_v7, 0.0  ;;  %v837_v7 = vpop.permute.xlu0 %836  ;;  %s4847_s11 = sld [smem:[#allocation3 + $0x58]] }
 0x46c   : > { %v700_v61 = vadd.f32 %v699_v1, %v670_v52  ;;  %v755_v25 = vadd.f32 %v753_v57, %v3543_v19  ;;  %v5632_v47 = vstv %s4009_s6  ;;  %v754_v53 = vadd.f32 %v752_v27, %v3530_v14  ;;  %v805_v58 = vpop.permute.xlu1 %804  ;;  %v5637_v52 = vld [vmem:[#allocation78_spill] sm:$0xff]  ;;  %v960_v27 = vpop.permute.xlu2 %959  ;;  %s4391_s6 = sld [smem:[#allocation3 + $0x48]] }
 0x46d   : > { %v880_v16 = vmul.f32 %v5632_v47, %v871_v37  ;;  %v729_v63 = vsel %vm602_vm1, %v722_v13, %v728_v43  ;;  %v5634_v11 = vmov %v5632_v47  ;;  %v1095_v6 = vstv %s4175_s13  ;;  %s4916_s15 = sld [smem:[#allocation3 + $0x5b]] }
 0x46e   : > { %v879_v9 = vmul.f32 %v5634_v11, %v872_v45  ;;  %v731_v1 = vsel %vm4227_vm13, %v729_v63, 0.0  ;;  %v760_v44 = vrot.slane %v755_v25, 7  ;;  %vm5638_vm3 = vcmp.lt.s32.totalorder %v2931_v55, 35 }
 0x46f   : > { %v882_v14 = vadd.f32 %v880_v16, %v3620_v22  ;;  %v808_v5 = vsel %vm5638_vm3, %v805_v58, %v5637_v52  ;;  %v732_v57 = vadd.f32 %v731_v1, %v700_v61  ;;  %vm5639_vm12 = vmmov %vm5638_vm3  ;;  %vm5641_vm15 = vcmp.lt.s32.totalorder %v2931_v55, 34  ;;  %v5643_v1 = vld [vmem:[#allocation83_spill] sm:$0xff] }
 0x470   : > { %v809_v37 = vsel %vm5639_vm12, %v5637_v52, %v805_v58  ;;  %v817_v45 = vmul.f32 %v815_v42, %v808_v5  ;;  %v840_v13 = vsel %vm5641_vm15, %v837_v7, %v5640_v48  ;;  %v761_v22 = vsel %vm602_vm1, %v754_v53, %v760_v44  ;;  %vm5642_vm13 = vmmov %vm5641_vm15 }
 0x471   : > { %v886_v43 = vrot.slane %v882_v14, 7  ;;  %v816_v25 = vmul.f32 %v815_v42, %v809_v37  ;;  %v841_v61 = vsel %vm5642_vm13, %v5640_v48, %v837_v7  ;;  %v763_v47 = vsel %vm4256_vm10, %v761_v22, 0.0  ;;  %vm4296_vm10 = vmand %vm596_vm14, %vm820_vm11  ;;  %v5653_v22 = vld [vmem:[#allocation81_spill] sm:$0xff] }
 0x472   : > { %v819_v16 = vadd.f32 %v817_v45, %v3566_v0  ;;  %v848_v63 = vmul.f32 %v847_v24, %v841_v61  ;;  %v849_v11 = vmul.f32 %v847_v24, %v840_v13  ;;  %v764_v58 = vadd.f32 %v763_v47, %v732_v57  ;;  %v5648_v57 = vld [vmem:[#allocation26_spill] sm:$0xff]  ;;  %vm4319_vm15 = vmand %vm630_vm4, %vm820_vm11 }
 0x473   : > { %v881_v53 = vadd.f32 %v879_v9, %v3606_v3  ;;  %vm5644_vm3 = vcmp.lt.s32.totalorder %v2931_v55, 30  ;;  %v1126_v44 = vstv %s4221_s18  ;;  %v818_v24 = vadd.f32 %v816_v25, %v3564_v41  ;;  %2056 = vrot.lane.b32.xlu2 %v5648_v57, %s5616_s10  ;;  %vm4329_vm13 = vmand %vm662_vm7, %vm820_vm11  ;;  %v929_v25 = vpop.permute.xlu0 %928  ;;  %s4886_s10 = sld [smem:[#allocation3 + $0x5a]] }
 0x474   : > { %v963_v42 = vsel %vm5644_vm3, %v960_v27, %v5643_v1  ;;  %v824_v19 = vrot.slane %v819_v16, 7  ;;  %v851_v3 = vadd.f32 %v849_v11, %v3595_v18  ;;  %v1249_v9 = vstv %s4236_s2  ;;  %vm5647_vm12 = vmmov %vm5644_vm3  ;;  %v899_v45 = vpop.permute.xlu1 %898  ;;  %v1054_v61 = vpop.permute.xlu2 %1053  ;;  %s4959_s2 = sld [smem:[#allocation3 + $0x5d]] }
 0x475   : > { %v887_v14 = vsel %vm602_vm1, %v881_v53, %v886_v43  ;;  %v850_v52 = vadd.f32 %v848_v63, %v3593_v50  ;;  %v964_v5 = vsel %vm5647_vm12, %v5643_v1, %v960_v27  ;;  %v972_v7 = vmul.f32 %v970_v4, %v963_v42  ;;  %v5656_v1 = vld [vmem:[#allocation79_spill] sm:$0xff] }
 0x476   : > { %v796_v41 = vadd.f32 %v795_v21, %v764_v58  ;;  %v825_v37 = vsel %vm602_vm1, %v818_v24, %v824_v19  ;;  %v855_v50 = vrot.slane %v851_v3, 7  ;;  %v971_v27 = vmul.f32 %v970_v4, %v964_v5  ;;  %v5661_v5 = vld [vmem:[#allocation86_spill] sm:$0xff] }
 0x477   : > { %v827_v48 = vsel %vm4296_vm10, %v825_v37, 0.0  ;;  %v974_v13 = vadd.f32 %v972_v7, %v3665_v60  ;;  %vm5654_vm3 = vcmp.lt.s32.totalorder %v2931_v55, 32  ;;  %vm5657_vm10 = vcmp.lt.s32.totalorder %v2931_v55, 31 }
 0x478   : > { %v902_v43 = vsel %vm5654_vm3, %v899_v45, %v5653_v22  ;;  %vm5655_vm12 = vmmov %vm5654_vm3  ;;  %v828_v47 = vadd.f32 %v827_v48, %v796_v41  ;;  %v856_v16 = vsel %vm602_vm1, %v850_v52, %v855_v50  ;;  %v973_v63 = vadd.f32 %v971_v27, %v3659_v33  ;;  %v5669_v33 = vld [vmem:[#allocation82_spill] sm:$0xff] }
 0x479   : > { %v903_v4 = vsel %vm5655_vm12, %v5653_v22, %v899_v45  ;;  %v858_v11 = vsel %vm4319_vm15, %v856_v16, 0.0  ;;  %v978_v58 = vrot.slane %v974_v13, 7  ;;  %v911_v53 = vmul.f32 %v909_v8, %v902_v43  ;;  %vm4361_vm3 = vmand %vm756_vm2, %vm820_vm11 }
 0x47a   : > { %v910_v60 = vmul.f32 %v909_v8, %v903_v4  ;;  %v932_v42 = vsel %vm5657_vm10, %v929_v25, %v5656_v1  ;;  %v889_v0 = vsel %vm4329_vm13, %v887_v14, 0.0  ;;  %v859_v24 = vadd.f32 %v858_v11, %v828_v47  ;;  %vm5660_vm15 = vmmov %vm5657_vm10 }
 0x47b   : > { %v933_v8 = vsel %vm5660_vm15, %v5656_v1, %v929_v25  ;;  %v941_v19 = vmul.f32 %v939_v59, %v932_v42  ;;  %v979_v3 = vsel %vm602_vm1, %v973_v63, %v978_v58  ;;  %v913_v14 = vadd.f32 %v911_v53, %v3634_v23  ;;  %v1022_v16 = vpop.permute.xlu0 %1021 }
 0x47c   : > { %v940_v52 = vmul.f32 %v939_v59, %v933_v8  ;;  %v1057_v7 = vsel %vm1050_vm8, %v1054_v61, %v5661_v5  ;;  %vm1037_vm13 = vcmp.ge.s32.totalorder %v4041_v2, 1  ;;  %v1058_v41 = vsel %vm1050_vm8, %v5661_v5, %v1054_v61  ;;  %vm4397_vm8 = vmand %vm724_vm9, %vm820_vm11  ;;  %v991_v43 = vpop.permute.xlu1 %990  ;;  %v5666_v61 = vld [vmem:[#allocation84_spill] sm:$0xff]  ;;  %v1146_v63 = vpop.permute.xlu2 %1145 }
 0x47d   : > { %v943_v57 = vadd.f32 %v941_v19, %v3657_v31  ;;  %v1187_v37 = vstv %s4290_s26  ;;  %v1218_v18 = vstv %s4303_s20  ;;  %v981_v23 = vsel %vm4361_vm3, %v979_v3, 0.0  ;;  %v5672_v3 = vld [vmem:[#allocation89_spill] sm:$0xff]  ;;  %s5008_s26 = sld [smem:[#allocation3 + $0x60]] }
 0x47e   : > { %v912_v59 = vadd.f32 %v910_v60, %v3622_v62  ;;  %v916_v50 = vrot.slane %v913_v14, 7  ;;  %v5662_v27 = vstv %s4097_s25  ;;  %v890_v31 = vadd.f32 %v889_v0, %v859_v24  ;;  %s4813_s25 = sld [smem:[#allocation3 + $0x59]] }
 0x47f   : > { %v1066_v45 = vmul.f32 %v5662_v27, %v1057_v7  ;;  %v942_v48 = vadd.f32 %v940_v52, %v3644_v26  ;;  %v947_v13 = vrot.slane %v943_v57, 7  ;;  %v5665_v22 = vmov %v5662_v27  ;;  %s5057_s20 = sld [smem:[#allocation3 + $0x61]] }
 0x480   : > { %v1065_v62 = vmul.f32 %v5665_v22, %v1058_v41  ;;  %v917_v4 = vsel %vm602_vm1, %v912_v59, %v916_v50  ;;  %vm5667_vm12 = vcmp.lt.s32.totalorder %v2931_v55, 29  ;;  %v1355_v60 = vstv %s4342_s29  ;;  %s5069_s29 = sld [smem:[#allocation3 + $0x30]] }
 0x481   : > { %v1068_v25 = vadd.f32 %v1066_v45, %v3738_v29  ;;  %v994_v47 = vsel %vm5667_vm12, %v991_v43, %v5666_v61  ;;  %v919_v26 = vsel %vm820_vm11, %v917_v4, 0.0  ;;  %v948_v11 = vsel %vm602_vm1, %v942_v48, %v947_v13  ;;  %vm5668_vm10 = vmmov %vm5667_vm12 }
 0x482   : > { %v995_v58 = vsel %vm5668_vm10, %v5666_v61, %v991_v43  ;;  %v1003_v29 = vmul.f32 %v1001_v12, %v994_v47  ;;  %v920_v53 = vadd.f32 %v919_v26, %v890_v31  ;;  %v950_v1 = vsel %vm4397_vm8, %v948_v11, 0.0  ;;  %vm4440_vm8 = vmand %vm788_vm0, %vm820_vm11  ;;  %v5682_v26 = vld [vmem:[#allocation85_spill] sm:$0xff]  ;;  %v5697_v61 = vld [vmem:[#allocation19_spill] sm:$0xff] }
 0x483   : > { %v1072_v42 = vrot.slane %v1068_v25, 7  ;;  %v1002_v0 = vmul.f32 %v1001_v12, %v995_v58  ;;  %vm5670_vm3 = vcmp.lt.s32.totalorder %v2931_v55, 19  ;;  %v1149_v14 = vsel %vm1142_vm5, %v1146_v63, %v5672_v3  ;;  %v1116_v43 = vpop.permute.xlu0 %1115  ;;  %vm4480_vm12 = vmand %vm596_vm14, %vm1037_vm13 }
 0x484   : > { %v1005_v24 = vadd.f32 %v1003_v29, %v3684_v10  ;;  %v1025_v8 = vsel %vm5670_vm3, %v1022_v16, %v5669_v33  ;;  %vm5671_vm15 = vmmov %vm5670_vm3  ;;  %v951_v52 = vadd.f32 %v950_v1, %v920_v53  ;;  %v1067_v12 = vadd.f32 %v1065_v62, %v3736_v40  ;;  %v1085_v13 = vpop.permute.xlu1 %1084  ;;  %v1239_v4 = vpop.permute.xlu2 %1238 }
 0x485   : > { %v1026_v19 = vsel %vm5671_vm15, %v5669_v33, %v1022_v16  ;;  %v1279_v10 = vstv %s4377_s30  ;;  %v1004_v57 = vadd.f32 %v1002_v0, %v3682_v56  ;;  %v1034_v59 = vmul.f32 %v1032_v28, %v1025_v8  ;;  %vm4502_vm3 = vmand %vm724_vm9, %vm1037_vm13  ;;  %v5685_v8 = vld [vmem:[#allocation92_spill] sm:$0xff]  ;;  %s5865_s30 = sld [smem:[#allocation8_spill]] }
 0x486   : > { %v1033_v5 = vmul.f32 %v1032_v28, %v1026_v19  ;;  %v1009_v41 = vrot.slane %v1005_v24, 7  ;;  %v1150_v40 = vsel %vm1142_vm5, %v5672_v3, %v1146_v63  ;;  %v1073_v50 = vsel %vm602_vm1, %v1067_v12, %v1072_v42  ;;  %vm4465_vm5 = vmand %vm630_vm4, %vm1037_vm13 }
 0x487   : > { %v1157_v27 = vmul.f32 %v1156_v15, %v1150_v40  ;;  %v1158_v45 = vmul.f32 %v1156_v15, %v1149_v14  ;;  %v1309_v31 = vstv %s4391_s6  ;;  %v982_v21 = vadd.f32 %v981_v23, %v951_v52  ;;  %vm4525_vm15 = vmand %vm662_vm7, %vm1037_vm13 }
 0x488   : > { %v1010_v56 = vsel %vm602_vm1, %v1004_v57, %v1009_v41  ;;  %v1035_v48 = vadd.f32 %v1033_v5, %v3709_v30  ;;  %v1036_v28 = vadd.f32 %v1034_v59, %v3711_v54  ;;  %v5677_v30 = vld [vmem:[#allocation87_spill] sm:$0xff]  ;;  %vm5678_vm11 = vcmp.lt.s32.totalorder %v2931_v55, 17 }
 0x489   : > { %v1012_v15 = vsel %vm4440_vm8, %v1010_v56, 0.0  ;;  %v1159_v23 = vadd.f32 %v1157_v27, %v3772_v20  ;;  %v1160_v62 = vadd.f32 %v1158_v45, %v3809_v34  ;;  %v1088_v54 = vsel %vm5678_vm11, %v1085_v13, %v5677_v30  ;;  %vm5681_vm10 = vmmov %vm5678_vm11  ;;  %v5690_v45 = vld [vmem:[#allocation117_spill] sm:$0xff]  ;;  %v5691_v56 = vld [vmem:[#allocation90_spill] sm:$0xff] }
 0x48a   : > { %v1013_v25 = vadd.f32 %v1012_v15, %v982_v21  ;;  %v1041_v20 = vrot.slane %v1036_v28, 7  ;;  %v1089_v34 = vsel %vm5681_vm10, %v5677_v30, %v1085_v13  ;;  %v1097_v47 = vmul.f32 %v1095_v6, %v1088_v54 }
 0x48b   : > { %v1164_v16 = vrot.slane %v1160_v62, 7  ;;  %v1096_v63 = vmul.f32 %v1095_v6, %v1089_v34  ;;  %v1119_v11 = vsel %vm1112_vm6, %v1116_v43, %v5682_v26  ;;  %v1120_v58 = vsel %vm1112_vm6, %v5682_v26, %v1116_v43  ;;  %v1208_v28 = vpop.permute.xlu0 %1207  ;;  %v5695_v43 = vld [vmem:[#allocation88_spill] sm:$0xff] }
 0x48c   : > { %v1042_v29 = vsel %vm602_vm1, %v1035_v48, %v1041_v20  ;;  %v1099_v6 = vadd.f32 %v1097_v47, %v3748_v38  ;;  %v1127_v1 = vmul.f32 %v1126_v44, %v1120_v58  ;;  %v1128_v42 = vmul.f32 %v1126_v44, %v1119_v11  ;;  %v1345_v13 = vpop.permute.xlu2 %1344  ;;  %v5701_v58 = vld [vmem:[#allocation18_spill] sm:$0xff] }
 0x48d   : > { %v1075_v0 = vsel %vm4465_vm5, %v1073_v50, 0.0  ;;  %v1044_v24 = vsel %vm4480_vm12, %v1042_v29, 0.0  ;;  %v1165_v33 = vsel %vm602_vm1, %v1159_v23, %v1164_v16  ;;  %vm5686_vm6 = vcmp.lt.s32.totalorder %v2931_v55, 3  ;;  %v1177_v50 = vpop.permute.xlu1 %1176 }
 0x48e   : > { %v1242_v19 = vsel %vm5686_vm6, %v1239_v4, %v5685_v8  ;;  %v1045_v38 = vadd.f32 %v1044_v24, %v1013_v25  ;;  %v1098_v3 = vadd.f32 %v1096_v63, %v3740_v51  ;;  %v1103_v14 = vrot.slane %v1099_v6, 7  ;;  %vm5689_vm8 = vmmov %vm5686_vm6  ;;  %v5702_v6 = vld [vmem:[#allocation113_spill] sm:$0xff]  ;;  %v5705_v24 = vld [vmem:[#allocation112_spill] sm:$0xff] }
 0x48f   : > { %v1445_v52 = vstv %s4450_s19  ;;  %v1167_v12 = vsel %vm4502_vm3, %v1165_v33, 0.0  ;;  %v1130_v5 = vadd.f32 %v1128_v42, %v3756_v17  ;;  %v1243_v7 = vsel %vm5689_vm8, %v5685_v8, %v1239_v4  ;;  %vm4579_vm3 = vmand %vm756_vm2, %vm1037_vm13  ;;  %v5703_v42 = vld [vmem:[#allocation95_spill] sm:$0xff] }
 0x490   : > { %v1251_v57 = vmul.f32 %v1249_v9, %v1242_v19  ;;  %v1076_v41 = vadd.f32 %v1075_v0, %v1045_v38  ;;  %v1104_v59 = vsel %vm602_vm1, %v1098_v3, %v1103_v14  ;;  %v1129_v51 = vadd.f32 %v1127_v1, %v3750_v46  ;;  %v5693_v46 = vld [vmem:[#allocation116_spill] sm:$0xff]  ;;  %vm4600_vm8 = vmand %vm788_vm0, %vm1037_vm13 }
 0x491   : > { %v1250_v40 = vmul.f32 %v1249_v9, %v1243_v7  ;;  %v1106_v17 = vsel %vm4525_vm15, %v1104_v59, 0.0  ;;  %v1133_v27 = vrot.slane %v1130_v5, 7  ;;  %vm5692_vm5 = vcmp.lt.s32.totalorder %v2931_v55, 14 }
 0x492   : > { %v1253_v21 = vadd.f32 %v1251_v57, %v5690_v45  ;;  %v1180_v48 = vsel %vm5692_vm5, %v1177_v50, %v5691_v56  ;;  %v1107_v22 = vadd.f32 %v1106_v17, %v1076_v41  ;;  %vm5694_vm11 = vmmov %vm5692_vm5  ;;  %vm5696_vm12 = vcmp.lt.s32.totalorder %v2931_v55, 13  ;;  %v5709_v41 = vld [vmem:[#allocation93_spill] sm:$0xff] }
 0x493   : > { %v1252_v15 = vadd.f32 %v1250_v40, %v5693_v46  ;;  %v1181_v9 = vsel %vm5694_vm11, %v5691_v56, %v1177_v50  ;;  %v1189_v23 = vmul.f32 %v1187_v37, %v1180_v48  ;;  %v1134_v62 = vsel %vm602_vm1, %v1129_v51, %v1133_v27  ;;  %vm5698_vm10 = vmmov %vm5696_vm12  ;;  %v1299_v40 = vpop.permute.xlu0 %1298  ;;  %v5712_v27 = vld [vmem:[#allocation23_spill] sm:$0xff] }
 0x494   : > { %v1256_v30 = vrot.slane %v1253_v21, 7  ;;  %v1188_v54 = vmul.f32 %v1187_v37, %v1181_v9  ;;  %v1211_v4 = vsel %vm5696_vm12, %v1208_v28, %v5695_v43  ;;  %v1136_v25 = vsel %vm1037_vm13, %v1134_v62, 0.0 }
 0x495   : > { %v1191_v20 = vadd.f32 %v1189_v23, %v5697_v61  ;;  %v1212_v34 = vsel %vm5698_vm10, %v5695_v43, %v1208_v28  ;;  %v1220_v47 = vmul.f32 %v1218_v18, %v1211_v4  ;;  %v1137_v16 = vadd.f32 %v1136_v25, %v1107_v22  ;;  %v1269_v5 = vpop.permute.xlu1 %1268  ;;  %v5713_v28 = vld [vmem:[#allocation91_spill] sm:$0xff]  ;;  %v5718_v43 = vld [vmem:[#allocation98_spill] sm:$0xff] }
 0x496   : > { %v1257_v63 = vsel %vm602_vm1, %v1252_v15, %v1256_v30  ;;  %v1219_v37 = vmul.f32 %v1218_v18, %v1212_v34  ;;  %v1385_v26 = vstv %s4519_s17  ;;  %v1190_v29 = vadd.f32 %v1188_v54, %v5701_v58  ;;  %v5716_v15 = vld [vmem:[#allocation22_spill] sm:$0xff]  ;;  %v5717_v30 = vld [vmem:[#allocation119_spill] sm:$0xff] }
 0x497   : > { %v1195_v53 = vrot.slane %v1191_v20, 7  ;;  %v1222_v1 = vadd.f32 %v1220_v47, %v5702_v6  ;;  %vm5704_vm6 = vcmp.lt.s32.totalorder %v2931_v55, 127  ;;  %v1168_v18 = vadd.f32 %v1167_v12, %v1137_v16  ;;  %v5721_v20 = vld [vmem:[#allocation118_spill] sm:$0xff] }
 0x498   : > { %v1348_v0 = vsel %vm5704_vm6, %v1345_v13, %v5703_v42  ;;  %v1221_v33 = vadd.f32 %v1219_v37, %v5705_v24  ;;  %vm5706_vm15 = vmmov %vm5704_vm6  ;;  %v1415_v19 = vstv %s4539_s7  ;;  %v1259_v7 = vsel %vm596_vm14, %v1257_v63, 0.0  ;;  %v5722_v37 = vld [vmem:[#allocation20_spill] sm:$0xff]  ;;  %s5871_s7 = sld [smem:[#allocation127_spill]] }
 0x499   : > { %v1349_v8 = vsel %vm5706_vm15, %v5703_v42, %v1345_v13  ;;  %v1196_v38 = vsel %vm602_vm1, %v1190_v29, %v1195_v53  ;;  %v1226_v3 = vrot.slane %v1222_v1, 7  ;;  %v1356_v14 = vmul.f32 %v1355_v60, %v1348_v0  ;;  %v5723_v53 = vld [vmem:[#allocation21_spill] sm:$0xff] }
 0x49a   : > { %v1357_v12 = vmul.f32 %v1355_v60, %v1349_v8  ;;  %v1198_v57 = vsel %vm4579_vm3, %v1196_v38, 0.0  ;;  %vm5710_vm13 = vcmp.lt.s32.totalorder %v2931_v55, 2  ;;  %v1435_v60 = vpop.permute.xlu2 %1434  ;;  %vm1450_vm11 = vcmp.lt.s32.totalorder %v4041_v2, 15  ;;  %v5724_v1 = vld [vmem:[#allocation29_spill] sm:$0xff]  ;;  %v5725_v8 = vld [vmem:[#allocation30_spill] sm:$0xff] }
 0x49b   : > { %v1272_v59 = vsel %vm5710_vm13, %v1269_v5, %v5709_v41  ;;  %vm5711_vm5 = vmmov %vm5710_vm13  ;;  %v1199_v50 = vadd.f32 %v1198_v57, %v1168_v18  ;;  %v1227_v17 = vsel %vm602_vm1, %v1221_v33, %v1226_v3  ;;  %vm5714_vm12 = vcmp.lt.s32.totalorder %v2931_v55, 1  ;;  %v1405_v3 = vpop.permute.xlu0 %1404  ;;  %v5729_v57 = vld [vmem:[#allocation94_spill] sm:$0xff] }
 0x49c   : > { %v1273_v51 = vsel %vm5711_vm5, %v5709_v41, %v1269_v5  ;;  %v1359_v45 = vadd.f32 %v1357_v12, %v5712_v27  ;;  %v1229_v56 = vsel %vm4600_vm8, %v1227_v17, 0.0  ;;  %v1281_v48 = vmul.f32 %v1279_v10, %v1272_v59  ;;  %vm5715_vm10 = vmmov %vm5714_vm12 }
 0x49d   : > { %v1280_v21 = vmul.f32 %v1279_v10, %v1273_v51  ;;  %v1302_v13 = vsel %vm5714_vm12, %v1299_v40, %v5713_v28  ;;  %v1303_v22 = vsel %vm5715_vm10, %v5713_v28, %v1299_v40  ;;  %v1230_v46 = vadd.f32 %v1229_v56, %v1199_v50  ;;  %v1375_v0 = vpop.permute.xlu1 %1374  ;;  %vm4696_vm12 = vmand %vm596_vm14, %vm1450_vm11 }
 0x49e   : > { %v1358_v9 = vadd.f32 %v1356_v14, %v5716_v15  ;;  %v1362_v23 = vrot.slane %v1359_v45, 7  ;;  %v1310_v62 = vmul.f32 %v1309_v31, %v1303_v22  ;;  %v1283_v54 = vadd.f32 %v1281_v48, %v5717_v30  ;;  %v5734_v48 = vld [vmem:[#allocation25_spill] sm:$0xff]  ;;  %v5735_v22 = vld [vmem:[#allocation24_spill] sm:$0xff]  ;;  %v5736_v15 = vld [vmem:[#allocation102_spill] sm:$0xff] }
 0x49f   : > { %v1311_v10 = vmul.f32 %v1309_v31, %v1302_v13  ;;  %vm5719_vm3 = vcmp.lt.s32.totalorder %v2931_v55, 115  ;;  %v1282_v34 = vadd.f32 %v1280_v21, %v5721_v20  ;;  %v1539_v16 = vstv %s4588_s21  ;;  %v5739_v30 = vld [vmem:[#allocation101_spill] sm:$0xff] }
 0x4a0   : > { %v1438_v4 = vsel %vm5719_vm3, %v1435_v60, %v5718_v43  ;;  %vm5720_vm6 = vmmov %vm5719_vm3  ;;  %v1363_v61 = vsel %vm602_vm1, %v1358_v9, %v1362_v23  ;;  %v1260_v63 = vadd.f32 %v1259_v7, %v1230_v46  ;;  %v1286_v31 = vrot.slane %v1283_v54, 7 }
 0x4a1   : > { %v1439_v25 = vsel %vm5720_vm6, %v5718_v43, %v1435_v60  ;;  %v1446_v47 = vmul.f32 %v1445_v52, %v1438_v4  ;;  %v1313_v11 = vadd.f32 %v1311_v10, %v5722_v37  ;;  %v1365_v29 = vsel %vm724_vm9, %v1363_v61, 0.0  ;;  %v5740_v43 = vld [vmem:[#allocation28_spill] sm:$0xff]  ;;  %v5741_v61 = vld [vmem:[#allocation27_spill] sm:$0xff] }
 0x4a2   : > { %v1447_v58 = vmul.f32 %v1445_v52, %v1439_v25  ;;  %v1312_v6 = vadd.f32 %v1310_v62, %v5723_v53  ;;  %v1477_v18 = vstv %s4608_s9  ;;  %v1287_v24 = vsel %vm602_vm1, %v1282_v34, %v1286_v31  ;;  %v5726_v52 = vld [vmem:[#allocation96_spill] sm:$0xff]  ;;  %v1529_v14 = vpop.permute.xlu2 %1528 }
 0x4a3   : > { %v1448_v42 = vadd.f32 %v1446_v47, %v5724_v1  ;;  %v1316_v33 = vrot.slane %v1313_v11, 7  ;;  %vm5727_vm15 = vcmp.lt.s32.totalorder %v2931_v55, 126  ;;  %v1289_v12 = vsel %vm630_vm4, %v1287_v24, 0.0 }
 0x4a4   : > { %v1449_v38 = vadd.f32 %v1447_v58, %v5725_v8  ;;  %v1378_v44 = vsel %vm5727_vm15, %v1375_v0, %v5726_v52  ;;  %vm5728_vm8 = vmmov %vm5727_vm15  ;;  %vm5730_vm13 = vcmp.lt.s32.totalorder %v2931_v55, 125  ;;  %v1290_v59 = vadd.f32 %v1289_v12, %v1260_v63  ;;  %v5742_v58 = vld [vmem:[#allocation35_spill] sm:$0xff]  ;;  %v5747_v12 = vld [vmem:[#allocation97_spill] sm:$0xff] }
 0x4a5   : > { %v1379_v5 = vsel %vm5728_vm8, %v5726_v52, %v1375_v0  ;;  %v1386_v7 = vmul.f32 %v1385_v26, %v1378_v44  ;;  %v1408_v41 = vsel %vm5730_vm13, %v1405_v3, %v5729_v57  ;;  %v1317_v51 = vsel %vm602_vm1, %v1312_v6, %v1316_v33  ;;  %vm5731_vm5 = vmmov %vm5730_vm13  ;;  %v1467_v47 = vpop.permute.xlu1 %1466  ;;  %v1498_v6 = vpop.permute.xlu0 %1497  ;;  %v5743_v0 = vld [vmem:[#allocation36_spill] sm:$0xff]  ;;  %v5744_v33 = vld [vmem:[#allocation99_spill] sm:$0xff] }
 0x4a6   : > { %v1454_v40 = vrot.slane %v1449_v38, 7  ;;  %v1387_v60 = vmul.f32 %v1385_v26, %v1379_v5  ;;  %v1319_v50 = vsel %vm662_vm7, %v1317_v51, 0.0  ;;  %v1409_v17 = vsel %vm5731_vm5, %v5729_v57, %v1405_v3 }
 0x4a7   : > { %v1416_v27 = vmul.f32 %v1415_v19, %v1408_v41  ;;  %v1508_v45 = vstv %s4638_s23  ;;  %v1320_v21 = vadd.f32 %v1319_v50, %v1290_v59  ;;  %v1417_v13 = vmul.f32 %v1415_v19, %v1409_v17  ;;  %v5750_v41 = vld [vmem:[#allocation32_spill] sm:$0xff]  ;;  %v5751_v50 = vld [vmem:[#allocation105_spill] sm:$0xff] }
 0x4a8   : > { %v1455_v26 = vsel %vm602_vm1, %v1448_v42, %v1454_v40  ;;  %v1389_v28 = vadd.f32 %v1387_v60, %v5734_v48  ;;  %v1388_v46 = vadd.f32 %v1386_v7, %v5735_v22  ;;  %vm5737_vm10 = vcmp.lt.s32.totalorder %v2931_v55, 112 }
 0x4a9   : > { %v1532_v9 = vsel %vm5737_vm10, %v1529_v14, %v5736_v15  ;;  %vm5738_vm3 = vmmov %vm5737_vm10  ;;  %v1631_v62 = vstv %s4654_s27  ;;  %v1336_v54 = vadd.f32 %v5739_v30, %v1320_v21  ;;  %v1419_v4 = vadd.f32 %v1417_v13, %v5740_v43  ;;  %v5757_v13 = vld [vmem:[#allocation33_spill] sm:$0xff] }
 0x4aa   : > { %v1533_v23 = vsel %vm5738_vm3, %v5736_v15, %v1529_v14  ;;  %v1392_v10 = vrot.slane %v1389_v28, 7  ;;  %v1540_v25 = vmul.f32 %v1539_v16, %v1532_v9  ;;  %v1457_v19 = vsel %vm4696_vm12, %v1455_v26, 0.0  ;;  %v1621_v1 = vpop.permute.xlu2 %1620  ;;  %vm4759_vm10 = vmand %vm630_vm4, %vm1450_vm11  ;;  %v5756_v26 = vld [vmem:[#allocation31_spill] sm:$0xff] }
 0x4ab   : > { %v1418_v20 = vadd.f32 %v1416_v27, %v5741_v61  ;;  %v1541_v34 = vmul.f32 %v1539_v16, %v1533_v23  ;;  %v1569_v63 = vstv %s4664_s8  ;;  %v1366_v31 = vadd.f32 %v1365_v29, %v1336_v54 }
 0x4ac   : > { %v1393_v37 = vsel %vm602_vm1, %v1388_v46, %v1392_v10  ;;  %v1422_v11 = vrot.slane %v1419_v4, 7  ;;  %v1542_v53 = vadd.f32 %v1540_v25, %v5742_v58  ;;  %vm5745_vm6 = vcmp.lt.s32.totalorder %v2931_v55, 114  ;;  %v5758_v46 = vld [vmem:[#allocation34_spill] sm:$0xff]  ;;  %v5759_v10 = vld [vmem:[#allocation103_spill] sm:$0xff] }
 0x4ad   : > { %v1395_v42 = vsel %vm756_vm2, %v1393_v37, 0.0  ;;  %v1543_v24 = vadd.f32 %v1541_v34, %v5743_v0  ;;  %v1470_v16 = vsel %vm5745_vm6, %v1467_v47, %v5744_v33  ;;  %vm5746_vm15 = vmmov %vm5745_vm6  ;;  %vm5748_vm8 = vcmp.lt.s32.totalorder %v2931_v55, 113  ;;  %v1559_v30 = vpop.permute.xlu1 %1558  ;;  %v1590_v25 = vpop.permute.xlu0 %1589 }
 0x4ae   : > { %v1471_v29 = vsel %vm5746_vm15, %v5744_v33, %v1467_v47  ;;  %v1396_v8 = vadd.f32 %v1395_v42, %v1366_v31  ;;  %v1423_v38 = vsel %vm602_vm1, %v1418_v20, %v1422_v11  ;;  %v1478_v52 = vmul.f32 %v1477_v18, %v1470_v16  ;;  %vm5749_vm13 = vmmov %vm5748_vm8  ;;  %v5764_v31 = vld [vmem:[#allocation40_spill] sm:$0xff]  ;;  %v5770_v16 = vld [vmem:[#allocation38_spill] sm:$0xff] }
 0x4af   : > { %v1479_v44 = vmul.f32 %v1477_v18, %v1471_v29  ;;  %v1425_v3 = vsel %vm788_vm0, %v1423_v38, 0.0  ;;  %v1546_v14 = vrot.slane %v1543_v24, 7  ;;  %v1501_v5 = vsel %vm5748_vm8, %v1498_v6, %v5747_v12  ;;  %vm4780_vm15 = vmand %vm662_vm7, %vm1450_vm11 }
 0x4b0   : > { %v1502_v7 = vsel %vm5749_vm13, %v5747_v12, %v1498_v6  ;;  %v1426_v57 = vadd.f32 %v1425_v3, %v1396_v8  ;;  %v1509_v51 = vmul.f32 %v1508_v45, %v1501_v5  ;;  %v1600_v40 = vstv %s4704_s16  ;;  %v5765_v6 = vld [vmem:[#allocation100_spill] sm:$0xff]  ;;  %v5771_v3 = vld [vmem:[#allocation37_spill] sm:$0xff] }
 0x4b1   : > { %v1481_v59 = vadd.f32 %v1479_v44, %v5750_v41  ;;  %v1547_v18 = vsel %vm602_vm1, %v1542_v53, %v1546_v14  ;;  %v1510_v60 = vmul.f32 %v1508_v45, %v1502_v7  ;;  %vm5752_vm5 = vcmp.lt.s32.totalorder %v2931_v55, 109  ;;  %v5772_v12 = vld [vmem:[#allocation108_spill] sm:$0xff]  ;;  %v5776_v41 = vld [vmem:[#allocation39_spill] sm:$0xff] }
 0x4b2   : > { %v1624_v17 = vsel %vm5752_vm5, %v1621_v1, %v5751_v50  ;;  %vm5753_vm12 = vmmov %vm5752_vm5  ;;  %v1549_v21 = vsel %vm1450_vm11, %v1547_v18, 0.0  ;;  %v1458_v45 = vadd.f32 %v1457_v19, %v1426_v57  ;;  %v1480_v48 = vadd.f32 %v1478_v52, %v5756_v26  ;;  %v1715_v61 = vpop.permute.xlu2 %1714 }
 0x4b3   : > { %v1625_v27 = vsel %vm5753_vm12, %v5751_v50, %v1621_v1  ;;  %v1485_v28 = vrot.slane %v1481_v59, 7  ;;  %v1511_v22 = vadd.f32 %v1509_v51, %v5757_v13  ;;  %v1512_v15 = vadd.f32 %v1510_v60, %v5758_v46  ;;  %vm4801_vm5 = vmand %vm788_vm0, %vm1450_vm11  ;;  %v5777_v51 = vld [vmem:[#allocation71_spill] sm:$0xff] }
 0x4b4   : > { %v1632_v9 = vmul.f32 %v1631_v62, %v1624_v17  ;;  %v1633_v23 = vmul.f32 %v1631_v62, %v1625_v27  ;;  %vm5760_vm3 = vcmp.lt.s32.totalorder %v2931_v55, 111  ;;  %v1725_v19 = vstv %s4722_s3 }
 0x4b5   : > { %v1486_v54 = vsel %vm602_vm1, %v1480_v48, %v1485_v28  ;;  %v1562_v43 = vsel %vm5760_vm3, %v1559_v30, %v5759_v10  ;;  %vm5761_vm6 = vmmov %vm5760_vm3  ;;  %v1516_v34 = vrot.slane %v1512_v15, 7  ;;  %vm5766_vm8 = vcmp.lt.s32.totalorder %v2931_v55, 110  ;;  %v1652_v56 = vpop.permute.xlu1 %1651  ;;  %v5781_v28 = vld [vmem:[#allocation106_spill] sm:$0xff] }
 0x4b6   : > { %v1563_v4 = vsel %vm5761_vm6, %v5759_v10, %v1559_v30  ;;  %v1488_v20 = vsel %vm4759_vm10, %v1486_v54, 0.0  ;;  %v1634_v47 = vadd.f32 %v1632_v9, %v3942_v49  ;;  %v1635_v37 = vadd.f32 %v1633_v23, %v5764_v31  ;;  %vm5767_vm13 = vmmov %vm5766_vm8  ;;  %v5784_v9 = vld [vmem:[#allocation46_spill] sm:$0xff] }
 0x4b7   : > { %v1489_v11 = vadd.f32 %v1488_v20, %v1458_v45  ;;  %v1570_v58 = vmul.f32 %v1569_v63, %v1562_v43  ;;  %v1571_v53 = vmul.f32 %v1569_v63, %v1563_v4  ;;  %v1593_v1 = vsel %vm5766_vm8, %v1590_v25, %v5765_v6  ;;  %vm4819_vm3 = vmand %vm724_vm9, %vm1450_vm11  ;;  %v5787_v20 = vld [vmem:[#allocation45_spill] sm:$0xff] }
 0x4b8   : > { %v1517_v42 = vsel %vm602_vm1, %v1511_v22, %v1516_v34  ;;  %v1639_v0 = vrot.slane %v1635_v37, 7  ;;  %v1594_v24 = vsel %vm5767_vm13, %v5765_v6, %v1590_v25  ;;  %v1601_v33 = vmul.f32 %v1600_v40, %v1593_v1  ;;  %v1684_v22 = vpop.permute.xlu0 %1683  ;;  %v5785_v25 = vld [vmem:[#allocation104_spill] sm:$0xff]  ;;  %v5789_v37 = vld [vmem:[#allocation42_spill] sm:$0xff]  ;;  %v5795_v63 = vld [vmem:[#allocation41_spill] sm:$0xff] }
 0x4b9   : > { %v1519_v49 = vsel %vm4780_vm15, %v1517_v42, 0.0  ;;  %v1573_v29 = vadd.f32 %v1571_v53, %v5770_v16  ;;  %v1602_v8 = vmul.f32 %v1600_v40, %v1594_v24  ;;  %v1662_v38 = vstv %s4744_s28  ;;  %vm4837_vm15 = vmand %vm756_vm2, %vm1450_vm11  ;;  %v5790_v42 = vld [vmem:[#allocation111_spill] sm:$0xff] }
 0x4ba   : > { %v1520_v52 = vadd.f32 %v1519_v49, %v1489_v11  ;;  %v1640_v44 = vsel %vm602_vm1, %v1634_v47, %v1639_v0  ;;  %v1572_v14 = vadd.f32 %v1570_v58, %v5771_v3  ;;  %vm1667_vm12 = vcmp.lt.s32.totalorder %v4041_v2, 14  ;;  %v1807_v46 = vpop.permute.xlu2 %1806 }
 0x4bb   : > { %vm5773_vm10 = vcmp.lt.s32.totalorder %v2931_v55, 97  ;;  %v1577_v57 = vrot.slane %v1573_v29, 7  ;;  %v1603_v59 = vadd.f32 %v1601_v33, %v5776_v41  ;;  %v1604_v40 = vadd.f32 %v1602_v8, %v5777_v51  ;;  %v5796_v8 = vld [vmem:[#allocation43_spill] sm:$0xff]  ;;  %v5800_v41 = vld [vmem:[#allocation109_spill] sm:$0xff] }
 0x4bc   : > { %v1718_v5 = vsel %vm5773_vm10, %v1715_v61, %v5772_v12  ;;  %vm5778_vm6 = vmmov %vm5773_vm10  ;;  %v1642_v60 = vsel %vm4801_vm5, %v1640_v44, 0.0  ;;  %v1550_v50 = vadd.f32 %v1549_v21, %v1520_v52  ;;  %vm5782_vm8 = vcmp.lt.s32.totalorder %v2931_v55, 99  ;;  %v5797_v52 = vld [vmem:[#allocation44_spill] sm:$0xff] }
 0x4bd   : > { %v1719_v18 = vsel %vm5778_vm6, %v5772_v12, %v1715_v61  ;;  %v1726_v17 = vmul.f32 %v1725_v19, %v1718_v5  ;;  %v1578_v45 = vsel %vm602_vm1, %v1572_v14, %v1577_v57  ;;  %v1608_v48 = vrot.slane %v1604_v40, 7  ;;  %vm5783_vm13 = vmmov %vm5782_vm8  ;;  %v1746_v5 = vpop.permute.xlu1 %1745 }
 0x4be   : > { %v1727_v27 = vmul.f32 %v1725_v19, %v1719_v18  ;;  %v1655_v21 = vsel %vm5782_vm8, %v1652_v56, %v5781_v28  ;;  %v1656_v13 = vsel %vm5783_vm13, %v5781_v28, %v1652_v56  ;;  %v1580_v15 = vsel %vm4819_vm3, %v1578_v45, 0.0  ;;  %vm4876_vm6 = vmand %vm596_vm14, %vm1667_vm12  ;;  %v5806_v45 = vld [vmem:[#allocation53_spill] sm:$0xff] }
 0x4bf   : > { %v1663_v30 = vmul.f32 %v1662_v38, %v1655_v21  ;;  %v1694_v54 = vstv %s4786_s4  ;;  %v1581_v10 = vadd.f32 %v1580_v15, %v1550_v50  ;;  %v1609_v43 = vsel %vm602_vm1, %v1603_v59, %v1608_v48  ;;  %v5825_v50 = vld [vmem:[#allocation110_spill] sm:$0xff] }
 0x4c0   : > { %v1729_v23 = vadd.f32 %v1727_v27, %v5784_v9  ;;  %v1664_v4 = vmul.f32 %v1662_v38, %v1656_v13  ;;  %vm5786_vm11 = vcmp.lt.s32.totalorder %v2931_v55, 98  ;;  %v1611_v61 = vsel %vm4837_vm15, %v1609_v43, 0.0  ;;  %vm4892_vm15 = vmand %vm662_vm7, %vm1667_vm12  ;;  %v1776_v18 = vpop.permute.xlu0 %1775  ;;  %v5805_v27 = vld [vmem:[#allocation51_spill] sm:$0xff]  ;;  %v5810_v43 = vld [vmem:[#allocation48_spill] sm:$0xff] }
 0x4c1   : > { %v1687_v19 = vsel %vm5786_vm11, %v1684_v22, %v5785_v25  ;;  %v1728_v62 = vadd.f32 %v1726_v17, %v5787_v20  ;;  %vm5788_vm5 = vmmov %vm5786_vm11  ;;  %v1612_v31 = vadd.f32 %v1611_v61, %v1581_v10  ;;  %v1817_v1 = vstv %s4813_s25  ;;  %v5811_v20 = vld [vmem:[#allocation47_spill] sm:$0xff] }
 0x4c2   : > { %v1733_v34 = vrot.slane %v1729_v23, 7  ;;  %v1688_v47 = vsel %vm5788_vm5, %v5785_v25, %v1684_v22  ;;  %v1666_v11 = vadd.f32 %v1664_v4, %v5789_v37  ;;  %v1695_v58 = vmul.f32 %v1694_v54, %v1687_v19  ;;  %vm4910_vm11 = vmand %vm630_vm4, %vm1667_vm12  ;;  %v1901_v48 = vpop.permute.xlu2 %1900  ;;  %v5807_v22 = vld [vmem:[#allocation107_spill] sm:$0xff]  ;;  %v5813_v37 = vld [vmem:[#allocation50_spill] sm:$0xff] }
 0x4c3   : > { %v1696_v53 = vmul.f32 %v1694_v54, %v1688_v47  ;;  %vm5791_vm10 = vcmp.lt.s32.totalorder %v2931_v55, 94  ;;  %v1643_v49 = vadd.f32 %v1642_v60, %v1612_v31  ;;  %v1665_v16 = vadd.f32 %v1663_v30, %v5795_v63 }
 0x4c4   : > { %v1734_v6 = vsel %vm602_vm1, %v1728_v62, %v1733_v34  ;;  %v1810_v0 = vsel %vm5791_vm10, %v1807_v46, %v5790_v42  ;;  %vm5792_vm3 = vmmov %vm5791_vm10  ;;  %v1671_v29 = vrot.slane %v1666_v11, 7  ;;  %v1697_v38 = vadd.f32 %v1695_v58, %v5796_v8  ;;  %v5812_v34 = vld [vmem:[#allocation49_spill] sm:$0xff] }
 0x4c5   : > { %v1811_v24 = vsel %vm5792_vm3, %v5790_v42, %v1807_v46  ;;  %v1698_v44 = vadd.f32 %v1696_v53, %v5797_v52  ;;  %v1818_v3 = vmul.f32 %v1817_v1, %v1810_v0  ;;  %v1756_v12 = vstv %s4830_s0  ;;  %v4939_v58 = vld [vmem:[%s5594_s12] ss:$2 sm:$0x3]  ;;  %v1838_v33 = vpop.permute.xlu1 %1837 }
 0x4c6   : > { %v1819_v14 = vmul.f32 %v1817_v1, %v1811_v24  ;;  %v1672_v57 = vsel %vm602_vm1, %v1665_v16, %v1671_v29  ;;  %vm5801_vm8 = vcmp.lt.s32.totalorder %v2931_v55, 96  ;;  %v1786_v40 = vstv %s4847_s11  ;;  %v5814_v1 = vld [vmem:[#allocation120_spill] sm:$0xff] }
 0x4c7   : > { %v1749_v59 = vsel %vm5801_vm8, %v1746_v5, %v5800_v41  ;;  %vm5802_vm13 = vmmov %vm5801_vm8  ;;  %v1674_v60 = vsel %vm4876_vm6, %v1672_v57, 0.0  ;;  %v1702_v17 = vrot.slane %v1698_v44, 7  ;;  %v1820_v56 = vadd.f32 %v1818_v3, %v5805_v27  ;;  %v5819_v44 = vld [vmem:[#allocation114_spill] sm:$0xff] }
 0x4c8   : > { %v1750_v51 = vsel %vm5802_vm13, %v5800_v41, %v1746_v5  ;;  %v1821_v26 = vadd.f32 %v1819_v14, %v5806_v45  ;;  %v1675_v28 = vadd.f32 %v1674_v60, %v1643_v49  ;;  %v1757_v21 = vmul.f32 %v1756_v12, %v1749_v59  ;;  %vm4955_vm8 = vmand %vm724_vm9, %vm1667_vm12  ;;  %v5824_v41 = vld [vmem:[#allocation74_spill] sm:$0xff]  ;;  %v5845_v5 = vld [vmem:[#allocation115_spill] sm:$0xff] }
 0x4c9   : > { %v1758_v13 = vmul.f32 %v1756_v12, %v1750_v51  ;;  %vm5808_vm5 = vcmp.lt.s32.totalorder %v2931_v55, 95  ;;  %v1703_v15 = vsel %vm602_vm1, %v1697_v38, %v1702_v17  ;;  %v1736_v54 = vsel %vm4892_vm15, %v1734_v6, 0.0  ;;  %v1869_v38 = vpop.permute.xlu0 %1868 }
 0x4ca   : > { %v1779_v46 = vsel %vm5808_vm5, %v1776_v18, %v5807_v22  ;;  %v1825_v9 = vrot.slane %v1821_v26, 7  ;;  %vm5809_vm10 = vmmov %vm5808_vm5  ;;  %v1705_v10 = vsel %vm4910_vm11, %v1703_v15, 0.0  ;;  %v1759_v62 = vadd.f32 %v1757_v21, %v5811_v20  ;;  %v1993_v27 = vpop.permute.xlu2 %1992 }
 0x4cb   : > { %v1780_v23 = vsel %vm5809_vm10, %v5807_v22, %v1776_v18  ;;  %v1787_v30 = vmul.f32 %v1786_v40, %v1779_v46  ;;  %v1760_v4 = vadd.f32 %v1758_v13, %v5810_v43  ;;  %v1706_v19 = vadd.f32 %v1705_v10, %v1675_v28  ;;  %vm4974_vm5 = vmand %vm756_vm2, %vm1667_vm12  ;;  %v5828_v28 = vld [vmem:[#allocation55_spill] sm:$0xff] }
 0x4cc   : > { %v1788_v25 = vmul.f32 %v1786_v40, %v1780_v23  ;;  %v1826_v61 = vsel %vm602_vm1, %v1820_v56, %v1825_v9  ;;  %vm1884_vm3 = vcmp.lt.s32.totalorder %v4939_v58, 13  ;;  %v1911_v53 = vstv %s4882_s5  ;;  %v5831_v23 = vld [vmem:[#allocation54_spill] sm:$0xff] }
 0x4cd   : > { %v1789_v47 = vadd.f32 %v1787_v30, %v5812_v34  ;;  %v1763_v31 = vrot.slane %v1760_v4, 7  ;;  %v1737_v6 = vadd.f32 %v1736_v54, %v1706_v19  ;;  %vm5815_vm6 = vcmp.lt.s32.totalorder %v2931_v55, 82  ;;  %v5832_v54 = vld [vmem:[#allocation52_spill] sm:$0xff]  ;;  %v5836_v4 = vld [vmem:[#allocation57_spill] sm:$0xff]  ;;  %v5837_v19 = vld [vmem:[#allocation58_spill] sm:$0xff] }
 0x4ce   : > { %v1790_v11 = vadd.f32 %v1788_v25, %v5813_v37  ;;  %v1904_v42 = vsel %vm5815_vm6, %v1901_v48, %v5814_v1  ;;  %vm5816_vm15 = vmmov %vm5815_vm6  ;;  %v1848_v24 = vstv %s4886_s10  ;;  %vm5820_vm13 = vcmp.lt.s32.totalorder %v2931_v55, 93  ;;  %v5839_v37 = vld [vmem:[#allocation121_spill] sm:$0xff] }
 0x4cf   : > { %v1905_v0 = vsel %vm5816_vm15, %v5814_v1, %v1901_v48  ;;  %v1764_v49 = vsel %vm602_vm1, %v1759_v62, %v1763_v31  ;;  %v1912_v29 = vmul.f32 %v1911_v53, %v1904_v42  ;;  %v1841_v3 = vsel %vm5820_vm13, %v1838_v33, %v5819_v44  ;;  %vm5821_vm11 = vmmov %vm5820_vm13  ;;  %v1932_v62 = vpop.permute.xlu1 %1931 }
 0x4d0   : > { %v1794_v16 = vrot.slane %v1790_v11, 7  ;;  %v1913_v8 = vmul.f32 %v1911_v53, %v1905_v0  ;;  %v1766_v52 = vsel %vm1667_vm12, %v1764_v49, 0.0  ;;  %v1842_v14 = vsel %vm5821_vm11, %v5819_v44, %v1838_v33  ;;  %vm5000_vm15 = vmand %vm788_vm0, %vm1667_vm12 }
 0x4d1   : > { %v1879_v12 = vstv %s4916_s15  ;;  %v1767_v7 = vadd.f32 %v1766_v52, %v1737_v6  ;;  %v1914_v59 = vadd.f32 %v1912_v29, %v5824_v41  ;;  %v1849_v18 = vmul.f32 %v1848_v24, %v1841_v3  ;;  %vm5014_vm13 = vmand %vm630_vm4, %vm1884_vm3 }
 0x4d2   : > { %v1795_v57 = vsel %vm602_vm1, %v1789_v47, %v1794_v16  ;;  %v1915_v51 = vadd.f32 %v1913_v8, %v4052_v32  ;;  %v1850_v60 = vmul.f32 %v1848_v24, %v1842_v14  ;;  %vm5826_vm10 = vcmp.lt.s32.totalorder %v2931_v55, 83  ;;  %vm5032_vm11 = vmand %vm596_vm14, %vm1884_vm3  ;;  %v1963_v24 = vpop.permute.xlu0 %1962  ;;  %v5844_v14 = vld [vmem:[#allocation60_spill] sm:$0xff] }
 0x4d3   : > { %v1797_v40 = vsel %vm4955_vm8, %v1795_v57, 0.0  ;;  %v1872_v17 = vsel %vm5826_vm10, %v1869_v38, %v5825_v50  ;;  %vm5827_vm6 = vmmov %vm5826_vm10  ;;  %v1828_v32 = vsel %vm4974_vm5, %v1826_v61, 0.0  ;;  %v2003_v22 = vstv %s4933_s24  ;;  %v5847_v57 = vld [vmem:[#allocation59_spill] sm:$0xff] }
 0x4d4   : > { %v1798_v56 = vadd.f32 %v1797_v40, %v1767_v7  ;;  %v1919_v45 = vrot.slane %v1915_v51, 7  ;;  %v1873_v26 = vsel %vm5827_vm6, %v5825_v50, %v1869_v38  ;;  %v1880_v48 = vmul.f32 %v1879_v12, %v1872_v17  ;;  %vm5064_vm6 = vmand %vm662_vm7, %vm1884_vm3  ;;  %v5851_v17 = vld [vmem:[#allocation63_spill] sm:$0xff] }
 0x4d5   : > { %v1852_v21 = vadd.f32 %v1850_v60, %v5828_v28  ;;  %v1881_v13 = vmul.f32 %v1879_v12, %v1873_v26  ;;  %v1851_v30 = vadd.f32 %v1849_v18, %v5831_v23  ;;  %vm5833_vm8 = vcmp.lt.s32.totalorder %v2931_v55, 79 }
 0x4d6   : > { %v1920_v46 = vsel %vm602_vm1, %v1914_v59, %v1919_v45  ;;  %v1829_v9 = vadd.f32 %v1828_v32, %v1798_v56  ;;  %v1996_v10 = vsel %vm5833_vm8, %v1993_v27, %v5832_v54  ;;  %v1882_v25 = vadd.f32 %v1880_v48, %v5836_v4  ;;  %vm5838_vm12 = vmmov %vm5833_vm8  ;;  %v5853_v32 = vld [vmem:[#allocation61_spill] sm:$0xff] }
 0x4d7   : > { %v1856_v43 = vrot.slane %v1852_v21, 7  ;;  %v1883_v61 = vadd.f32 %v1881_v13, %v5837_v19  ;;  %v1997_v20 = vsel %vm5838_vm12, %v5832_v54, %v1993_v27  ;;  %v2004_v34 = vmul.f32 %v2003_v22, %v1996_v10  ;;  %v2024_v26 = vpop.permute.xlu1 %2023  ;;  %v5854_v21 = vld [vmem:[#allocation56_spill] sm:$0xff]  ;;  %v5859_v4 = vld [vmem:[#allocation69_spill] sm:$0xff]  ;;  %vm5102_vm12 = vmand %vm756_vm2, %vm1884_vm3 }
 0x4d8   : > { %v2005_v47 = vmul.f32 %v2003_v22, %v1997_v20  ;;  %v1942_v31 = vstv %s4959_s2  ;;  %vm5840_vm4 = vcmp.lt.s32.totalorder %v2931_v55, 81  ;;  %v1922_v33 = vsel %vm5014_vm13, %v1920_v46, 0.0  ;;  %v5857_v46 = vld [vmem:[#allocation70_spill] sm:$0xff]  ;;  %vm2008_vm13 = vmand %vm724_vm9, %vm1884_vm3 }
 0x4d9   : > { %v1935_v11 = vsel %vm5840_vm4, %v1932_v62, %v5839_v37  ;;  %v1857_v53 = vsel %vm602_vm1, %v1851_v30, %v1856_v43  ;;  %v1888_v1 = vrot.slane %v1883_v61, 7  ;;  %vm5843_vm5 = vmmov %vm5840_vm4  ;;  %v2006_v38 = vadd.f32 %v2004_v34, %v4068_v39 }
 0x4da   : > { %v1936_v42 = vsel %vm5843_vm5, %v5839_v37, %v1932_v62  ;;  %v1943_v0 = vmul.f32 %v1942_v31, %v1935_v11  ;;  %v1859_v49 = vsel %vm5000_vm15, %v1857_v53, 0.0  ;;  %v2007_v63 = vadd.f32 %v2005_v47, %v4071_v35  ;;  %v2055_v20 = vpop.permute.xlu0 %2054  ;;  %v2057_v47 = vpop.permute.xlu2 %2056  ;;  %vm2070_vm9 = vmand %vm788_vm0, %vm1884_vm3 }
 0x4db   : > { %v1944_v16 = vmul.f32 %v1942_v31, %v1936_v42  ;;  %v1860_v29 = vadd.f32 %v1859_v49, %v1829_v9  ;;  %v1889_v8 = vsel %vm602_vm1, %v1882_v25, %v1888_v1  ;;  %v1973_v52 = vstv %s4986_s14  ;;  %v5875_v31 = vld [vmem:[#allocation10_spill] sm:$0xff] }
 0x4dc   : > { %v1891_v44 = vsel %vm5032_vm11, %v1889_v8, 0.0  ;;  %v2011_v3 = vrot.slane %v2007_v63, 7  ;;  %vm5846_vm14 = vcmp.lt.s32.totalorder %v2931_v55, 80  ;;  %v1945_v41 = vadd.f32 %v1943_v0, %v5847_v57 }
 0x4dd   : > { %v1946_v12 = vadd.f32 %v1944_v16, %v5844_v14  ;;  %v1966_v7 = vsel %vm5846_vm14, %v1963_v24, %v5845_v5  ;;  %v1892_v35 = vadd.f32 %v1891_v44, %v1860_v29  ;;  %vm5848_vm10 = vmmov %vm5846_vm14  ;;  %v2034_v50 = vstv %s5008_s26  ;;  %v5863_v29 = vld [vmem:[#allocation65_spill] sm:$0xff] }
 0x4de   : > { %v1967_v59 = vsel %vm5848_vm10, %v5845_v5, %v1963_v24  ;;  %v1974_v39 = vmul.f32 %v1973_v52, %v1966_v7  ;;  %v2012_v51 = vsel %vm602_vm1, %v2006_v38, %v2011_v3  ;;  %v5852_v27 = vstv %s3884_s1  ;;  %s2078_s1 = sld [smem:[#allocation2]] }
 0x4df   : > { %v1950_v18 = vrot.slane %v1946_v12, 7  ;;  %v1975_v60 = vmul.f32 %v1973_v52, %v1967_v59  ;;  %v1970_v56 = vmul.f32 %v5852_v27, %v5851_v17  ;;  %v1923_v45 = vadd.f32 %v1922_v33, %v1892_v35  ;;  %v2050_v49 = vpop.permute.xlu1 %2049 }
 0x4e0   : > { %vm5855_vm7 = vcmp.lt.s32.totalorder %v2931_v55, 78  ;;  %v5858_v15 = vstv %s3932_s22  ;;  %vm2051_vm8 = vcmp.lt.s32.totalorder %v2931_v55, 77  ;;  %v2065_v6 = vstv %s5057_s20  ;;  %s5864_s22 = sld [smem:[#allocation7_spill]] }
 0x4e1   : > { %v1951_v48 = vsel %vm602_vm1, %v1945_v41, %v1950_v18  ;;  %v1977_v28 = vadd.f32 %v1975_v60, %v5853_v32  ;;  %v2027_v13 = vsel %vm5855_vm7, %v2024_v26, %v5854_v21  ;;  %vm5856_vm15 = vmmov %vm5855_vm7  ;;  %v2032_v9 = vmul.f32 %v5858_v15, %v5857_v46 }
 0x4e2   : > { %v2028_v22 = vsel %vm5856_vm15, %v5854_v21, %v2024_v26  ;;  %v1953_v23 = vsel %vm5064_vm6, %v1951_v48, 0.0  ;;  %v2035_v30 = vmul.f32 %v2034_v50, %v2027_v13  ;;  %v1976_v2 = vadd.f32 %v1974_v39, %v1970_v56  ;;  %v5866_v21 = vld [vmem:[#allocation13_spill] sm:$0xff] }
 0x4e3   : > { %v2036_v54 = vmul.f32 %v2034_v50, %v2028_v22  ;;  %v1954_v10 = vadd.f32 %v1953_v23, %v1923_v45  ;;  %v1980_v43 = vrot.slane %v1977_v28, 7  ;;  %v5860_v25 = vmov %v5858_v15  ;;  %v5867_v22 = vld [vmem:[#allocation14_spill] sm:$0xff]  ;;  %v5868_v15 = vld [vmem:[#allocation11_spill] sm:$0xff]  ;;  %v5869_v23 = vld [vmem:[#allocation12_spill] sm:$0xff] }
 0x4e4   : > { %v2031_v19 = vmul.f32 %v5860_v25, %v5859_v4  ;;  %v2059_v1 = vsel %vm2051_vm8, %v2057_v47, %v2055_v20  ;;  %v2061_v42 = vstv %s5069_s29  ;;  %v2014_v0 = vsel %vm2008_vm13, %v2012_v51, 0.0  ;;  %v5874_v4 = vld [vmem:[#allocation9_spill] sm:$0xff] }
 0x4e5   : > { %v2038_v61 = vadd.f32 %v2036_v54, %v2032_v9  ;;  %v1981_v62 = vsel %vm602_vm1, %v1976_v2, %v1980_v43  ;;  %v2058_v33 = vsel %vm2051_vm8, %v2055_v20, %v2057_v47  ;;  %v2052_v8 = vsel %vm2051_vm8, %v5863_v29, %v2050_v49  ;;  %v5872_v54 = vld [vmem:[#allocation15_spill] sm:$0xff]  ;;  %v5873_v2 = vld [vmem:[#allocation16_spill] sm:$0xff]  ;;  %v2418_v20 = vld [vmem:[%s5865_s30 + $0x8] sm:$0xff] }
 0x4e6   : > { %v1983_v34 = vsel %vm1884_vm3, %v1981_v62, 0.0  ;;  %v2037_v37 = vadd.f32 %v2035_v30, %v2031_v19  ;;  %v2053_v38 = vsel %vm2051_vm8, %v2050_v49, %v5863_v29  ;;  %v2067_v52 = vmul.f32 %v2065_v6, %v2059_v1  ;;  %s5870_s6 = sshll.u32 %s5864_s22, 6  ;;  %v2417_v19 = vld [vmem:[%s5865_s30] sm:$0xff]  ;;  %v2424_v49 = vld [vmem:[%s5865_s30 + $0x38] sm:$0xff] }
 0x4e7   : > { %v2042_v11 = vrot.slane %v2038_v61, 7  ;;  %v1984_v53 = vadd.f32 %v1983_v34, %v1954_v10  ;;  %v2062_v44 = vmul.f32 %v2061_v42, %v2052_v8  ;;  %v2063_v3 = vmul.f32 %v2061_v42, %v2053_v38  ;;  %s266_s21 = scalar_lea.vmem %s5871_s7, %s5870_s6  ;;  %v2419_v34 = vld [vmem:[%s5865_s30 + $0x10] sm:$0xff]  ;;  %v2422_v42 = vld [vmem:[%s5865_s30 + $0x28] sm:$0xff] }
 0x4e8   : > { %v2066_v12 = vmul.f32 %v2065_v6, %v2058_v33  ;;  %v2079_v41 = vstv %s2078_s1  ;;  %v2421_v6 = vld [vmem:[%s5865_s30 + $0x20] sm:$0xff] }
 0x4e9   : > { %v2043_v24 = vsel %vm602_vm1, %v2037_v37, %v2042_v11  ;;  %v2015_v63 = vadd.f32 %v2014_v0, %v1984_v53  ;;  %v2069_v5 = vadd.f32 %v2067_v52, %v2063_v3  ;;  %v2420_v11 = vld [vmem:[%s5865_s30 + $0x18] sm:$0xff] }
 0x4ea   : > { %v2045_v16 = vsel %vm5102_vm12, %v2043_v24, 0.0  ;;  %v2068_v7 = vadd.f32 %v2066_v12, %v2062_v44  ;;  %v2423_v24 = vld [vmem:[%s5865_s30 + $0x30] sm:$0xff] }
 0x4eb   : > { %v2046_v14 = vadd.f32 %v2045_v16, %v2015_v63  ;;  %v2073_v35 = vrot.slane %v2069_v5, 7 }
 0x4ed   : > { %v2074_v57 = vsel %vm602_vm1, %v2068_v7, %v2073_v35 }
 0x4ee   : > { %v2076_v59 = vsel %vm2070_vm9, %v2074_v57, 0.0 }
 0x4ef   : > { %v2077_v39 = vadd.f32 %v2076_v59, %v2046_v14 }
 0x4f1   : > { %v2080_v55 = vadd.f32 %v2079_v41, %v2077_v39 }
 0x4f3   : > { %v2318_v51 = vmul.f32 -1.442695, %v2080_v55 }
 0x4f5   : > { %2412 = vpow2.f32 %v2318_v51 }
 0x4fb   : > { %v2413_v40 = vpop.eup %2412 }
 0x4fc   : > { %v2084_v18 = vadd.f32 1.0, %v2413_v40 }
 0x4fe   : > { %2414 = vrcp.f32 %v2084_v18  ;;  %v2096_v58 = vand.u32 2147483648, %v2084_v18  ;;  %v2094_v36 = vand.u32 2147483647, %v2084_v18  ;;  %vm2090_vm2 = vweird.f32 %v2084_v18 }
 0x500   : > { %v2097_v45 = vor.u32 1.1754944e-38, %v2096_v58  ;;  %vm2095_vm3 = vcmp.eq.f32.partialorder %v2094_v36, 8.507059e+37 }
 0x504   : > { %v2415_v60 = vpop.eup %2414 }
 0x505   : > { %v2086_v50 = vmul.f32 %v2415_v60, %v2084_v18  ;;  %vm2091_vm0 = vweird.f32 %v2415_v60 }
 0x506   : > { %vm2092_vm1 = vmor %vm2090_vm2, %vm2091_vm0 }
 0x507   : > { %v2087_v17 = vsub.f32 1.0, %v2086_v50 }
 0x509   : > { %v2088_v27 = vmul.f32 %v2415_v60, %v2087_v17 }
 0x50b   : > { %v2089_v56 = vadd.f32 %v2415_v60, %v2088_v27 }
 0x50d   : > { %v2093_v26 = vsel %vm2092_vm1, %v2415_v60, %v2089_v56 }
 0x50e   : > { %v2098_v48 = vsel %vm2095_vm3, %v2097_v45, %v2093_v26 }
 0x50f   : > { %v2101_v32 = vperm.slane %v2098_v48, 0  ;;  %v2102_v28 = vperm.slane %v2098_v48, 1 }
 0x511   : > { %v2105_v13 = vmul.f32 %v2101_v32, %v5866_v21  ;;  %v2106_v46 = vmul.f32 %v2102_v28, %v5867_v22  ;;  %v2107_v9 = vmul.f32 %v2101_v32, %v5868_v15  ;;  %v2108_v30 = vmul.f32 %v2102_v28, %v5869_v23 }
 0x512   : > { %v2109_v10 = vmul.f32 %v2101_v32, %v5872_v54  ;;  %v2110_v43 = vmul.f32 %v2102_v28, %v5873_v2  ;;  %v2111_v25 = vmul.f32 %v2101_v32, %v5874_v4  ;;  %v2112_v37 = vmul.f32 %v2102_v28, %v5875_v31 }
 0x513   : > { %v2113_v61 = vadd.f32 %v2417_v19, %v2105_v13  ;;  %v2114_v62 = vadd.f32 %v2418_v20, %v2106_v46  ;;  %v2115_v47 = vadd.f32 %v2419_v34, %v2107_v9  ;;  %v2116_v53 = vadd.f32 %v2420_v11, %v2108_v30 }
 0x514   : > { %v2117_v1 = vadd.f32 %v2421_v6, %v2109_v10  ;;  %v2118_v0 = vadd.f32 %v2422_v42, %v2110_v43  ;;  %v2119_v33 = vadd.f32 %v2423_v24, %v2111_v25  ;;  %v2120_v63 = vadd.f32 %v2424_v49, %v2112_v37 }
 0x515   : > { %2121 = vst [vmem:[%s266_s21] sm:$0xff] %v2113_v61 }
 0x516   : > { %2122 = vst [vmem:[%s266_s21 + $0x8] sm:$0xff] %v2114_v62 }
 0x517   : > { %2123 = vst [vmem:[%s266_s21 + $0x10] sm:$0xff] %v2115_v47 }
 0x518   : > { %2124 = vst [vmem:[%s266_s21 + $0x18] sm:$0xff] %v2116_v53 }
 0x519   : > { %2125 = vst [vmem:[%s266_s21 + $0x20] sm:$0xff] %v2117_v1 }
 0x51a   : > { %2126 = vst [vmem:[%s266_s21 + $0x28] sm:$0xff] %v2118_v0 }
 0x51b   : > { %2127 = vst [vmem:[%s266_s21 + $0x30] sm:$0xff] %v2119_v33 }
 0x51c   : > { %2128 = vst [vmem:[%s266_s21 + $0x38] sm:$0xff] %v2120_v63 }
 0x51d PF: > { %s5876_s9 = sld [smem:[#allocation6_spill]] }
 0x523   : > { %s18_s23 = sadd.s32 1, %s5876_s9  }
 0x524   : > { %p15_p7 = scmp.ge.s32.totalorder %s18_s23, 4  }
 0x526   :  { %17 = sbr.rel (!%p15_p7) target bundleno = 9 (0x9), region = 80 }
 0x52b   :  { %2150 = vsyncpa [#allocation4], 1 }
 0x52c   :  { %2152 = vsyncpa [#allocation4 + $0x1], 1 }

</bundles_post_ra>
